<compile_context>
chip_gen: v6e
topology: v6e:2x2x1
jax: 0.10.0
libtpu: 0.0.40
codegen_flags: <defaults>
</compile_context>

<pallas_src>
import jax
import jax.numpy as jnp
from jax.experimental import pallas as pl
from jax.experimental.pallas import tpu as pltpu

LANE = 128
SUBLANE = 8


def _round_up(x, m):
    return ((x + m - 1) // m) * m


def _pick_batch_tile(batch, requested):
    """Batch tile: multiple of 8 sublanes, big (amortize ~0.35us/step), but
    preferring >= 2 grid steps so v7x's two TensorCores both get work."""
    b8 = _round_up(batch, SUBLANE)
    tb = 512 if requested is None else requested
    tb = max(SUBLANE, min(_round_up(tb, SUBLANE), b8))
    if b8 // tb < 2 and b8 >= 2 * SUBLANE:
        tb = max(SUBLANE, _round_up(pl.cdiv(b8, 2), SUBLANE))
    return tb


# ---------------------------------------------------------------------------
# Kernel 1 (primary): fused embedding-gather + Linear/ReLU/Linear/ReLU/Linear.
# ---------------------------------------------------------------------------
def _fused_gather_mlp_kernel(tok_ref, l_ref, b1_ref, w2_ref, b2_ref,
                             w3_ref, b3_ref, out_ref):
    # tok: (tb, n_feat) int32
    # l:   (n_feat, vocab_p, h_pad)   b1: (1, h_pad)
    # w2:  (h_pad, h2_pad)            b2: (1, h2_pad)
    # w3:  (h2_pad, out_size)         b3: (1, out_size)
    tb = tok_ref.shape[0]
    n_feat = tok_ref.shape[1]
    vocab_p = l_ref.shape[1]
    h_pad = l_ref.shape[2]
    cd = l_ref.dtype

    # Loop-invariant lane ids, hoisted (JAX does not CSE broadcasts).
    lane_ids = jax.lax.broadcasted_iota(jnp.int32, (tb, vocab_p), 1)

    # Layer 1 as sum_f onehot(tokens[:, f]) @ L[f]  (replaces gather + matmul).
    acc = jnp.zeros((tb, h_pad), jnp.float32)
    for f in range(n_feat):                              # static unroll (36)
        tok_f = tok_ref[:, f:f + 1]                      # (tb, 1) int32
        onehot = (lane_ids == tok_f).astype(cd)          # (tb, vocab_p)
        acc = acc + jnp.dot(onehot, l_ref[f],
                            preferred_element_type=jnp.float32)

    h1 = jnp.maximum(acc + b1_ref[...], 0.0).astype(cd)          # ReLU (f32)
    h2 = jnp.dot(h1, w2_ref[...], preferred_element_type=jnp.float32) + b2_ref[...]
    h2 = jnp.maximum(h2, 0.0).astype(cd)
    logits = jnp.dot(h2, w3_ref[...], preferred_element_type=jnp.float32) + b3_ref[...]
    out_ref[...] = logits.astype(out_ref.dtype)


# ---------------------------------------------------------------------------
# Kernel 2 (fallback for huge vocabularies): streamed-x MLP, D_in unpadded.
# ---------------------------------------------------------------------------
def _mlp_kernel(x_ref, w1_ref, b1_ref, w2_ref, b2_ref, w3_ref, b3_ref, out_ref):
    cd = w2_ref.dtype
    h1 = jnp.dot(x_ref[...], w1_ref[...], preferred_element_type=jnp.float32) + b1_ref[...]
    h1 = jnp.maximum(h1, 0.0).astype(cd)
    h2 = jnp.dot(h1, w2_ref[...], preferred_element_type=jnp.float32) + b2_ref[...]
    h2 = jnp.maximum(h2, 0.0).astype(cd)
    logits = jnp.dot(h2, w3_ref[...], preferred_element_type=jnp.float32) + b3_ref[...]
    out_ref[...] = logits.astype(out_ref.dtype)


def parsing_model_forward(tokens, emb_table, w1, b1, w2, b2, w3, b3, *,
                          batch_tile=None, compute_dtype=jnp.float32,
                          fused_table_limit_bytes=8 << 20):
    """ParsingModel forward pass.

    tokens:    (B, n_features) int32
    emb_table: (vocab, emb)    float32
    w1: (emb*n_features, hidden)   b1: (hidden,)
    w2: (hidden, hidden//2)        b2: (hidden//2,)
    w3: (hidden//2, out_size)      b3: (out_size,)
    returns (B, out_size) float32 logits.

    compute_dtype=jnp.bfloat16 enables bf16 MXU inputs (f32 accumulation,
    f32 bias add / ReLU on the VPU) for production batches on v5e/v6e/v7x.
    """
    B, n_feat = tokens.shape
    vocab, emb = emb_table.shape
    d_in = n_feat * emb
    hid, hid2, out_size = w1.shape[1], w2.shape[1], w3.shape[1]

    h_pad = _round_up(hid, LANE)
    h2_pad = _round_up(hid2, LANE)
    vocab_p = _round_up(vocab, LANE)
    cd = jnp.dtype(compute_dtype)
    csize = cd.itemsize

    tb = _pick_batch_tile(B, batch_tile)
    b_pad = _round_up(B, tb)
    grid = (b_pad // tb,)

    # Small padded weights, VMEM-resident across grid steps (constant block
    # index).  Zero padding keeps padded lanes exactly 0 through ReLU, so no
    # in-kernel masking is needed; padded batch rows are sliced off at the end.
    w2p = jnp.pad(w2, ((0, h_pad - hid), (0, h2_pad - hid2))).astype(cd)
    w3p = jnp.pad(w3, ((0, h2_pad - hid2), (0, 0))).astype(cd)   # narrow out lanes
    b1p = jnp.pad(b1, (0, h_pad - hid)).reshape(1, h_pad).astype(jnp.float32)
    b2p = jnp.pad(b2, (0, h2_pad - hid2)).reshape(1, h2_pad).astype(jnp.float32)
    b3p = b3.reshape(1, out_size).astype(jnp.float32)

    weight_specs = [
        pl.BlockSpec((1, h_pad), lambda i: (0, 0)),
        pl.BlockSpec((h_pad, h2_pad), lambda i: (0, 0)),
        pl.BlockSpec((1, h2_pad), lambda i: (0, 0)),
        pl.BlockSpec((h2_pad, out_size), lambda i: (0, 0)),
        pl.BlockSpec((1, out_size), lambda i: (0, 0)),
    ]
    out_spec = pl.BlockSpec((tb, out_size), lambda i: (i, 0))   # narrow write
    out_shape = jax.ShapeDtypeStruct((b_pad, out_size), jnp.float32)
    cparams = pltpu.CompilerParams(dimension_semantics=("parallel",))

    table_bytes = n_feat * vocab_p * h_pad * csize
    if table_bytes <= fused_table_limit_bytes:
        # ---- primary path: fused embedding gather; only tokens stream ----
        l_tab = jnp.einsum("ve,feh->fvh", emb_table,
                           w1.reshape(n_feat, emb, hid),
                           precision=jax.lax.Precision.HIGHEST)
        l_tab = jnp.pad(l_tab, ((0, 0), (0, vocab_p - vocab),
                                (0, h_pad - hid))).astype(cd)
        tok_p = jnp.pad(tokens.astype(jnp.int32), ((0, b_pad - B), (0, 0)))

        flops = 2 * b_pad * (n_feat * vocab_p * h_pad
                             + h_pad * h2_pad + h2_pad * out_size)
        bytes_accessed = (tok_p.size * 4 + l_tab.size * csize
                          + (w2p.size + w3p.size) * csize
                          + (b1p.size + b2p.size + b3p.size) * 4
                          + b_pad * out_size * 4)

        out = pl.pallas_call(
            _fused_gather_mlp_kernel,
            out_shape=out_shape,
            grid_spec=pltpu.PrefetchScalarGridSpec(
                num_scalar_prefetch=0,
                grid=grid,
                in_specs=[
                    pl.BlockSpec((tb, n_feat), lambda i: (i, 0)),
                    pl.BlockSpec((n_feat, vocab_p, h_pad), lambda i: (0, 0, 0)),
                ] + weight_specs,
                out_specs=out_spec,
            ),
            compiler_params=cparams,
            cost_estimate=pl.CostEstimate(flops=flops, transcendentals=0,
                                          bytes_accessed=bytes_accessed),
        )(tok_p, l_tab, b1p, w2p, b2p, w3p, b3p)
    else:
        # ---- fallback: XLA gather + streamed x (no D_in lane padding) ----
        # TODO(synk): for huge vocabularies, DMA-gather emb rows in-kernel
        # instead of materializing x in HBM.
        x = jnp.take(emb_table, tokens, axis=0).reshape(B, d_in).astype(cd)
        xp = jnp.pad(x, ((0, b_pad - B), (0, 0)))
        w1p = jnp.pad(w1, ((0, 0), (0, h_pad - hid))).astype(cd)

        flops = 2 * b_pad * (d_in * h_pad + h_pad * h2_pad + h2_pad * out_size)
        bytes_accessed = (xp.size * csize + (w1p.size + w2p.size + w3p.size) * csize
                          + (b1p.size + b2p.size + b3p.size) * 4
                          + b_pad * out_size * 4)

        out = pl.pallas_call(
            _mlp_kernel,
            out_shape=out_shape,
            grid_spec=pltpu.PrefetchScalarGridSpec(
                num_scalar_prefetch=0,
                grid=grid,
                in_specs=[
                    pl.BlockSpec((tb, d_in), lambda i: (i, 0)),
                    pl.BlockSpec((d_in, h_pad), lambda i: (0, 0)),
                ] + weight_specs,
                out_specs=out_spec,
            ),
            compiler_params=cparams,
            cost_estimate=pl.CostEstimate(flops=flops, transcendentals=0,
                                          bytes_accessed=bytes_accessed),
        )(xp, w1p, b1p, w2p, b2p, w3p, b3p)

    return out[:B]


def _reference_forward(tokens, emb_table, w1, b1, w2, b2, w3, b3):
    hp = jax.lax.Precision.HIGHEST
    x = jnp.take(emb_table, tokens, axis=0).reshape(tokens.shape[0], -1)
    h1 = jnp.maximum(jnp.dot(x, w1, precision=hp) + b1, 0.0)
    h2 = jnp.maximum(jnp.dot(h1, w2, precision=hp) + b2, 0.0)
    return jnp.dot(h2, w3, precision=hp) + b3


if __name__ == "__main__":
    # Small shapes consistent with the module (use_dep=False -> 36 features).
    batch = 8
    n_features = 36
    vocab_size = 64
    embedding_size = 8          # D_in = 288
    hidden_size = 32            # hidden_layer2 out = 16
    out_size = 8

    key = jax.random.PRNGKey(0)
    k_tok, k_emb, k_w1, k_b1, k_w2, k_b2, k_w3, k_b3 = jax.random.split(key, 8)

    tokens = jax.random.randint(k_tok, (batch, n_features), 0, vocab_size,
                                dtype=jnp.int32)
    emb_table = jax.random.normal(k_emb, (vocab_size, embedding_size),
                                  dtype=jnp.float32)

    d_in = embedding_size * n_features

    def xavier_uniform(k, fan_in, fan_out):   # matches nn.init.xavier_uniform_
        limit = (6.0 / (fan_in + fan_out)) ** 0.5
        return jax.random.uniform(k, (fan_in, fan_out), jnp.float32, -limit, limit)

    # Weights stored (in, out) = W.T of the PyTorch Linear layers.
    w1 = xavier_uniform(k_w1, d_in, hidden_size)
    b1 = jax.random.uniform(k_b1, (hidden_size,), jnp.float32, -0.05, 0.05)
    w2 = xavier_uniform(k_w2, hidden_size, hidden_size // 2)
    b2 = jax.random.uniform(k_b2, (hidden_size // 2,), jnp.float32, -0.05, 0.05)
    w3 = xavier_uniform(k_w3, hidden_size // 2, out_size)
    b3 = jax.random.uniform(k_b3, (out_size,), jnp.float32, -0.05, 0.05)

    ref = _reference_forward(tokens, emb_table, w1, b1, w2, b2, w3, b3)

    # Primary path: fused embedding-gather kernel.
    logits = parsing_model_forward(tokens, emb_table, w1, b1, w2, b2, w3, b3)
    logits = jax.block_until_ready(logits)
    assert logits.shape == (batch, out_size)
    assert jnp.allclose(logits, ref, atol=1e-4, rtol=1e-4), "fused path mismatch"

    # Fallback path (large-vocab regime): XLA gather + streamed-x kernel.
    logits_fb = parsing_model_forward(tokens, emb_table, w1, b1, w2, b2, w3, b3,
                                      fused_table_limit_bytes=0)
    logits_fb = jax.block_until_ready(logits_fb)
    assert jnp.allclose(logits_fb, ref, atol=1e-4, rtol=1e-4), "fallback path mismatch"

    print("KERNEL_OK")
</pallas_src>

<mosaic_0001>
module attributes {stable_mosaic.version = 11 : i64} {
  func.func @_fused_gather_mlp_kernel(%arg0: i32, %arg1: memref<8x36xi32, #tpu.memory_space<vmem>>, %arg2: memref<36x128x128xf32, #tpu.memory_space<vmem>>, %arg3: memref<1x128xf32, #tpu.memory_space<vmem>>, %arg4: memref<128x128xf32, #tpu.memory_space<vmem>>, %arg5: memref<1x128xf32, #tpu.memory_space<vmem>>, %arg6: memref<128x8xf32, #tpu.memory_space<vmem>>, %arg7: memref<1x8xf32, #tpu.memory_space<vmem>>, %arg8: memref<8x8xf32, #tpu.memory_space<vmem>>) attributes {dimension_semantics = [#tpu.dimension_semantics<parallel>], iteration_bounds = array<i64: 1>, scalar_prefetch = 0 : i64, scratch_operands = 0 : i64, tpu.core_type = #tpu.core_type<tc>, window_params = [{transform_indices = @transform_0, window_bounds = array<i64: 8, 36>}, {pipeline_mode = #tpu.pipeline_mode<synchronous>, transform_indices = @transform_1, window_bounds = array<i64: 36, 128, 128>}, {pipeline_mode = #tpu.pipeline_mode<synchronous>, transform_indices = @transform_2, window_bounds = array<i64: 1, 128>}, {pipeline_mode = #tpu.pipeline_mode<synchronous>, transform_indices = @transform_3, window_bounds = array<i64: 128, 128>}, {pipeline_mode = #tpu.pipeline_mode<synchronous>, transform_indices = @transform_4, window_bounds = array<i64: 1, 128>}, {pipeline_mode = #tpu.pipeline_mode<synchronous>, transform_indices = @transform_5, window_bounds = array<i64: 128, 8>}, {pipeline_mode = #tpu.pipeline_mode<synchronous>, transform_indices = @transform_6, window_bounds = array<i64: 1, 8>}, {transform_indices = @transform_7, window_bounds = array<i64: 8, 8>}]} {
    %0 = tpu.iota {dimensions = array<i32: 1>} : vector<8x128xi32>
    %cst = arith.constant 0.000000e+00 : f32
    %1 = vector.broadcast %cst : f32 to vector<8x128xf32>
    %c0 = arith.constant 0 : index
    %c0_0 = arith.constant 0 : index
    %2 = vector.load %arg1[%c0, %c0_0] : memref<8x36xi32, #tpu.memory_space<vmem>>, vector<8x1xi32>
    %3 = vector.broadcast %2 : vector<8x1xi32> to vector<8x128xi32>
    %4 = arith.cmpi eq, %0, %3 : vector<8x128xi32>
    %5 = arith.extui %4 : vector<8x128xi1> to vector<8x128xi32>
    %6 = arith.sitofp %5 : vector<8x128xi32> to vector<8x128xf32>
    %c0_1 = arith.constant 0 : index
    %c0_2 = arith.constant 0 : index
    %c0_3 = arith.constant 0 : index
    %7 = vector.load %arg2[%c0_1, %c0_2, %c0_3] : memref<36x128x128xf32, #tpu.memory_space<vmem>>, vector<1x128x128xf32>
    %8 = vector.shape_cast %7 : vector<1x128x128xf32> to vector<128x128xf32>
    %cst_4 = arith.constant dense<0.000000e+00> : vector<8x128xf32>
    %9 = tpu.matmul %6, %8, %cst_4 {dimension_numbers = #tpu.dot_dimension_numbers<[1], [0], [0], [1], [0, 0, 1, 1], [], []>} : vector<8x128xf32>, vector<128x128xf32>, vector<8x128xf32> -> vector<8x128xf32>
    %10 = arith.addf %1, %9 : vector<8x128xf32>
    %c0_5 = arith.constant 0 : index
    %c1 = arith.constant 1 : index
    %11 = vector.load %arg1[%c0_5, %c1] : memref<8x36xi32, #tpu.memory_space<vmem>>, vector<8x1xi32>
    %12 = vector.broadcast %11 : vector<8x1xi32> to vector<8x128xi32>
    %13 = arith.cmpi eq, %0, %12 : vector<8x128xi32>
    %14 = arith.extui %13 : vector<8x128xi1> to vector<8x128xi32>
    %15 = arith.sitofp %14 : vector<8x128xi32> to vector<8x128xf32>
    %c1_6 = arith.constant 1 : index
    %c0_7 = arith.constant 0 : index
    %c0_8 = arith.constant 0 : index
    %16 = vector.load %arg2[%c1_6, %c0_7, %c0_8] : memref<36x128x128xf32, #tpu.memory_space<vmem>>, vector<1x128x128xf32>
    %17 = vector.shape_cast %16 : vector<1x128x128xf32> to vector<128x128xf32>
    %cst_9 = arith.constant dense<0.000000e+00> : vector<8x128xf32>
    %18 = tpu.matmul %15, %17, %cst_9 {dimension_numbers = #tpu.dot_dimension_numbers<[1], [0], [0], [1], [0, 0, 1, 1], [], []>} : vector<8x128xf32>, vector<128x128xf32>, vector<8x128xf32> -> vector<8x128xf32>
    %19 = arith.addf %10, %18 : vector<8x128xf32>
    %c0_10 = arith.constant 0 : index
    %c2 = arith.constant 2 : index
    %20 = vector.load %arg1[%c0_10, %c2] : memref<8x36xi32, #tpu.memory_space<vmem>>, vector<8x1xi32>
    %21 = vector.broadcast %20 : vector<8x1xi32> to vector<8x128xi32>
    %22 = arith.cmpi eq, %0, %21 : vector<8x128xi32>
    %23 = arith.extui %22 : vector<8x128xi1> to vector<8x128xi32>
    %24 = arith.sitofp %23 : vector<8x128xi32> to vector<8x128xf32>
    %c2_11 = arith.constant 2 : index
    %c0_12 = arith.constant 0 : index
    %c0_13 = arith.constant 0 : index
    %25 = vector.load %arg2[%c2_11, %c0_12, %c0_13] : memref<36x128x128xf32, #tpu.memory_space<vmem>>, vector<1x128x128xf32>
    %26 = vector.shape_cast %25 : vector<1x128x128xf32> to vector<128x128xf32>
    %cst_14 = arith.constant dense<0.000000e+00> : vector<8x128xf32>
    %27 = tpu.matmul %24, %26, %cst_14 {dimension_numbers = #tpu.dot_dimension_numbers<[1], [0], [0], [1], [0, 0, 1, 1], [], []>} : vector<8x128xf32>, vector<128x128xf32>, vector<8x128xf32> -> vector<8x128xf32>
    %28 = arith.addf %19, %27 : vector<8x128xf32>
    %c0_15 = arith.constant 0 : index
    %c3 = arith.constant 3 : index
    %29 = vector.load %arg1[%c0_15, %c3] : memref<8x36xi32, #tpu.memory_space<vmem>>, vector<8x1xi32>
    %30 = vector.broadcast %29 : vector<8x1xi32> to vector<8x128xi32>
    %31 = arith.cmpi eq, %0, %30 : vector<8x128xi32>
    %32 = arith.extui %31 : vector<8x128xi1> to vector<8x128xi32>
    %33 = arith.sitofp %32 : vector<8x128xi32> to vector<8x128xf32>
    %c3_16 = arith.constant 3 : index
    %c0_17 = arith.constant 0 : index
    %c0_18 = arith.constant 0 : index
    %34 = vector.load %arg2[%c3_16, %c0_17, %c0_18] : memref<36x128x128xf32, #tpu.memory_space<vmem>>, vector<1x128x128xf32>
    %35 = vector.shape_cast %34 : vector<1x128x128xf32> to vector<128x128xf32>
    %cst_19 = arith.constant dense<0.000000e+00> : vector<8x128xf32>
    %36 = tpu.matmul %33, %35, %cst_19 {dimension_numbers = #tpu.dot_dimension_numbers<[1], [0], [0], [1], [0, 0, 1, 1], [], []>} : vector<8x128xf32>, vector<128x128xf32>, vector<8x128xf32> -> vector<8x128xf32>
    %37 = arith.addf %28, %36 : vector<8x128xf32>
    %c0_20 = arith.constant 0 : index
    %c4 = arith.constant 4 : index
    %38 = vector.load %arg1[%c0_20, %c4] : memref<8x36xi32, #tpu.memory_space<vmem>>, vector<8x1xi32>
    %39 = vector.broadcast %38 : vector<8x1xi32> to vector<8x128xi32>
    %40 = arith.cmpi eq, %0, %39 : vector<8x128xi32>
    %41 = arith.extui %40 : vector<8x128xi1> to vector<8x128xi32>
    %42 = arith.sitofp %41 : vector<8x128xi32> to vector<8x128xf32>
    %c4_21 = arith.constant 4 : index
    %c0_22 = arith.constant 0 : index
    %c0_23 = arith.constant 0 : index
    %43 = vector.load %arg2[%c4_21, %c0_22, %c0_23] : memref<36x128x128xf32, #tpu.memory_space<vmem>>, vector<1x128x128xf32>
    %44 = vector.shape_cast %43 : vector<1x128x128xf32> to vector<128x128xf32>
    %cst_24 = arith.constant dense<0.000000e+00> : vector<8x128xf32>
    %45 = tpu.matmul %42, %44, %cst_24 {dimension_numbers = #tpu.dot_dimension_numbers<[1], [0], [0], [1], [0, 0, 1, 1], [], []>} : vector<8x128xf32>, vector<128x128xf32>, vector<8x128xf32> -> vector<8x128xf32>
    %46 = arith.addf %37, %45 : vector<8x128xf32>
    %c0_25 = arith.constant 0 : index
    %c5 = arith.constant 5 : index
    %47 = vector.load %arg1[%c0_25, %c5] : memref<8x36xi32, #tpu.memory_space<vmem>>, vector<8x1xi32>
    %48 = vector.broadcast %47 : vector<8x1xi32> to vector<8x128xi32>
    %49 = arith.cmpi eq, %0, %48 : vector<8x128xi32>
    %50 = arith.extui %49 : vector<8x128xi1> to vector<8x128xi32>
    %51 = arith.sitofp %50 : vector<8x128xi32> to vector<8x128xf32>
    %c5_26 = arith.constant 5 : index
    %c0_27 = arith.constant 0 : index
    %c0_28 = arith.constant 0 : index
    %52 = vector.load %arg2[%c5_26, %c0_27, %c0_28] : memref<36x128x128xf32, #tpu.memory_space<vmem>>, vector<1x128x128xf32>
    %53 = vector.shape_cast %52 : vector<1x128x128xf32> to vector<128x128xf32>
    %cst_29 = arith.constant dense<0.000000e+00> : vector<8x128xf32>
    %54 = tpu.matmul %51, %53, %cst_29 {dimension_numbers = #tpu.dot_dimension_numbers<[1], [0], [0], [1], [0, 0, 1, 1], [], []>} : vector<8x128xf32>, vector<128x128xf32>, vector<8x128xf32> -> vector<8x128xf32>
    %55 = arith.addf %46, %54 : vector<8x128xf32>
    %c0_30 = arith.constant 0 : index
    %c6 = arith.constant 6 : index
    %56 = vector.load %arg1[%c0_30, %c6] : memref<8x36xi32, #tpu.memory_space<vmem>>, vector<8x1xi32>
    %57 = vector.broadcast %56 : vector<8x1xi32> to vector<8x128xi32>
    %58 = arith.cmpi eq, %0, %57 : vector<8x128xi32>
    %59 = arith.extui %58 : vector<8x128xi1> to vector<8x128xi32>
    %60 = arith.sitofp %59 : vector<8x128xi32> to vector<8x128xf32>
    %c6_31 = arith.constant 6 : index
    %c0_32 = arith.constant 0 : index
    %c0_33 = arith.constant 0 : index
    %61 = vector.load %arg2[%c6_31, %c0_32, %c0_33] : memref<36x128x128xf32, #tpu.memory_space<vmem>>, vector<1x128x128xf32>
    %62 = vector.shape_cast %61 : vector<1x128x128xf32> to vector<128x128xf32>
    %cst_34 = arith.constant dense<0.000000e+00> : vector<8x128xf32>
    %63 = tpu.matmul %60, %62, %cst_34 {dimension_numbers = #tpu.dot_dimension_numbers<[1], [0], [0], [1], [0, 0, 1, 1], [], []>} : vector<8x128xf32>, vector<128x128xf32>, vector<8x128xf32> -> vector<8x128xf32>
    %64 = arith.addf %55, %63 : vector<8x128xf32>
    %c0_35 = arith.constant 0 : index
    %c7 = arith.constant 7 : index
    %65 = vector.load %arg1[%c0_35, %c7] : memref<8x36xi32, #tpu.memory_space<vmem>>, vector<8x1xi32>
    %66 = vector.broadcast %65 : vector<8x1xi32> to vector<8x128xi32>
    %67 = arith.cmpi eq, %0, %66 : vector<8x128xi32>
    %68 = arith.extui %67 : vector<8x128xi1> to vector<8x128xi32>
    %69 = arith.sitofp %68 : vector<8x128xi32> to vector<8x128xf32>
    %c7_36 = arith.constant 7 : index
    %c0_37 = arith.constant 0 : index
    %c0_38 = arith.constant 0 : index
    %70 = vector.load %arg2[%c7_36, %c0_37, %c0_38] : memref<36x128x128xf32, #tpu.memory_space<vmem>>, vector<1x128x128xf32>
    %71 = vector.shape_cast %70 : vector<1x128x128xf32> to vector<128x128xf32>
    %cst_39 = arith.constant dense<0.000000e+00> : vector<8x128xf32>
    %72 = tpu.matmul %69, %71, %cst_39 {dimension_numbers = #tpu.dot_dimension_numbers<[1], [0], [0], [1], [0, 0, 1, 1], [], []>} : vector<8x128xf32>, vector<128x128xf32>, vector<8x128xf32> -> vector<8x128xf32>
    %73 = arith.addf %64, %72 : vector<8x128xf32>
    %c0_40 = arith.constant 0 : index
    %c8 = arith.constant 8 : index
    %74 = vector.load %arg1[%c0_40, %c8] : memref<8x36xi32, #tpu.memory_space<vmem>>, vector<8x1xi32>
    %75 = vector.broadcast %74 : vector<8x1xi32> to vector<8x128xi32>
    %76 = arith.cmpi eq, %0, %75 : vector<8x128xi32>
    %77 = arith.extui %76 : vector<8x128xi1> to vector<8x128xi32>
    %78 = arith.sitofp %77 : vector<8x128xi32> to vector<8x128xf32>
    %c8_41 = arith.constant 8 : index
    %c0_42 = arith.constant 0 : index
    %c0_43 = arith.constant 0 : index
    %79 = vector.load %arg2[%c8_41, %c0_42, %c0_43] : memref<36x128x128xf32, #tpu.memory_space<vmem>>, vector<1x128x128xf32>
    %80 = vector.shape_cast %79 : vector<1x128x128xf32> to vector<128x128xf32>
    %cst_44 = arith.constant dense<0.000000e+00> : vector<8x128xf32>
    %81 = tpu.matmul %78, %80, %cst_44 {dimension_numbers = #tpu.dot_dimension_numbers<[1], [0], [0], [1], [0, 0, 1, 1], [], []>} : vector<8x128xf32>, vector<128x128xf32>, vector<8x128xf32> -> vector<8x128xf32>
    %82 = arith.addf %73, %81 : vector<8x128xf32>
    %c0_45 = arith.constant 0 : index
    %c9 = arith.constant 9 : index
    %83 = vector.load %arg1[%c0_45, %c9] : memref<8x36xi32, #tpu.memory_space<vmem>>, vector<8x1xi32>
    %84 = vector.broadcast %83 : vector<8x1xi32> to vector<8x128xi32>
    %85 = arith.cmpi eq, %0, %84 : vector<8x128xi32>
    %86 = arith.extui %85 : vector<8x128xi1> to vector<8x128xi32>
    %87 = arith.sitofp %86 : vector<8x128xi32> to vector<8x128xf32>
    %c9_46 = arith.constant 9 : index
    %c0_47 = arith.constant 0 : index
    %c0_48 = arith.constant 0 : index
    %88 = vector.load %arg2[%c9_46, %c0_47, %c0_48] : memref<36x128x128xf32, #tpu.memory_space<vmem>>, vector<1x128x128xf32>
    %89 = vector.shape_cast %88 : vector<1x128x128xf32> to vector<128x128xf32>
    %cst_49 = arith.constant dense<0.000000e+00> : vector<8x128xf32>
    %90 = tpu.matmul %87, %89, %cst_49 {dimension_numbers = #tpu.dot_dimension_numbers<[1], [0], [0], [1], [0, 0, 1, 1], [], []>} : vector<8x128xf32>, vector<128x128xf32>, vector<8x128xf32> -> vector<8x128xf32>
    %91 = arith.addf %82, %90 : vector<8x128xf32>
    %c0_50 = arith.constant 0 : index
    %c10 = arith.constant 10 : index
    %92 = vector.load %arg1[%c0_50, %c10] : memref<8x36xi32, #tpu.memory_space<vmem>>, vector<8x1xi32>
    %93 = vector.broadcast %92 : vector<8x1xi32> to vector<8x128xi32>
    %94 = arith.cmpi eq, %0, %93 : vector<8x128xi32>
    %95 = arith.extui %94 : vector<8x128xi1> to vector<8x128xi32>
    %96 = arith.sitofp %95 : vector<8x128xi32> to vector<8x128xf32>
    %c10_51 = arith.constant 10 : index
    %c0_52 = arith.constant 0 : index
    %c0_53 = arith.constant 0 : index
    %97 = vector.load %arg2[%c10_51, %c0_52, %c0_53] : memref<36x128x128xf32, #tpu.memory_space<vmem>>, vector<1x128x128xf32>
    %98 = vector.shape_cast %97 : vector<1x128x128xf32> to vector<128x128xf32>
    %cst_54 = arith.constant dense<0.000000e+00> : vector<8x128xf32>
    %99 = tpu.matmul %96, %98, %cst_54 {dimension_numbers = #tpu.dot_dimension_numbers<[1], [0], [0], [1], [0, 0, 1, 1], [], []>} : vector<8x128xf32>, vector<128x128xf32>, vector<8x128xf32> -> vector<8x128xf32>
    %100 = arith.addf %91, %99 : vector<8x128xf32>
    %c0_55 = arith.constant 0 : index
    %c11 = arith.constant 11 : index
    %101 = vector.load %arg1[%c0_55, %c11] : memref<8x36xi32, #tpu.memory_space<vmem>>, vector<8x1xi32>
    %102 = vector.broadcast %101 : vector<8x1xi32> to vector<8x128xi32>
    %103 = arith.cmpi eq, %0, %102 : vector<8x128xi32>
    %104 = arith.extui %103 : vector<8x128xi1> to vector<8x128xi32>
    %105 = arith.sitofp %104 : vector<8x128xi32> to vector<8x128xf32>
    %c11_56 = arith.constant 11 : index
    %c0_57 = arith.constant 0 : index
    %c0_58 = arith.constant 0 : index
    %106 = vector.load %arg2[%c11_56, %c0_57, %c0_58] : memref<36x128x128xf32, #tpu.memory_space<vmem>>, vector<1x128x128xf32>
    %107 = vector.shape_cast %106 : vector<1x128x128xf32> to vector<128x128xf32>
    %cst_59 = arith.constant dense<0.000000e+00> : vector<8x128xf32>
    %108 = tpu.matmul %105, %107, %cst_59 {dimension_numbers = #tpu.dot_dimension_numbers<[1], [0], [0], [1], [0, 0, 1, 1], [], []>} : vector<8x128xf32>, vector<128x128xf32>, vector<8x128xf32> -> vector<8x128xf32>
    %109 = arith.addf %100, %108 : vector<8x128xf32>
    %c0_60 = arith.constant 0 : index
    %c12 = arith.constant 12 : index
    %110 = vector.load %arg1[%c0_60, %c12] : memref<8x36xi32, #tpu.memory_space<vmem>>, vector<8x1xi32>
    %111 = vector.broadcast %110 : vector<8x1xi32> to vector<8x128xi32>
    %112 = arith.cmpi eq, %0, %111 : vector<8x128xi32>
    %113 = arith.extui %112 : vector<8x128xi1> to vector<8x128xi32>
    %114 = arith.sitofp %113 : vector<8x128xi32> to vector<8x128xf32>
    %c12_61 = arith.constant 12 : index
    %c0_62 = arith.constant 0 : index
    %c0_63 = arith.constant 0 : index
    %115 = vector.load %arg2[%c12_61, %c0_62, %c0_63] : memref<36x128x128xf32, #tpu.memory_space<vmem>>, vector<1x128x128xf32>
    %116 = vector.shape_cast %115 : vector<1x128x128xf32> to vector<128x128xf32>
    %cst_64 = arith.constant dense<0.000000e+00> : vector<8x128xf32>
    %117 = tpu.matmul %114, %116, %cst_64 {dimension_numbers = #tpu.dot_dimension_numbers<[1], [0], [0], [1], [0, 0, 1, 1], [], []>} : vector<8x128xf32>, vector<128x128xf32>, vector<8x128xf32> -> vector<8x128xf32>
    %118 = arith.addf %109, %117 : vector<8x128xf32>
    %c0_65 = arith.constant 0 : index
    %c13 = arith.constant 13 : index
    %119 = vector.load %arg1[%c0_65, %c13] : memref<8x36xi32, #tpu.memory_space<vmem>>, vector<8x1xi32>
    %120 = vector.broadcast %119 : vector<8x1xi32> to vector<8x128xi32>
    %121 = arith.cmpi eq, %0, %120 : vector<8x128xi32>
    %122 = arith.extui %121 : vector<8x128xi1> to vector<8x128xi32>
    %123 = arith.sitofp %122 : vector<8x128xi32> to vector<8x128xf32>
    %c13_66 = arith.constant 13 : index
    %c0_67 = arith.constant 0 : index
    %c0_68 = arith.constant 0 : index
    %124 = vector.load %arg2[%c13_66, %c0_67, %c0_68] : memref<36x128x128xf32, #tpu.memory_space<vmem>>, vector<1x128x128xf32>
    %125 = vector.shape_cast %124 : vector<1x128x128xf32> to vector<128x128xf32>
    %cst_69 = arith.constant dense<0.000000e+00> : vector<8x128xf32>
    %126 = tpu.matmul %123, %125, %cst_69 {dimension_numbers = #tpu.dot_dimension_numbers<[1], [0], [0], [1], [0, 0, 1, 1], [], []>} : vector<8x128xf32>, vector<128x128xf32>, vector<8x128xf32> -> vector<8x128xf32>
    %127 = arith.addf %118, %126 : vector<8x128xf32>
    %c0_70 = arith.constant 0 : index
    %c14 = arith.constant 14 : index
    %128 = vector.load %arg1[%c0_70, %c14] : memref<8x36xi32, #tpu.memory_space<vmem>>, vector<8x1xi32>
    %129 = vector.broadcast %128 : vector<8x1xi32> to vector<8x128xi32>
    %130 = arith.cmpi eq, %0, %129 : vector<8x128xi32>
    %131 = arith.extui %130 : vector<8x128xi1> to vector<8x128xi32>
    %132 = arith.sitofp %131 : vector<8x128xi32> to vector<8x128xf32>
    %c14_71 = arith.constant 14 : index
    %c0_72 = arith.constant 0 : index
    %c0_73 = arith.constant 0 : index
    %133 = vector.load %arg2[%c14_71, %c0_72, %c0_73] : memref<36x128x128xf32, #tpu.memory_space<vmem>>, vector<1x128x128xf32>
    %134 = vector.shape_cast %133 : vector<1x128x128xf32> to vector<128x128xf32>
    %cst_74 = arith.constant dense<0.000000e+00> : vector<8x128xf32>
    %135 = tpu.matmul %132, %134, %cst_74 {dimension_numbers = #tpu.dot_dimension_numbers<[1], [0], [0], [1], [0, 0, 1, 1], [], []>} : vector<8x128xf32>, vector<128x128xf32>, vector<8x128xf32> -> vector<8x128xf32>
    %136 = arith.addf %127, %135 : vector<8x128xf32>
    %c0_75 = arith.constant 0 : index
    %c15 = arith.constant 15 : index
    %137 = vector.load %arg1[%c0_75, %c15] : memref<8x36xi32, #tpu.memory_space<vmem>>, vector<8x1xi32>
    %138 = vector.broadcast %137 : vector<8x1xi32> to vector<8x128xi32>
    %139 = arith.cmpi eq, %0, %138 : vector<8x128xi32>
    %140 = arith.extui %139 : vector<8x128xi1> to vector<8x128xi32>
    %141 = arith.sitofp %140 : vector<8x128xi32> to vector<8x128xf32>
    %c15_76 = arith.constant 15 : index
    %c0_77 = arith.constant 0 : index
    %c0_78 = arith.constant 0 : index
    %142 = vector.load %arg2[%c15_76, %c0_77, %c0_78] : memref<36x128x128xf32, #tpu.memory_space<vmem>>, vector<1x128x128xf32>
    %143 = vector.shape_cast %142 : vector<1x128x128xf32> to vector<128x128xf32>
    %cst_79 = arith.constant dense<0.000000e+00> : vector<8x128xf32>
    %144 = tpu.matmul %141, %143, %cst_79 {dimension_numbers = #tpu.dot_dimension_numbers<[1], [0], [0], [1], [0, 0, 1, 1], [], []>} : vector<8x128xf32>, vector<128x128xf32>, vector<8x128xf32> -> vector<8x128xf32>
    %145 = arith.addf %136, %144 : vector<8x128xf32>
    %c0_80 = arith.constant 0 : index
    %c16 = arith.constant 16 : index
    %146 = vector.load %arg1[%c0_80, %c16] : memref<8x36xi32, #tpu.memory_space<vmem>>, vector<8x1xi32>
    %147 = vector.broadcast %146 : vector<8x1xi32> to vector<8x128xi32>
    %148 = arith.cmpi eq, %0, %147 : vector<8x128xi32>
    %149 = arith.extui %148 : vector<8x128xi1> to vector<8x128xi32>
    %150 = arith.sitofp %149 : vector<8x128xi32> to vector<8x128xf32>
    %c16_81 = arith.constant 16 : index
    %c0_82 = arith.constant 0 : index
    %c0_83 = arith.constant 0 : index
    %151 = vector.load %arg2[%c16_81, %c0_82, %c0_83] : memref<36x128x128xf32, #tpu.memory_space<vmem>>, vector<1x128x128xf32>
    %152 = vector.shape_cast %151 : vector<1x128x128xf32> to vector<128x128xf32>
    %cst_84 = arith.constant dense<0.000000e+00> : vector<8x128xf32>
    %153 = tpu.matmul %150, %152, %cst_84 {dimension_numbers = #tpu.dot_dimension_numbers<[1], [0], [0], [1], [0, 0, 1, 1], [], []>} : vector<8x128xf32>, vector<128x128xf32>, vector<8x128xf32> -> vector<8x128xf32>
    %154 = arith.addf %145, %153 : vector<8x128xf32>
    %c0_85 = arith.constant 0 : index
    %c17 = arith.constant 17 : index
    %155 = vector.load %arg1[%c0_85, %c17] : memref<8x36xi32, #tpu.memory_space<vmem>>, vector<8x1xi32>
    %156 = vector.broadcast %155 : vector<8x1xi32> to vector<8x128xi32>
    %157 = arith.cmpi eq, %0, %156 : vector<8x128xi32>
    %158 = arith.extui %157 : vector<8x128xi1> to vector<8x128xi32>
    %159 = arith.sitofp %158 : vector<8x128xi32> to vector<8x128xf32>
    %c17_86 = arith.constant 17 : index
    %c0_87 = arith.constant 0 : index
    %c0_88 = arith.constant 0 : index
    %160 = vector.load %arg2[%c17_86, %c0_87, %c0_88] : memref<36x128x128xf32, #tpu.memory_space<vmem>>, vector<1x128x128xf32>
    %161 = vector.shape_cast %160 : vector<1x128x128xf32> to vector<128x128xf32>
    %cst_89 = arith.constant dense<0.000000e+00> : vector<8x128xf32>
    %162 = tpu.matmul %159, %161, %cst_89 {dimension_numbers = #tpu.dot_dimension_numbers<[1], [0], [0], [1], [0, 0, 1, 1], [], []>} : vector<8x128xf32>, vector<128x128xf32>, vector<8x128xf32> -> vector<8x128xf32>
    %163 = arith.addf %154, %162 : vector<8x128xf32>
    %c0_90 = arith.constant 0 : index
    %c18 = arith.constant 18 : index
    %164 = vector.load %arg1[%c0_90, %c18] : memref<8x36xi32, #tpu.memory_space<vmem>>, vector<8x1xi32>
    %165 = vector.broadcast %164 : vector<8x1xi32> to vector<8x128xi32>
    %166 = arith.cmpi eq, %0, %165 : vector<8x128xi32>
    %167 = arith.extui %166 : vector<8x128xi1> to vector<8x128xi32>
    %168 = arith.sitofp %167 : vector<8x128xi32> to vector<8x128xf32>
    %c18_91 = arith.constant 18 : index
    %c0_92 = arith.constant 0 : index
    %c0_93 = arith.constant 0 : index
    %169 = vector.load %arg2[%c18_91, %c0_92, %c0_93] : memref<36x128x128xf32, #tpu.memory_space<vmem>>, vector<1x128x128xf32>
    %170 = vector.shape_cast %169 : vector<1x128x128xf32> to vector<128x128xf32>
    %cst_94 = arith.constant dense<0.000000e+00> : vector<8x128xf32>
    %171 = tpu.matmul %168, %170, %cst_94 {dimension_numbers = #tpu.dot_dimension_numbers<[1], [0], [0], [1], [0, 0, 1, 1], [], []>} : vector<8x128xf32>, vector<128x128xf32>, vector<8x128xf32> -> vector<8x128xf32>
    %172 = arith.addf %163, %171 : vector<8x128xf32>
    %c0_95 = arith.constant 0 : index
    %c19 = arith.constant 19 : index
    %173 = vector.load %arg1[%c0_95, %c19] : memref<8x36xi32, #tpu.memory_space<vmem>>, vector<8x1xi32>
    %174 = vector.broadcast %173 : vector<8x1xi32> to vector<8x128xi32>
    %175 = arith.cmpi eq, %0, %174 : vector<8x128xi32>
    %176 = arith.extui %175 : vector<8x128xi1> to vector<8x128xi32>
    %177 = arith.sitofp %176 : vector<8x128xi32> to vector<8x128xf32>
    %c19_96 = arith.constant 19 : index
    %c0_97 = arith.constant 0 : index
    %c0_98 = arith.constant 0 : index
    %178 = vector.load %arg2[%c19_96, %c0_97, %c0_98] : memref<36x128x128xf32, #tpu.memory_space<vmem>>, vector<1x128x128xf32>
    %179 = vector.shape_cast %178 : vector<1x128x128xf32> to vector<128x128xf32>
    %cst_99 = arith.constant dense<0.000000e+00> : vector<8x128xf32>
    %180 = tpu.matmul %177, %179, %cst_99 {dimension_numbers = #tpu.dot_dimension_numbers<[1], [0], [0], [1], [0, 0, 1, 1], [], []>} : vector<8x128xf32>, vector<128x128xf32>, vector<8x128xf32> -> vector<8x128xf32>
    %181 = arith.addf %172, %180 : vector<8x128xf32>
    %c0_100 = arith.constant 0 : index
    %c20 = arith.constant 20 : index
    %182 = vector.load %arg1[%c0_100, %c20] : memref<8x36xi32, #tpu.memory_space<vmem>>, vector<8x1xi32>
    %183 = vector.broadcast %182 : vector<8x1xi32> to vector<8x128xi32>
    %184 = arith.cmpi eq, %0, %183 : vector<8x128xi32>
    %185 = arith.extui %184 : vector<8x128xi1> to vector<8x128xi32>
    %186 = arith.sitofp %185 : vector<8x128xi32> to vector<8x128xf32>
    %c20_101 = arith.constant 20 : index
    %c0_102 = arith.constant 0 : index
    %c0_103 = arith.constant 0 : index
    %187 = vector.load %arg2[%c20_101, %c0_102, %c0_103] : memref<36x128x128xf32, #tpu.memory_space<vmem>>, vector<1x128x128xf32>
    %188 = vector.shape_cast %187 : vector<1x128x128xf32> to vector<128x128xf32>
    %cst_104 = arith.constant dense<0.000000e+00> : vector<8x128xf32>
    %189 = tpu.matmul %186, %188, %cst_104 {dimension_numbers = #tpu.dot_dimension_numbers<[1], [0], [0], [1], [0, 0, 1, 1], [], []>} : vector<8x128xf32>, vector<128x128xf32>, vector<8x128xf32> -> vector<8x128xf32>
    %190 = arith.addf %181, %189 : vector<8x128xf32>
    %c0_105 = arith.constant 0 : index
    %c21 = arith.constant 21 : index
    %191 = vector.load %arg1[%c0_105, %c21] : memref<8x36xi32, #tpu.memory_space<vmem>>, vector<8x1xi32>
    %192 = vector.broadcast %191 : vector<8x1xi32> to vector<8x128xi32>
    %193 = arith.cmpi eq, %0, %192 : vector<8x128xi32>
    %194 = arith.extui %193 : vector<8x128xi1> to vector<8x128xi32>
    %195 = arith.sitofp %194 : vector<8x128xi32> to vector<8x128xf32>
    %c21_106 = arith.constant 21 : index
    %c0_107 = arith.constant 0 : index
    %c0_108 = arith.constant 0 : index
    %196 = vector.load %arg2[%c21_106, %c0_107, %c0_108] : memref<36x128x128xf32, #tpu.memory_space<vmem>>, vector<1x128x128xf32>
    %197 = vector.shape_cast %196 : vector<1x128x128xf32> to vector<128x128xf32>
    %cst_109 = arith.constant dense<0.000000e+00> : vector<8x128xf32>
    %198 = tpu.matmul %195, %197, %cst_109 {dimension_numbers = #tpu.dot_dimension_numbers<[1], [0], [0], [1], [0, 0, 1, 1], [], []>} : vector<8x128xf32>, vector<128x128xf32>, vector<8x128xf32> -> vector<8x128xf32>
    %199 = arith.addf %190, %198 : vector<8x128xf32>
    %c0_110 = arith.constant 0 : index
    %c22 = arith.constant 22 : index
    %200 = vector.load %arg1[%c0_110, %c22] : memref<8x36xi32, #tpu.memory_space<vmem>>, vector<8x1xi32>
    %201 = vector.broadcast %200 : vector<8x1xi32> to vector<8x128xi32>
    %202 = arith.cmpi eq, %0, %201 : vector<8x128xi32>
    %203 = arith.extui %202 : vector<8x128xi1> to vector<8x128xi32>
    %204 = arith.sitofp %203 : vector<8x128xi32> to vector<8x128xf32>
    %c22_111 = arith.constant 22 : index
    %c0_112 = arith.constant 0 : index
    %c0_113 = arith.constant 0 : index
    %205 = vector.load %arg2[%c22_111, %c0_112, %c0_113] : memref<36x128x128xf32, #tpu.memory_space<vmem>>, vector<1x128x128xf32>
    %206 = vector.shape_cast %205 : vector<1x128x128xf32> to vector<128x128xf32>
    %cst_114 = arith.constant dense<0.000000e+00> : vector<8x128xf32>
    %207 = tpu.matmul %204, %206, %cst_114 {dimension_numbers = #tpu.dot_dimension_numbers<[1], [0], [0], [1], [0, 0, 1, 1], [], []>} : vector<8x128xf32>, vector<128x128xf32>, vector<8x128xf32> -> vector<8x128xf32>
    %208 = arith.addf %199, %207 : vector<8x128xf32>
    %c0_115 = arith.constant 0 : index
    %c23 = arith.constant 23 : index
    %209 = vector.load %arg1[%c0_115, %c23] : memref<8x36xi32, #tpu.memory_space<vmem>>, vector<8x1xi32>
    %210 = vector.broadcast %209 : vector<8x1xi32> to vector<8x128xi32>
    %211 = arith.cmpi eq, %0, %210 : vector<8x128xi32>
    %212 = arith.extui %211 : vector<8x128xi1> to vector<8x128xi32>
    %213 = arith.sitofp %212 : vector<8x128xi32> to vector<8x128xf32>
    %c23_116 = arith.constant 23 : index
    %c0_117 = arith.constant 0 : index
    %c0_118 = arith.constant 0 : index
    %214 = vector.load %arg2[%c23_116, %c0_117, %c0_118] : memref<36x128x128xf32, #tpu.memory_space<vmem>>, vector<1x128x128xf32>
    %215 = vector.shape_cast %214 : vector<1x128x128xf32> to vector<128x128xf32>
    %cst_119 = arith.constant dense<0.000000e+00> : vector<8x128xf32>
    %216 = tpu.matmul %213, %215, %cst_119 {dimension_numbers = #tpu.dot_dimension_numbers<[1], [0], [0], [1], [0, 0, 1, 1], [], []>} : vector<8x128xf32>, vector<128x128xf32>, vector<8x128xf32> -> vector<8x128xf32>
    %217 = arith.addf %208, %216 : vector<8x128xf32>
    %c0_120 = arith.constant 0 : index
    %c24 = arith.constant 24 : index
    %218 = vector.load %arg1[%c0_120, %c24] : memref<8x36xi32, #tpu.memory_space<vmem>>, vector<8x1xi32>
    %219 = vector.broadcast %218 : vector<8x1xi32> to vector<8x128xi32>
    %220 = arith.cmpi eq, %0, %219 : vector<8x128xi32>
    %221 = arith.extui %220 : vector<8x128xi1> to vector<8x128xi32>
    %222 = arith.sitofp %221 : vector<8x128xi32> to vector<8x128xf32>
    %c24_121 = arith.constant 24 : index
    %c0_122 = arith.constant 0 : index
    %c0_123 = arith.constant 0 : index
    %223 = vector.load %arg2[%c24_121, %c0_122, %c0_123] : memref<36x128x128xf32, #tpu.memory_space<vmem>>, vector<1x128x128xf32>
    %224 = vector.shape_cast %223 : vector<1x128x128xf32> to vector<128x128xf32>
    %cst_124 = arith.constant dense<0.000000e+00> : vector<8x128xf32>
    %225 = tpu.matmul %222, %224, %cst_124 {dimension_numbers = #tpu.dot_dimension_numbers<[1], [0], [0], [1], [0, 0, 1, 1], [], []>} : vector<8x128xf32>, vector<128x128xf32>, vector<8x128xf32> -> vector<8x128xf32>
    %226 = arith.addf %217, %225 : vector<8x128xf32>
    %c0_125 = arith.constant 0 : index
    %c25 = arith.constant 25 : index
    %227 = vector.load %arg1[%c0_125, %c25] : memref<8x36xi32, #tpu.memory_space<vmem>>, vector<8x1xi32>
    %228 = vector.broadcast %227 : vector<8x1xi32> to vector<8x128xi32>
    %229 = arith.cmpi eq, %0, %228 : vector<8x128xi32>
    %230 = arith.extui %229 : vector<8x128xi1> to vector<8x128xi32>
    %231 = arith.sitofp %230 : vector<8x128xi32> to vector<8x128xf32>
    %c25_126 = arith.constant 25 : index
    %c0_127 = arith.constant 0 : index
    %c0_128 = arith.constant 0 : index
    %232 = vector.load %arg2[%c25_126, %c0_127, %c0_128] : memref<36x128x128xf32, #tpu.memory_space<vmem>>, vector<1x128x128xf32>
    %233 = vector.shape_cast %232 : vector<1x128x128xf32> to vector<128x128xf32>
    %cst_129 = arith.constant dense<0.000000e+00> : vector<8x128xf32>
    %234 = tpu.matmul %231, %233, %cst_129 {dimension_numbers = #tpu.dot_dimension_numbers<[1], [0], [0], [1], [0, 0, 1, 1], [], []>} : vector<8x128xf32>, vector<128x128xf32>, vector<8x128xf32> -> vector<8x128xf32>
    %235 = arith.addf %226, %234 : vector<8x128xf32>
    %c0_130 = arith.constant 0 : index
    %c26 = arith.constant 26 : index
    %236 = vector.load %arg1[%c0_130, %c26] : memref<8x36xi32, #tpu.memory_space<vmem>>, vector<8x1xi32>
    %237 = vector.broadcast %236 : vector<8x1xi32> to vector<8x128xi32>
    %238 = arith.cmpi eq, %0, %237 : vector<8x128xi32>
    %239 = arith.extui %238 : vector<8x128xi1> to vector<8x128xi32>
    %240 = arith.sitofp %239 : vector<8x128xi32> to vector<8x128xf32>
    %c26_131 = arith.constant 26 : index
    %c0_132 = arith.constant 0 : index
    %c0_133 = arith.constant 0 : index
    %241 = vector.load %arg2[%c26_131, %c0_132, %c0_133] : memref<36x128x128xf32, #tpu.memory_space<vmem>>, vector<1x128x128xf32>
    %242 = vector.shape_cast %241 : vector<1x128x128xf32> to vector<128x128xf32>
    %cst_134 = arith.constant dense<0.000000e+00> : vector<8x128xf32>
    %243 = tpu.matmul %240, %242, %cst_134 {dimension_numbers = #tpu.dot_dimension_numbers<[1], [0], [0], [1], [0, 0, 1, 1], [], []>} : vector<8x128xf32>, vector<128x128xf32>, vector<8x128xf32> -> vector<8x128xf32>
    %244 = arith.addf %235, %243 : vector<8x128xf32>
    %c0_135 = arith.constant 0 : index
    %c27 = arith.constant 27 : index
    %245 = vector.load %arg1[%c0_135, %c27] : memref<8x36xi32, #tpu.memory_space<vmem>>, vector<8x1xi32>
    %246 = vector.broadcast %245 : vector<8x1xi32> to vector<8x128xi32>
    %247 = arith.cmpi eq, %0, %246 : vector<8x128xi32>
    %248 = arith.extui %247 : vector<8x128xi1> to vector<8x128xi32>
    %249 = arith.sitofp %248 : vector<8x128xi32> to vector<8x128xf32>
    %c27_136 = arith.constant 27 : index
    %c0_137 = arith.constant 0 : index
    %c0_138 = arith.constant 0 : index
    %250 = vector.load %arg2[%c27_136, %c0_137, %c0_138] : memref<36x128x128xf32, #tpu.memory_space<vmem>>, vector<1x128x128xf32>
    %251 = vector.shape_cast %250 : vector<1x128x128xf32> to vector<128x128xf32>
    %cst_139 = arith.constant dense<0.000000e+00> : vector<8x128xf32>
    %252 = tpu.matmul %249, %251, %cst_139 {dimension_numbers = #tpu.dot_dimension_numbers<[1], [0], [0], [1], [0, 0, 1, 1], [], []>} : vector<8x128xf32>, vector<128x128xf32>, vector<8x128xf32> -> vector<8x128xf32>
    %253 = arith.addf %244, %252 : vector<8x128xf32>
    %c0_140 = arith.constant 0 : index
    %c28 = arith.constant 28 : index
    %254 = vector.load %arg1[%c0_140, %c28] : memref<8x36xi32, #tpu.memory_space<vmem>>, vector<8x1xi32>
    %255 = vector.broadcast %254 : vector<8x1xi32> to vector<8x128xi32>
    %256 = arith.cmpi eq, %0, %255 : vector<8x128xi32>
    %257 = arith.extui %256 : vector<8x128xi1> to vector<8x128xi32>
    %258 = arith.sitofp %257 : vector<8x128xi32> to vector<8x128xf32>
    %c28_141 = arith.constant 28 : index
    %c0_142 = arith.constant 0 : index
    %c0_143 = arith.constant 0 : index
    %259 = vector.load %arg2[%c28_141, %c0_142, %c0_143] : memref<36x128x128xf32, #tpu.memory_space<vmem>>, vector<1x128x128xf32>
    %260 = vector.shape_cast %259 : vector<1x128x128xf32> to vector<128x128xf32>
    %cst_144 = arith.constant dense<0.000000e+00> : vector<8x128xf32>
    %261 = tpu.matmul %258, %260, %cst_144 {dimension_numbers = #tpu.dot_dimension_numbers<[1], [0], [0], [1], [0, 0, 1, 1], [], []>} : vector<8x128xf32>, vector<128x128xf32>, vector<8x128xf32> -> vector<8x128xf32>
    %262 = arith.addf %253, %261 : vector<8x128xf32>
    %c0_145 = arith.constant 0 : index
    %c29 = arith.constant 29 : index
    %263 = vector.load %arg1[%c0_145, %c29] : memref<8x36xi32, #tpu.memory_space<vmem>>, vector<8x1xi32>
    %264 = vector.broadcast %263 : vector<8x1xi32> to vector<8x128xi32>
    %265 = arith.cmpi eq, %0, %264 : vector<8x128xi32>
    %266 = arith.extui %265 : vector<8x128xi1> to vector<8x128xi32>
    %267 = arith.sitofp %266 : vector<8x128xi32> to vector<8x128xf32>
    %c29_146 = arith.constant 29 : index
    %c0_147 = arith.constant 0 : index
    %c0_148 = arith.constant 0 : index
    %268 = vector.load %arg2[%c29_146, %c0_147, %c0_148] : memref<36x128x128xf32, #tpu.memory_space<vmem>>, vector<1x128x128xf32>
    %269 = vector.shape_cast %268 : vector<1x128x128xf32> to vector<128x128xf32>
    %cst_149 = arith.constant dense<0.000000e+00> : vector<8x128xf32>
    %270 = tpu.matmul %267, %269, %cst_149 {dimension_numbers = #tpu.dot_dimension_numbers<[1], [0], [0], [1], [0, 0, 1, 1], [], []>} : vector<8x128xf32>, vector<128x128xf32>, vector<8x128xf32> -> vector<8x128xf32>
    %271 = arith.addf %262, %270 : vector<8x128xf32>
    %c0_150 = arith.constant 0 : index
    %c30 = arith.constant 30 : index
    %272 = vector.load %arg1[%c0_150, %c30] : memref<8x36xi32, #tpu.memory_space<vmem>>, vector<8x1xi32>
    %273 = vector.broadcast %272 : vector<8x1xi32> to vector<8x128xi32>
    %274 = arith.cmpi eq, %0, %273 : vector<8x128xi32>
    %275 = arith.extui %274 : vector<8x128xi1> to vector<8x128xi32>
    %276 = arith.sitofp %275 : vector<8x128xi32> to vector<8x128xf32>
    %c30_151 = arith.constant 30 : index
    %c0_152 = arith.constant 0 : index
    %c0_153 = arith.constant 0 : index
    %277 = vector.load %arg2[%c30_151, %c0_152, %c0_153] : memref<36x128x128xf32, #tpu.memory_space<vmem>>, vector<1x128x128xf32>
    %278 = vector.shape_cast %277 : vector<1x128x128xf32> to vector<128x128xf32>
    %cst_154 = arith.constant dense<0.000000e+00> : vector<8x128xf32>
    %279 = tpu.matmul %276, %278, %cst_154 {dimension_numbers = #tpu.dot_dimension_numbers<[1], [0], [0], [1], [0, 0, 1, 1], [], []>} : vector<8x128xf32>, vector<128x128xf32>, vector<8x128xf32> -> vector<8x128xf32>
    %280 = arith.addf %271, %279 : vector<8x128xf32>
    %c0_155 = arith.constant 0 : index
    %c31 = arith.constant 31 : index
    %281 = vector.load %arg1[%c0_155, %c31] : memref<8x36xi32, #tpu.memory_space<vmem>>, vector<8x1xi32>
    %282 = vector.broadcast %281 : vector<8x1xi32> to vector<8x128xi32>
    %283 = arith.cmpi eq, %0, %282 : vector<8x128xi32>
    %284 = arith.extui %283 : vector<8x128xi1> to vector<8x128xi32>
    %285 = arith.sitofp %284 : vector<8x128xi32> to vector<8x128xf32>
    %c31_156 = arith.constant 31 : index
    %c0_157 = arith.constant 0 : index
    %c0_158 = arith.constant 0 : index
    %286 = vector.load %arg2[%c31_156, %c0_157, %c0_158] : memref<36x128x128xf32, #tpu.memory_space<vmem>>, vector<1x128x128xf32>
    %287 = vector.shape_cast %286 : vector<1x128x128xf32> to vector<128x128xf32>
    %cst_159 = arith.constant dense<0.000000e+00> : vector<8x128xf32>
    %288 = tpu.matmul %285, %287, %cst_159 {dimension_numbers = #tpu.dot_dimension_numbers<[1], [0], [0], [1], [0, 0, 1, 1], [], []>} : vector<8x128xf32>, vector<128x128xf32>, vector<8x128xf32> -> vector<8x128xf32>
    %289 = arith.addf %280, %288 : vector<8x128xf32>
    %c0_160 = arith.constant 0 : index
    %c32 = arith.constant 32 : index
    %290 = vector.load %arg1[%c0_160, %c32] : memref<8x36xi32, #tpu.memory_space<vmem>>, vector<8x1xi32>
    %291 = vector.broadcast %290 : vector<8x1xi32> to vector<8x128xi32>
    %292 = arith.cmpi eq, %0, %291 : vector<8x128xi32>
    %293 = arith.extui %292 : vector<8x128xi1> to vector<8x128xi32>
    %294 = arith.sitofp %293 : vector<8x128xi32> to vector<8x128xf32>
    %c32_161 = arith.constant 32 : index
    %c0_162 = arith.constant 0 : index
    %c0_163 = arith.constant 0 : index
    %295 = vector.load %arg2[%c32_161, %c0_162, %c0_163] : memref<36x128x128xf32, #tpu.memory_space<vmem>>, vector<1x128x128xf32>
    %296 = vector.shape_cast %295 : vector<1x128x128xf32> to vector<128x128xf32>
    %cst_164 = arith.constant dense<0.000000e+00> : vector<8x128xf32>
    %297 = tpu.matmul %294, %296, %cst_164 {dimension_numbers = #tpu.dot_dimension_numbers<[1], [0], [0], [1], [0, 0, 1, 1], [], []>} : vector<8x128xf32>, vector<128x128xf32>, vector<8x128xf32> -> vector<8x128xf32>
    %298 = arith.addf %289, %297 : vector<8x128xf32>
    %c0_165 = arith.constant 0 : index
    %c33 = arith.constant 33 : index
    %299 = vector.load %arg1[%c0_165, %c33] : memref<8x36xi32, #tpu.memory_space<vmem>>, vector<8x1xi32>
    %300 = vector.broadcast %299 : vector<8x1xi32> to vector<8x128xi32>
    %301 = arith.cmpi eq, %0, %300 : vector<8x128xi32>
    %302 = arith.extui %301 : vector<8x128xi1> to vector<8x128xi32>
    %303 = arith.sitofp %302 : vector<8x128xi32> to vector<8x128xf32>
    %c33_166 = arith.constant 33 : index
    %c0_167 = arith.constant 0 : index
    %c0_168 = arith.constant 0 : index
    %304 = vector.load %arg2[%c33_166, %c0_167, %c0_168] : memref<36x128x128xf32, #tpu.memory_space<vmem>>, vector<1x128x128xf32>
    %305 = vector.shape_cast %304 : vector<1x128x128xf32> to vector<128x128xf32>
    %cst_169 = arith.constant dense<0.000000e+00> : vector<8x128xf32>
    %306 = tpu.matmul %303, %305, %cst_169 {dimension_numbers = #tpu.dot_dimension_numbers<[1], [0], [0], [1], [0, 0, 1, 1], [], []>} : vector<8x128xf32>, vector<128x128xf32>, vector<8x128xf32> -> vector<8x128xf32>
    %307 = arith.addf %298, %306 : vector<8x128xf32>
    %c0_170 = arith.constant 0 : index
    %c34 = arith.constant 34 : index
    %308 = vector.load %arg1[%c0_170, %c34] : memref<8x36xi32, #tpu.memory_space<vmem>>, vector<8x1xi32>
    %309 = vector.broadcast %308 : vector<8x1xi32> to vector<8x128xi32>
    %310 = arith.cmpi eq, %0, %309 : vector<8x128xi32>
    %311 = arith.extui %310 : vector<8x128xi1> to vector<8x128xi32>
    %312 = arith.sitofp %311 : vector<8x128xi32> to vector<8x128xf32>
    %c34_171 = arith.constant 34 : index
    %c0_172 = arith.constant 0 : index
    %c0_173 = arith.constant 0 : index
    %313 = vector.load %arg2[%c34_171, %c0_172, %c0_173] : memref<36x128x128xf32, #tpu.memory_space<vmem>>, vector<1x128x128xf32>
    %314 = vector.shape_cast %313 : vector<1x128x128xf32> to vector<128x128xf32>
    %cst_174 = arith.constant dense<0.000000e+00> : vector<8x128xf32>
    %315 = tpu.matmul %312, %314, %cst_174 {dimension_numbers = #tpu.dot_dimension_numbers<[1], [0], [0], [1], [0, 0, 1, 1], [], []>} : vector<8x128xf32>, vector<128x128xf32>, vector<8x128xf32> -> vector<8x128xf32>
    %316 = arith.addf %307, %315 : vector<8x128xf32>
    %c0_175 = arith.constant 0 : index
    %c35 = arith.constant 35 : index
    %317 = vector.load %arg1[%c0_175, %c35] : memref<8x36xi32, #tpu.memory_space<vmem>>, vector<8x1xi32>
    %318 = vector.broadcast %317 : vector<8x1xi32> to vector<8x128xi32>
    %319 = arith.cmpi eq, %0, %318 : vector<8x128xi32>
    %320 = arith.extui %319 : vector<8x128xi1> to vector<8x128xi32>
    %321 = arith.sitofp %320 : vector<8x128xi32> to vector<8x128xf32>
    %c35_176 = arith.constant 35 : index
    %c0_177 = arith.constant 0 : index
    %c0_178 = arith.constant 0 : index
    %322 = vector.load %arg2[%c35_176, %c0_177, %c0_178] : memref<36x128x128xf32, #tpu.memory_space<vmem>>, vector<1x128x128xf32>
    %323 = vector.shape_cast %322 : vector<1x128x128xf32> to vector<128x128xf32>
    %cst_179 = arith.constant dense<0.000000e+00> : vector<8x128xf32>
    %324 = tpu.matmul %321, %323, %cst_179 {dimension_numbers = #tpu.dot_dimension_numbers<[1], [0], [0], [1], [0, 0, 1, 1], [], []>} : vector<8x128xf32>, vector<128x128xf32>, vector<8x128xf32> -> vector<8x128xf32>
    %325 = arith.addf %316, %324 : vector<8x128xf32>
    %c0_180 = arith.constant 0 : index
    %c0_181 = arith.constant 0 : index
    %326 = vector.load %arg3[%c0_180, %c0_181] : memref<1x128xf32, #tpu.memory_space<vmem>>, vector<1x128xf32>
    %327 = vector.broadcast %326 : vector<1x128xf32> to vector<8x128xf32>
    %328 = arith.addf %325, %327 : vector<8x128xf32>
    %cst_182 = arith.constant 0.000000e+00 : f32
    %329 = vector.broadcast %cst_182 : f32 to vector<8x128xf32>
    %330 = arith.maximumf %328, %329 : vector<8x128xf32>
    %c0_183 = arith.constant 0 : index
    %c0_184 = arith.constant 0 : index
    %331 = vector.load %arg4[%c0_183, %c0_184] : memref<128x128xf32, #tpu.memory_space<vmem>>, vector<128x128xf32>
    %cst_185 = arith.constant dense<0.000000e+00> : vector<8x128xf32>
    %332 = tpu.matmul %330, %331, %cst_185 {dimension_numbers = #tpu.dot_dimension_numbers<[1], [0], [0], [1], [0, 0, 1, 1], [], []>} : vector<8x128xf32>, vector<128x128xf32>, vector<8x128xf32> -> vector<8x128xf32>
    %c0_186 = arith.constant 0 : index
    %c0_187 = arith.constant 0 : index
    %333 = vector.load %arg5[%c0_186, %c0_187] : memref<1x128xf32, #tpu.memory_space<vmem>>, vector<1x128xf32>
    %334 = vector.broadcast %333 : vector<1x128xf32> to vector<8x128xf32>
    %335 = arith.addf %332, %334 : vector<8x128xf32>
    %cst_188 = arith.constant 0.000000e+00 : f32
    %336 = vector.broadcast %cst_188 : f32 to vector<8x128xf32>
    %337 = arith.maximumf %335, %336 : vector<8x128xf32>
    %c0_189 = arith.constant 0 : index
    %c0_190 = arith.constant 0 : index
    %338 = vector.load %arg6[%c0_189, %c0_190] : memref<128x8xf32, #tpu.memory_space<vmem>>, vector<128x8xf32>
    %cst_191 = arith.constant dense<0.000000e+00> : vector<8x8xf32>
    %339 = tpu.matmul %337, %338, %cst_191 {dimension_numbers = #tpu.dot_dimension_numbers<[1], [0], [0], [1], [0, 0, 1, 1], [], []>} : vector<8x128xf32>, vector<128x8xf32>, vector<8x8xf32> -> vector<8x8xf32>
    %c0_192 = arith.constant 0 : index
    %c0_193 = arith.constant 0 : index
    %340 = vector.load %arg7[%c0_192, %c0_193] : memref<1x8xf32, #tpu.memory_space<vmem>>, vector<1x8xf32>
    %341 = vector.broadcast %340 : vector<1x8xf32> to vector<8x8xf32>
    %342 = arith.addf %339, %341 : vector<8x8xf32>
    %c0_194 = arith.constant 0 : index
    %c0_195 = arith.constant 0 : index
    %343 = vector.load %arg8[%c0_194, %c0_195] : memref<8x8xf32, #tpu.memory_space<vmem>>, vector<8x8xf32>
    tpu.vector_store %arg8[%c0_194, %c0_195], %342 {strides = array<i32>} : memref<8x8xf32, #tpu.memory_space<vmem>>, vector<8x8xf32>,
    return
  }
  func.func @transform_0(%arg0: i32) -> (i32, i32) {
    %c0_i32 = arith.constant 0 : i32
    %c0_i32_0 = arith.constant 0 : i32
    return %arg0, %c0_i32 : i32, i32
  }
  func.func @transform_1(%arg0: i32) -> (i32, i32, i32) {
    %c0_i32 = arith.constant 0 : i32
    %c0_i32_0 = arith.constant 0 : i32
    %c0_i32_1 = arith.constant 0 : i32
    %c0_i32_2 = arith.constant 0 : i32
    return %c0_i32, %c0_i32_0, %c0_i32_1 : i32, i32, i32
  }
  func.func @transform_2(%arg0: i32) -> (i32, i32) {
    %c0_i32 = arith.constant 0 : i32
    %c0_i32_0 = arith.constant 0 : i32
    %c0_i32_1 = arith.constant 0 : i32
    return %c0_i32, %c0_i32_0 : i32, i32
  }
  func.func @transform_3(%arg0: i32) -> (i32, i32) {
    %c0_i32 = arith.constant 0 : i32
    %c0_i32_0 = arith.constant 0 : i32
    %c0_i32_1 = arith.constant 0 : i32
    return %c0_i32, %c0_i32_0 : i32, i32
  }
  func.func @transform_4(%arg0: i32) -> (i32, i32) {
    %c0_i32 = arith.constant 0 : i32
    %c0_i32_0 = arith.constant 0 : i32
    %c0_i32_1 = arith.constant 0 : i32
    return %c0_i32, %c0_i32_0 : i32, i32
  }
  func.func @transform_5(%arg0: i32) -> (i32, i32) {
    %c0_i32 = arith.constant 0 : i32
    %c0_i32_0 = arith.constant 0 : i32
    %c0_i32_1 = arith.constant 0 : i32
    return %c0_i32, %c0_i32_0 : i32, i32
  }
  func.func @transform_6(%arg0: i32) -> (i32, i32) {
    %c0_i32 = arith.constant 0 : i32
    %c0_i32_0 = arith.constant 0 : i32
    %c0_i32_1 = arith.constant 0 : i32
    return %c0_i32, %c0_i32_0 : i32, i32
  }
  func.func @transform_7(%arg0: i32) -> (i32, i32) {
    %c0_i32 = arith.constant 0 : i32
    %c0_i32_0 = arith.constant 0 : i32
    return %arg0, %c0_i32 : i32, i32
  }
}

</mosaic_0001>

<bundles_post_ra>
// kernel: tpu_custom_call.1
= control target key start
LH: loop header
LB: loop body
LE: loop exit
PB: predicated region body
PF: predicated region fallthrough
CT: control target
= control target key end

     0   :  { %12 = vsyncpa [#allocation3], 0  ;;  %s6978_s0 = inlined_call_operand.hbm [shape: s32[8,36], index: 0, kind: input, shape index: {}]   ;;  %s6979_s1 = inlined_call_operand.hbm [shape: f32[36,128,128], index: 1, kind: input, shape index: {}]   ;;  %s6980_s2 = inlined_call_operand.hbm [shape: f32[1,128], index: 2, kind: input, shape index: {}]   ;;  %s6981_s3 = inlined_call_operand.hbm [shape: f32[128,128], index: 3, kind: input, shape index: {}]   ;;  %s6982_s4 = inlined_call_operand.hbm [shape: f32[1,128], index: 4, kind: input, shape index: {}]   ;;  %s6983_s5 = inlined_call_operand.vmem [shape: f32[128,8], index: 5, kind: input, shape index: {}]   ;;  %s6984_s6 = inlined_call_operand.hbm [shape: f32[1,8], index: 6, kind: input, shape index: {}]   ;;  %s6985_s7 = inlined_call_operand.hbm [shape: f32[8,8], index: 7, kind: output, shape index: {}]  }
   0x1   :  { %13 = vsyncpa [#allocation6], 0 }
   0x2   :  { %14 = vsyncpa [#allocation9], 0 }
   0x3   :  { %15 = vsyncpa [#allocation12], 0 }
   0x4   :  { %16 = vsyncpa [#allocation4], 0  ;;  %s5988_s24 = smov [#allocation5]  }
   0x5   :  { %s32_s25 = sshll.u32 %s5988_s24, 4  ;;  %s33_s25 = int_to_ptr.vmem [resolvable:$true] %s32_s25 }
   0x6   :  { %s5846_s26 = scalar_lea.vmem %s33_s25, 73728  ;;  %p5851_p1 = scmp.lt.s32.totalorder %s33_s25, %s33_s25 }
   0x7   :  { %p5847_p0 = scmp.ne.s32.totalorder %s33_s25, %s5846_s26  ;;  %p5852_p2 = scmp.lt.s32.totalorder %s5846_s26, %s5846_s26 }
   0x9   :  { %p5853_p3 = por %p5852_p2, %p5851_p1 }
   0xb   :  { %p5854_p4 = pnand %p5853_p3, %p5847_p0 }
   0xd   :  { %5857 = shalt.err (!%p5854_p4)
}
   0xe   :  { %s5989_s27 = smov 128   ;;  %s5990_s28 = smov 8  }
   0xf   :  { %38 = dma.hbm_to_vmem [thread:$0]  %s6979_s1, 73728, %s33_s25, [#allocation6], %s5989_s27, %s5989_s27, %s5990_s28  }
  0x10   :  { %s5991_s8 = smov [#allocation8]   ;;  %s5992_s10 = smov [#allocation2]  }
  0x11   :  { %s54_s9 = sshll.u32 %s5991_s8, 4  ;;  %s23_s11 = sshll.u32 %s5992_s10, 4  ;;  %s55_s9 = int_to_ptr.vmem [resolvable:$true] %s54_s9  ;;  %s24_s11 = int_to_ptr.vmem [resolvable:$true] %s23_s11 }
  0x12   :  { %s5866_s12 = scalar_lea.vmem %s55_s9, 2048  ;;  %p5871_p6 = scmp.lt.s32.totalorder %s55_s9, %s55_s9 }
  0x13   :  { %p5867_p5 = scmp.ne.s32.totalorder %s55_s9, %s5866_s12  ;;  %p5872_p7 = scmp.lt.s32.totalorder %s5866_s12, %s5866_s12 }
  0x15   :  { %p5873_p8 = por %p5872_p7, %p5871_p6 }
  0x17   :  { %p5874_p9 = pnand %p5873_p8, %p5867_p5 }
  0x19   :  { %5877 = shalt.err (!%p5874_p9)
}
  0x1a   :  { %60 = dma.hbm_to_vmem [thread:$0]  %s6981_s3, 2048, %s55_s9, [#allocation9], %s5989_s27, %s5989_s27, %s5990_s28  }
  0x1b   :  { %s5886_s15 = scalar_lea.vmem %s24_s11, 128  ;;  %p5891_p11 = scmp.lt.s32.totalorder %s24_s11, %s24_s11 }
  0x1c   :  { %p5887_p10 = scmp.ne.s32.totalorder %s24_s11, %s5886_s15  ;;  %p5892_p12 = scmp.lt.s32.totalorder %s5886_s15, %s5886_s15 }
  0x1e   :  { %p5893_p13 = por %p5892_p12, %p5891_p11 }
  0x20   :  { %p5894_p0 = pnand %p5893_p13, %p5887_p10 }
  0x22   :  { %5897 = shalt.err (!%p5894_p0)
}
  0x23   :  { %26 = dma.hbm_to_vmem [thread:$0]  %s6978_s0, 128, %s24_s11, [#allocation3]  }
  0x24   :  { %s5993_s17 = smov [#allocation7]   ;;  %s5994_s19 = smov [#allocation10]  }
  0x25   :  { %s45_s18 = sshll.u32 %s5993_s17, 4  ;;  %s67_s20 = sshll.u32 %s5994_s19, 4  ;;  %s46_s18 = int_to_ptr.vmem [resolvable:$true] %s45_s18  ;;  %s68_s20 = int_to_ptr.vmem [resolvable:$true] %s67_s20 }
  0x26   :  { %s5906_s21 = scalar_lea.vmem %s46_s18, 16  ;;  %s5910_s3 = scalar_lea.vmem %s46_s18, 32 }
  0x27   :  { %p5907_p1 = scmp.ne.s32.totalorder %s46_s18, %s5906_s21  ;;  %p5911_p2 = scmp.lt.s32.totalorder %s46_s18, %s46_s18 }
  0x28   :  { %p5912_p3 = scmp.lt.s32.totalorder %s5910_s3, %s5906_s21 }
  0x2a   :  { %p5913_p4 = por %p5912_p3, %p5911_p2 }
  0x2c   :  { %p5914_p5 = pnand %p5913_p4, %p5907_p1 }
  0x2e   :  { %5917 = shalt.err (!%p5914_p5)
}
  0x2f   :  { %48 = dma.hbm_to_vmem [thread:$0]  %s6980_s2, 16, %s46_s18, [#allocation6]  }
  0x30   :  { %s5926_s24 = scalar_lea.vmem %s68_s20, 16  ;;  %s5930_s0 = scalar_lea.vmem %s68_s20, 32 }
  0x31   :  { %p5927_p6 = scmp.ne.s32.totalorder %s68_s20, %s5926_s24  ;;  %p5931_p7 = scmp.lt.s32.totalorder %s68_s20, %s68_s20 }
  0x32   :  { %p5932_p8 = scmp.lt.s32.totalorder %s5930_s0, %s5926_s24 }
  0x34   :  { %p5933_p9 = por %p5932_p8, %p5931_p7 }
  0x36   :  { %p5934_p10 = pnand %p5933_p9, %p5927_p6 }
  0x38   :  { %5937 = shalt.err (!%p5934_p10)
}
  0x39   :  { %70 = dma.hbm_to_vmem [thread:$0]  %s6982_s4, 16, %s68_s20, [#allocation9]  }
  0x3a   :  { %s5995_s27 = smov [#allocation11]  }
  0x3b   :  { %s79_s28 = sshll.u32 %s5995_s27, 4  ;;  %s80_s28 = int_to_ptr.vmem [resolvable:$true] %s79_s28 }
  0x3c   :  { %s5946_s29 = scalar_lea.vmem %s80_s28, 16  ;;  %s5950_s30 = scalar_lea.vmem %s80_s28, 32 }
  0x3d   :  { %p5947_p11 = scmp.ne.s32.totalorder %s80_s28, %s5946_s29  ;;  %p5951_p12 = scmp.lt.s32.totalorder %s80_s28, %s80_s28 }
  0x3e   :  { %p5952_p13 = scmp.lt.s32.totalorder %s5950_s30, %s5946_s29 }
  0x40   :  { %p5953_p0 = por %p5952_p13, %p5951_p12 }
  0x42   :  { %p5954_p1 = pnand %p5953_p0, %p5947_p11 }
  0x44   :  { %5957 = shalt.err (!%p5954_p1)
}
  0x45   :  { %82 = dma.hbm_to_vmem [thread:$0]  %s6984_s6, 16, %s80_s28, [#allocation12]  }
  0x46   :  { %5978 = dma.done.wait [#allocation3], 128  }
  0x47   :  { %5979 = vsyncadd [#allocation3], 4294967168 }
  0x48   :  { %5980 = dma.done.wait [#allocation6], 73744  }
  0x49   :  { %5981 = vsyncadd [#allocation6], 4294893552 }
  0x4a   :  { %5982 = dma.done.wait [#allocation9], 2064  }
  0x4b   :  { %5983 = vsyncadd [#allocation9], 4294965232 }
  0x4c   :  { %5984 = dma.done.wait [#allocation12], 16  }
  0x4d   :  { %5985 = vsyncadd [#allocation12], 4294967280  ;;  %v5996_v0 = vmov 1   ;;  %v5997_v1 = vmov 2   ;;  %v5998_v2 = vmov 0.0   ;;  %vm5999_vm0 = vmmov 0  }
  0x4e   :  { %5800 = vset.pattern.permute.xlu0 %v5996_v0  ;;  %5802 = vset.pattern.permute.xlu1 %v5997_v1  ;;  %v6100_v3 = vld [vmem:[#allocation2] sm:$0xff]  ;;  %v147_v5 = vld [vmem:[#allocation5 + $0xf0] sm:$0xff]  ;;  %v6000_v8 = vmov 0   ;;  %v6001_v9 = vmov 3   ;;  %v146_v10 = vld [vmem:[#allocation5 + $0xe8] sm:$0xff]  ;;  %v6002_v14 = vmov 4   ;;  %v101_v50 = vlaneseq }
  0x4f   :  { %4422 = vmatprep.subr.mxu0 %v5998_v2  ;;  %4457 = vmatprep.subr.mxu1 %v5998_v2  ;;  %v148_v4 = vld [vmem:[#allocation5 + $0xf8] sm:$0xff]  ;;  %v124_v7 = vld [vmem:[#allocation5 + $0x70] sm:$0xff]  ;;  %v123_v11 = vld [vmem:[#allocation5 + $0x68] sm:$0xff]  ;;  %v6003_v15 = vmov 5   ;;  %v6004_v19 = vmov 6   ;;  %v6005_v25 = vmov 7  }
  0x50   :  { %4454 = vmatprep.mubr.msk.f32.mxu0 %vm5999_vm0, %v5998_v2  ;;  %4489 = vmatprep.mubr.msk.f32.mxu1 %vm5999_vm0, %v5998_v2  ;;  %v125_v6 = vld [vmem:[#allocation5 + $0x78] sm:$0xff]  ;;  %v145_v12 = vld [vmem:[#allocation5 + $0xe0] sm:$0xff]  ;;  %v143_v18 = vld [vmem:[#allocation5 + $0xd0] sm:$0xff]  ;;  %v6006_v42 = vmov 8   ;;  %v6007_v43 = vmov 9   ;;  %v6008_v44 = vmov 11  }
  0x51   :  { %127 = vperm.xlu0 %5800, %v6100_v3   ;;  %290 = vperm.xlu1 %5802, %v6100_v3   ;;  %v122_v13 = vld [vmem:[#allocation5 + $0x60] sm:$0xff]  ;;  %v144_v16 = vld [vmem:[#allocation5 + $0xd8] sm:$0xff]  ;;  %v142_v20 = vld [vmem:[#allocation5 + $0xc8] sm:$0xff]  ;;  %v6009_v45 = vmov 10   ;;  %v6010_v46 = vmov 12   ;;  %v6011_v47 = vmov 13  }
  0x52   :  { %4423 = vmatpush3.msra.mxu0 %v148_v4  ;;  %4458 = vmatpush3.msra.mxu1 %v125_v6  ;;  %v121_v17 = vld [vmem:[#allocation5 + $0x58] sm:$0xff]  ;;  %v120_v21 = vld [vmem:[#allocation5 + $0x50] sm:$0xff]  ;;  %v141_v22 = vld [vmem:[#allocation5 + $0xc0] sm:$0xff]  ;;  %v6012_v48 = vmov 14   ;;  %v6013_v49 = vmov 15   ;;  %v6150_v51 = vand.u32 127, %v101_v50 }
  0x53   :  { %4424 = vmatprep.subr.mxu0 %v5998_v2  ;;  %4459 = vmatprep.subr.mxu1 %v5998_v2  ;;  %v140_v23 = vld [vmem:[#allocation5 + $0xb8] sm:$0xff]  ;;  %v119_v24 = vld [vmem:[#allocation5 + $0x48] sm:$0xff]  ;;  %v139_v26 = vld [vmem:[#allocation5 + $0xb0] sm:$0xff]  ;;  %v6014_v54 = vmov 1.0   ;;  %s6035_s10 = smov [#allocation13]  }
  0x54   :  { %4425 = vmatpush3.msra.mxu0 %v147_v5  ;;  %4460 = vmatpush3.msra.mxu1 %v124_v7  ;;  %v118_v27 = vld [vmem:[#allocation5 + $0x40] sm:$0xff]  ;;  %v138_v28 = vld [vmem:[#allocation5 + $0xa8] sm:$0xff]  ;;  %v117_v29 = vld [vmem:[#allocation5 + $0x38] sm:$0xff]  ;;  %s3689_s11 = sshll.u32 %s6035_s10, 4  ;;  %s3690_s11 = int_to_ptr.vmem [resolvable:$true] %s3689_s11 }
  0x55   :  { %5801 = vset.pattern.permute.xlu0 %v6000_v8  ;;  %5803 = vset.pattern.permute.xlu1 %v6001_v9  ;;  %v137_v30 = vld [vmem:[#allocation5 + $0xa0] sm:$0xff]  ;;  %v116_v31 = vld [vmem:[#allocation5 + $0x30] sm:$0xff]  ;;  %v136_v32 = vld [vmem:[#allocation5 + $0x98] sm:$0xff]  ;;  %s5958_s12 = scalar_lea.vmem %s3690_s11, 128  ;;  %p5963_p3 = scmp.lt.s32.totalorder %s3690_s11, %s3690_s11 }
  0x56   :  { %105 = vperm.xlu0 %5801, %v6100_v3   ;;  %384 = vperm.xlu1 %5803, %v6100_v3   ;;  %v115_v33 = vld [vmem:[#allocation5 + $0x28] sm:$0xff]  ;;  %v135_v34 = vld [vmem:[#allocation5 + $0x90] sm:$0xff]  ;;  %v114_v35 = vld [vmem:[#allocation5 + $0x20] sm:$0xff]  ;;  %p5959_p2 = scmp.ne.s32.totalorder %s3690_s11, %s5958_s12  ;;  %p5964_p4 = scmp.lt.s32.totalorder %s5958_s12, %s5958_s12 }
  0x57   :  { %4426 = vmatprep.subr.mxu0 %v5998_v2  ;;  %4461 = vmatprep.subr.mxu1 %v5998_v2  ;;  %v134_v36 = vld [vmem:[#allocation5 + $0x88] sm:$0xff]  ;;  %v113_v37 = vld [vmem:[#allocation5 + $0x18] sm:$0xff]  ;;  %v133_v38 = vld [vmem:[#allocation5 + $0x80] sm:$0xff] }
  0x58   :  { %4427 = vmatpush3.msra.mxu0 %v146_v10  ;;  %4462 = vmatpush3.msra.mxu1 %v123_v11  ;;  %v112_v39 = vld [vmem:[#allocation5 + $0x10] sm:$0xff]  ;;  %v111_v40 = vld [vmem:[#allocation5 + $0x8] sm:$0xff]  ;;  %v110_v41 = vld [vmem:[#allocation5] sm:$0xff]  ;;  %p5965_p5 = por %p5964_p4, %p5963_p3 }
  0x59   :  { %4428 = vmatprep.subr.mxu0 %v5998_v2  ;;  %4463 = vmatprep.subr.mxu1 %v5998_v2  ;;  %v311_v53 = vld [vmem:[#allocation5 + $0x178] sm:$0xff]  ;;  %v310_v55 = vld [vmem:[#allocation5 + $0x170] sm:$0xff]  ;;  %v309_v56 = vld [vmem:[#allocation5 + $0x168] sm:$0xff] }
  0x5a   :  { %5804 = vset.pattern.permute.xlu1 %v6002_v14  ;;  %5805 = vset.pattern.permute.xlu0 %v6003_v15  ;;  %v405_v58 = vld [vmem:[#allocation5 + $0x1f8] sm:$0xff]  ;;  %v308_v59 = vld [vmem:[#allocation5 + $0x160] sm:$0xff]  ;;  %v404_v60 = vld [vmem:[#allocation5 + $0x1f0] sm:$0xff]  ;;  %p5966_p6 = pnand %p5965_p5, %p5959_p2 }
  0x5b   :  { %478 = vperm.xlu1 %5804, %v6100_v3   ;;  %572 = vperm.xlu0 %5805, %v6100_v3   ;;  %v307_v61 = vld [vmem:[#allocation5 + $0x158] sm:$0xff]  ;;  %v403_v62 = vld [vmem:[#allocation5 + $0x1e8] sm:$0xff]  ;;  %v306_v63 = vld [vmem:[#allocation5 + $0x150] sm:$0xff] }
  0x5c   :  { %4429 = vmatpush3.msra.mxu0 %v145_v12  ;;  %4464 = vmatpush3.msra.mxu1 %v122_v13  ;;  %v402_v0 = vld [vmem:[#allocation5 + $0x1e0] sm:$0xff]  ;;  %v305_v1 = vld [vmem:[#allocation5 + $0x148] sm:$0xff]  ;;  %v400_v5 = vld [vmem:[#allocation5 + $0x1d0] sm:$0xff] }
  0x5d   :  { %4430 = vmatprep.subr.mxu0 %v5998_v2  ;;  %4465 = vmatprep.subr.mxu1 %v5998_v2  ;;  %v304_v4 = vld [vmem:[#allocation5 + $0x140] sm:$0xff]  ;;  %v303_v6 = vld [vmem:[#allocation5 + $0x138] sm:$0xff]  ;;  %v399_v7 = vld [vmem:[#allocation5 + $0x1c8] sm:$0xff] }
  0x5e   :  { %4431 = vmatpush3.msra.mxu0 %v144_v16  ;;  %4466 = vmatpush3.msra.mxu1 %v121_v17  ;;  %v302_v8 = vld [vmem:[#allocation5 + $0x130] sm:$0xff]  ;;  %v398_v9 = vld [vmem:[#allocation5 + $0x1c0] sm:$0xff]  ;;  %v301_v10 = vld [vmem:[#allocation5 + $0x128] sm:$0xff] }
  0x5f   :  { %5806 = vset.pattern.permute.xlu1 %v6004_v19  ;;  %4432 = vmatprep.subr.mxu0 %v5998_v2  ;;  %v397_v11 = vld [vmem:[#allocation5 + $0x1b8] sm:$0xff]  ;;  %v300_v12 = vld [vmem:[#allocation5 + $0x120] sm:$0xff]  ;;  %v396_v13 = vld [vmem:[#allocation5 + $0x1b0] sm:$0xff] }
  0x60   :  { %666 = vperm.xlu1 %5806, %v6100_v3   ;;  %4433 = vmatpush3.msra.mxu0 %v143_v18  ;;  %v299_v14 = vld [vmem:[#allocation5 + $0x118] sm:$0xff]  ;;  %v395_v15 = vld [vmem:[#allocation5 + $0x1a8] sm:$0xff]  ;;  %v298_v16 = vld [vmem:[#allocation5 + $0x110] sm:$0xff] }
  0x61   :  { %4434 = vmatprep.subr.mxu0 %v5998_v2  ;;  %4467 = vmatprep.subr.mxu1 %v5998_v2  ;;  %v394_v17 = vld [vmem:[#allocation5 + $0x1a0] sm:$0xff]  ;;  %v297_v18 = vld [vmem:[#allocation5 + $0x108] sm:$0xff]  ;;  %v486_v50 = vld [vmem:[#allocation5 + $0x210] sm:$0xff] }
  0x62   :  { %4435 = vmatpush3.msra.mxu0 %v142_v20  ;;  %4468 = vmatpush3.msra.mxu1 %v120_v21  ;;  %v393_v20 = vld [vmem:[#allocation5 + $0x198] sm:$0xff]  ;;  %v296_v21 = vld [vmem:[#allocation5 + $0x100] sm:$0xff] }
  0x63   :  { %4436 = vmatprep.subr.mxu0 %v5998_v2  ;;  %4469 = vmatprep.subr.mxu1 %v5998_v2 }
  0x64   :  { %5807 = vset.pattern.permute.xlu1 %v6005_v25  ;;  %4437 = vmatpush3.msra.mxu0 %v141_v22  ;;  %v392_v22 = vld [vmem:[#allocation5 + $0x190] sm:$0xff] }
  0x65   :  { %760 = vperm.xlu1 %5807, %v6100_v3   ;;  %4438 = vmatprep.subr.mxu0 %v5998_v2 }
  0x66   :  { %4439 = vmatpush3.msra.mxu0 %v140_v23  ;;  %4470 = vmatpush3.msra.mxu1 %v119_v24  ;;  %v499_v23 = vld [vmem:[#allocation5 + $0x278] sm:$0xff]  ;;  %v391_v24 = vld [vmem:[#allocation5 + $0x188] sm:$0xff] }
  0x67   :  { %4440 = vmatprep.subr.mxu0 %v5998_v2  ;;  %4471 = vmatprep.subr.mxu1 %v5998_v2 }
  0x68   :  { %4441 = vmatpush3.msra.mxu0 %v139_v26  ;;  %4472 = vmatpush3.msra.mxu1 %v118_v27  ;;  %v498_v26 = vld [vmem:[#allocation5 + $0x270] sm:$0xff]  ;;  %v390_v27 = vld [vmem:[#allocation5 + $0x180] sm:$0xff] }
  0x69   :  { %4442 = vmatprep.subr.mxu0 %v5998_v2  ;;  %4473 = vmatprep.subr.mxu1 %v5998_v2 }
  0x6a   :  { %4443 = vmatpush3.msra.mxu0 %v138_v28  ;;  %4474 = vmatpush3.msra.mxu1 %v117_v29  ;;  %v497_v28 = vld [vmem:[#allocation5 + $0x268] sm:$0xff]  ;;  %v593_v29 = vld [vmem:[#allocation5 + $0x2f8] sm:$0xff] }
  0x6b   :  { %4444 = vmatprep.subr.mxu0 %v5998_v2  ;;  %4475 = vmatprep.subr.mxu1 %v5998_v2 }
  0x6c   :  { %4445 = vmatpush3.msra.mxu0 %v137_v30  ;;  %4476 = vmatpush3.msra.mxu1 %v116_v31  ;;  %v496_v30 = vld [vmem:[#allocation5 + $0x260] sm:$0xff]  ;;  %v592_v31 = vld [vmem:[#allocation5 + $0x2f0] sm:$0xff] }
  0x6d   :  { %4446 = vmatprep.subr.mxu0 %v5998_v2  ;;  %4477 = vmatprep.subr.mxu1 %v5998_v2 }
  0x6e   :  { %4447 = vmatpush3.msra.mxu0 %v136_v32  ;;  %4478 = vmatpush3.msra.mxu1 %v115_v33  ;;  %v495_v32 = vld [vmem:[#allocation5 + $0x258] sm:$0xff]  ;;  %v591_v33 = vld [vmem:[#allocation5 + $0x2e8] sm:$0xff] }
  0x6f   :  { %4448 = vmatprep.subr.mxu0 %v5998_v2  ;;  %4479 = vmatprep.subr.mxu1 %v5998_v2 }
  0x70   :  { %4449 = vmatpush3.msra.mxu0 %v135_v34  ;;  %4480 = vmatpush3.msra.mxu1 %v114_v35  ;;  %v494_v34 = vld [vmem:[#allocation5 + $0x250] sm:$0xff]  ;;  %v590_v35 = vld [vmem:[#allocation5 + $0x2e0] sm:$0xff] }
  0x71   :  { %4450 = vmatprep.subr.mxu0 %v5998_v2  ;;  %4481 = vmatprep.subr.mxu1 %v5998_v2 }
  0x72   :  { %4451 = vmatpush3.msra.mxu0 %v134_v36  ;;  %4482 = vmatpush3.msra.mxu1 %v113_v37  ;;  %v493_v36 = vld [vmem:[#allocation5 + $0x248] sm:$0xff]  ;;  %v589_v37 = vld [vmem:[#allocation5 + $0x2d8] sm:$0xff] }
  0x73   :  { %4452 = vmatprep.subr.mxu0 %v5998_v2  ;;  %4483 = vmatprep.subr.mxu1 %v5998_v2 }
  0x74   :  { %4453 = vmatpush3.msra.mxu0 %v133_v38  ;;  %4484 = vmatpush3.msra.mxu1 %v112_v39  ;;  %v492_v38 = vld [vmem:[#allocation5 + $0x240] sm:$0xff]  ;;  %v588_v39 = vld [vmem:[#allocation5 + $0x2d0] sm:$0xff] }
  0x75   :  { %4492 = vmatprep.subr.mxu0 %v5998_v2  ;;  %4485 = vmatprep.subr.mxu1 %v5998_v2 }
  0x76   :  { %4486 = vmatpush3.msra.mxu1 %v111_v40  ;;  %5808 = vset.pattern.permute.xlu0 %v6006_v42  ;;  %v491_v40 = vld [vmem:[#allocation5 + $0x238] sm:$0xff]  ;;  %v490_v42 = vld [vmem:[#allocation5 + $0x230] sm:$0xff] }
  0x77   :  { %4487 = vmatprep.subr.mxu1 %v5998_v2  ;;  %854 = vperm.xlu0 %5808, %v6100_v3  }
  0x78   :  { %4488 = vmatpush3.msra.mxu1 %v110_v41  ;;  %5809 = vset.pattern.permute.xlu1 %v6007_v43  ;;  %v587_v41 = vld [vmem:[#allocation5 + $0x2c8] sm:$0xff]  ;;  %v586_v43 = vld [vmem:[#allocation5 + $0x2c0] sm:$0xff] }
  0x79   :  { %4527 = vmatprep.subr.mxu1 %v5998_v2  ;;  %948 = vperm.xlu1 %5809, %v6100_v3  }
  0x7b   :  { %5811 = vset.pattern.permute.xlu0 %v6008_v44  ;;  %v489_v44 = vld [vmem:[#allocation5 + $0x228] sm:$0xff] }
  0x7c   :  { %1136 = vperm.xlu0 %5811, %v6100_v3  }
  0x7d   :  { %5810 = vset.pattern.permute.xlu1 %v6009_v45  ;;  %v585_v45 = vld [vmem:[#allocation5 + $0x2b8] sm:$0xff] }
  0x7e   :  { %1042 = vperm.xlu1 %5810, %v6100_v3  }
  0x80   :  { %5814 = vset.pattern.permute.xlu0 %v6012_v48  ;;  %v487_v48 = vld [vmem:[#allocation5 + $0x218] sm:$0xff] }
  0x81   :  { %1418 = vperm.xlu0 %5814, %v6100_v3  }
  0x82   :  { %5812 = vset.pattern.permute.xlu1 %v6010_v46  ;;  %v488_v46 = vld [vmem:[#allocation5 + $0x220] sm:$0xff] }
  0x83   :  { %1230 = vperm.xlu1 %5812, %v6100_v3  }
  0x87   :  { %5813 = vset.pattern.permute.xlu1 %v6011_v47  ;;  %v584_v47 = vld [vmem:[#allocation5 + $0x2b0] sm:$0xff] }
  0x88   :  { %1324 = vperm.xlu1 %5813, %v6100_v3  }
  0x8c   :  { %5815 = vset.pattern.permute.xlu1 %v6013_v49  ;;  %v583_v49 = vld [vmem:[#allocation5 + $0x2a8] sm:$0xff] }
  0x8d   :  { %1512 = vperm.xlu1 %5815, %v6100_v3   ;;  %v401_v3 = vld [vmem:[#allocation5 + $0x1d8] sm:$0xff] }
  0xcc   :  { %v128_v52 = vpop.permute.xlu0 %127  ;;  %v291_v19 = vpop.permute.xlu1 %290 }
  0xcd   :  { %vm129_vm1 = vcmp.eq.s32.totalorder %v6150_v51, %v128_v52  ;;  %vm292_vm3 = vcmp.eq.s32.totalorder %v6150_v51, %v291_v19  ;;  %v582_v52 = vld [vmem:[#allocation5 + $0x2a0] sm:$0xff] }
  0xce   :  { %4455 = vmatmul.mubr.msk.f32.vlgmr.msra.gmra.mxu0 %vm129_vm1, %v6014_v54  ;;  %v676_v19 = vld [vmem:[#allocation5 + $0x320] sm:$0xff] }
  0xcf   :  { %4493 = vmatpush3.msra.mxu0 %v311_v53  ;;  %4524 = vmatprep.mubr.msk.f32.mxu0 %vm5999_vm0, %v5998_v2  ;;  %v485_v53 = vld [vmem:[#allocation5 + $0x208] sm:$0xff] }
  0xd0   :  { %4494 = vmatprep.subr.mxu0 %v5998_v2 }
  0xd1   :  { %4495 = vmatpush3.msra.mxu0 %v310_v55  ;;  %v106_v57 = vpop.permute.xlu0 %105  ;;  %v385_v25 = vpop.permute.xlu1 %384 }
  0xd2   :  { %4496 = vmatprep.subr.mxu0 %v5998_v2  ;;  %vm107_vm2 = vcmp.eq.s32.totalorder %v6150_v51, %v106_v57  ;;  %vm386_vm4 = vcmp.eq.s32.totalorder %v6150_v51, %v385_v25  ;;  %v484_v57 = vld [vmem:[#allocation5 + $0x200] sm:$0xff]  ;;  %v673_v25 = vld [vmem:[#allocation5 + $0x308] sm:$0xff] }
  0xd3   :  { %4497 = vmatpush3.msra.mxu0 %v309_v56  ;;  %4490 = vmatmul.mubr.msk.f32.vlgmr.msra.gmra.mxu1 %vm107_vm2, %v6014_v54  ;;  %v581_v56 = vld [vmem:[#allocation5 + $0x298] sm:$0xff] }
  0xd4   :  { %4498 = vmatprep.subr.mxu0 %v5998_v2  ;;  %4528 = vmatpush3.msra.mxu1 %v405_v58  ;;  %v580_v58 = vld [vmem:[#allocation5 + $0x290] sm:$0xff] }
  0xd5   :  { %4499 = vmatpush3.msra.mxu0 %v308_v59  ;;  %4529 = vmatprep.subr.mxu1 %v5998_v2  ;;  %v687_v59 = vld [vmem:[#allocation5 + $0x378] sm:$0xff] }
  0xd6   :  { %4500 = vmatprep.subr.mxu0 %v5998_v2  ;;  %4530 = vmatpush3.msra.mxu1 %v404_v60  ;;  %v479_v55 = vpop.permute.xlu1 %478  ;;  %v579_v60 = vld [vmem:[#allocation5 + $0x288] sm:$0xff] }
  0xd7   :  { %4501 = vmatpush3.msra.mxu0 %v307_v61  ;;  %4531 = vmatprep.subr.mxu1 %v5998_v2  ;;  %vm480_vm5 = vcmp.eq.s32.totalorder %v6150_v51, %v479_v55  ;;  %v573_v61 = vpop.permute.xlu0 %572  ;;  %v864_v55 = vld [vmem:[#allocation5 + $0x420] sm:$0xff] }
  0xd8   :  { %4502 = vmatprep.subr.mxu0 %v5998_v2  ;;  %4532 = vmatpush3.msra.mxu1 %v403_v62  ;;  %v686_v62 = vld [vmem:[#allocation5 + $0x370] sm:$0xff]  ;;  %vm574_vm6 = vcmp.eq.s32.totalorder %v6150_v51, %v573_v61  ;;  %v861_v61 = vld [vmem:[#allocation5 + $0x408] sm:$0xff] }
  0xd9   :  { %4503 = vmatpush3.msra.mxu0 %v306_v63  ;;  %4533 = vmatprep.subr.mxu1 %v5998_v2  ;;  %v578_v63 = vld [vmem:[#allocation5 + $0x280] sm:$0xff] }
  0xda   :  { %4504 = vmatprep.subr.mxu0 %v5998_v2  ;;  %4534 = vmatpush3.msra.mxu1 %v402_v0  ;;  %v685_v0 = vld [vmem:[#allocation5 + $0x368] sm:$0xff] }
  0xdb   :  { %4505 = vmatpush3.msra.mxu0 %v305_v1  ;;  %4535 = vmatprep.subr.mxu1 %v5998_v2  ;;  %v781_v1 = vld [vmem:[#allocation5 + $0x3f8] sm:$0xff] }
  0xdc   :  { %4506 = vmatprep.subr.mxu0 %v5998_v2  ;;  %4536 = vmatpush3.msra.mxu1 %v401_v3  ;;  %v684_v3 = vld [vmem:[#allocation5 + $0x360] sm:$0xff] }
  0xdd   :  { %4507 = vmatpush3.msra.mxu0 %v304_v4  ;;  %4537 = vmatprep.subr.mxu1 %v5998_v2  ;;  %v780_v4 = vld [vmem:[#allocation5 + $0x3f0] sm:$0xff] }
  0xde   :  { %4508 = vmatprep.subr.mxu0 %v5998_v2  ;;  %4538 = vmatpush3.msra.mxu1 %v400_v5  ;;  %v683_v5 = vld [vmem:[#allocation5 + $0x358] sm:$0xff] }
  0xdf   :  { %4509 = vmatpush3.msra.mxu0 %v303_v6  ;;  %4539 = vmatprep.subr.mxu1 %v5998_v2  ;;  %v779_v6 = vld [vmem:[#allocation5 + $0x3e8] sm:$0xff] }
  0xe0   :  { %4510 = vmatprep.subr.mxu0 %v5998_v2  ;;  %4540 = vmatpush3.msra.mxu1 %v399_v7  ;;  %v682_v7 = vld [vmem:[#allocation5 + $0x350] sm:$0xff] }
  0xe1   :  { %4511 = vmatpush3.msra.mxu0 %v302_v8  ;;  %4541 = vmatprep.subr.mxu1 %v5998_v2  ;;  %v778_v8 = vld [vmem:[#allocation5 + $0x3e0] sm:$0xff] }
  0xe2   :  { %4512 = vmatprep.subr.mxu0 %v5998_v2  ;;  %4542 = vmatpush3.msra.mxu1 %v398_v9  ;;  %v681_v9 = vld [vmem:[#allocation5 + $0x348] sm:$0xff] }
  0xe3   :  { %4513 = vmatpush3.msra.mxu0 %v301_v10  ;;  %4543 = vmatprep.subr.mxu1 %v5998_v2  ;;  %v777_v10 = vld [vmem:[#allocation5 + $0x3d8] sm:$0xff] }
  0xe4   :  { %4514 = vmatprep.subr.mxu0 %v5998_v2  ;;  %4544 = vmatpush3.msra.mxu1 %v397_v11  ;;  %v680_v11 = vld [vmem:[#allocation5 + $0x340] sm:$0xff] }
  0xe5   :  { %4515 = vmatpush3.msra.mxu0 %v300_v12  ;;  %4545 = vmatprep.subr.mxu1 %v5998_v2  ;;  %v776_v12 = vld [vmem:[#allocation5 + $0x3d0] sm:$0xff] }
  0xe6   :  { %4516 = vmatprep.subr.mxu0 %v5998_v2  ;;  %4546 = vmatpush3.msra.mxu1 %v396_v13  ;;  %v679_v13 = vld [vmem:[#allocation5 + $0x338] sm:$0xff] }
  0xe7   :  { %4517 = vmatpush3.msra.mxu0 %v299_v14  ;;  %4547 = vmatprep.subr.mxu1 %v5998_v2  ;;  %v775_v14 = vld [vmem:[#allocation5 + $0x3c8] sm:$0xff] }
  0xe8   :  { %4518 = vmatprep.subr.mxu0 %v5998_v2  ;;  %4548 = vmatpush3.msra.mxu1 %v395_v15  ;;  %v678_v15 = vld [vmem:[#allocation5 + $0x330] sm:$0xff] }
  0xe9   :  { %4519 = vmatpush3.msra.mxu0 %v298_v16  ;;  %4549 = vmatprep.subr.mxu1 %v5998_v2  ;;  %v774_v16 = vld [vmem:[#allocation5 + $0x3c0] sm:$0xff] }
  0xea   :  { %4520 = vmatprep.subr.mxu0 %v5998_v2  ;;  %4550 = vmatpush3.msra.mxu1 %v394_v17  ;;  %v677_v17 = vld [vmem:[#allocation5 + $0x328] sm:$0xff] }
  0xeb   :  { %4521 = vmatpush3.msra.mxu0 %v297_v18  ;;  %4551 = vmatprep.subr.mxu1 %v5998_v2  ;;  %v773_v18 = vld [vmem:[#allocation5 + $0x3b8] sm:$0xff] }
  0xec   :  { %4522 = vmatprep.subr.mxu0 %v5998_v2  ;;  %4552 = vmatpush3.msra.mxu1 %v393_v20  ;;  %v772_v20 = vld [vmem:[#allocation5 + $0x3b0] sm:$0xff] }
  0xed   :  { %4523 = vmatpush3.msra.mxu0 %v296_v21  ;;  %4553 = vmatprep.subr.mxu1 %v5998_v2  ;;  %v675_v21 = vld [vmem:[#allocation5 + $0x318] sm:$0xff] }
  0xee   :  { %4525 = vmatmul.mubr.msk.f32.vlgmr.msra.gmra.mxu0 %vm292_vm3, %v6014_v54  ;;  %4554 = vmatpush3.msra.mxu1 %v392_v22  ;;  %v771_v22 = vld [vmem:[#allocation5 + $0x3a8] sm:$0xff] }
  0xef   :  { %4562 = vmatprep.subr.mxu0 %v5998_v2  ;;  %4555 = vmatprep.subr.mxu1 %v5998_v2 }
  0xf0   :  { %4563 = vmatpush3.msra.mxu0 %v499_v23  ;;  %4556 = vmatpush3.msra.mxu1 %v391_v24  ;;  %v674_v23 = vld [vmem:[#allocation5 + $0x310] sm:$0xff]  ;;  %v770_v24 = vld [vmem:[#allocation5 + $0x3a0] sm:$0xff] }
  0xf1   :  { %4564 = vmatprep.subr.mxu0 %v5998_v2  ;;  %4557 = vmatprep.subr.mxu1 %v5998_v2 }
  0xf2   :  { %4565 = vmatpush3.msra.mxu0 %v498_v26  ;;  %4558 = vmatpush3.msra.mxu1 %v390_v27  ;;  %v667_v26 = vpop.permute.xlu1 %666  ;;  %v769_v27 = vld [vmem:[#allocation5 + $0x398] sm:$0xff] }
  0xf3   :  { %4559 = vmatprep.mubr.msk.f32.mxu1 %vm5999_vm0, %v5998_v2  ;;  %4566 = vmatprep.subr.mxu0 %v5998_v2  ;;  %vm668_vm7 = vcmp.eq.s32.totalorder %v6150_v51, %v667_v26  ;;  %v1150_v26 = vld [vmem:[#allocation5 + $0x5c0] sm:$0xff] }
  0xf4   :  { %4560 = vmatmul.mubr.msk.f32.vlgmr.msra.gmra.mxu1 %vm386_vm4, %v6014_v54  ;;  %4567 = vmatpush3.msra.mxu0 %v497_v28  ;;  %v672_v28 = vld [vmem:[#allocation5 + $0x300] sm:$0xff] }
  0xf5   :  { %4597 = vmatprep.subr.mxu1 %v5998_v2  ;;  %4568 = vmatprep.subr.mxu0 %v5998_v2 }
  0xf6   :  { %4598 = vmatpush3.msra.mxu1 %v593_v29  ;;  %4569 = vmatpush3.msra.mxu0 %v496_v30  ;;  %v768_v29 = vld [vmem:[#allocation5 + $0x390] sm:$0xff]  ;;  %v875_v30 = vld [vmem:[#allocation5 + $0x478] sm:$0xff] }
  0xf7   :  { %4599 = vmatprep.subr.mxu1 %v5998_v2  ;;  %4570 = vmatprep.subr.mxu0 %v5998_v2 }
  0xf8   :  { %4600 = vmatpush3.msra.mxu1 %v592_v31  ;;  %4571 = vmatpush3.msra.mxu0 %v495_v32  ;;  %v767_v31 = vld [vmem:[#allocation5 + $0x388] sm:$0xff]  ;;  %v761_v32 = vpop.permute.xlu1 %760 }
  0xf9   :  { %4601 = vmatprep.subr.mxu1 %v5998_v2  ;;  %4572 = vmatprep.subr.mxu0 %v5998_v2  ;;  %vm762_vm8 = vcmp.eq.s32.totalorder %v6150_v51, %v761_v32  ;;  %v1147_v32 = vld [vmem:[#allocation5 + $0x5a8] sm:$0xff] }
  0xfa   :  { %4602 = vmatpush3.msra.mxu1 %v591_v33  ;;  %4573 = vmatpush3.msra.mxu0 %v494_v34  ;;  %v874_v33 = vld [vmem:[#allocation5 + $0x470] sm:$0xff]  ;;  %v766_v34 = vld [vmem:[#allocation5 + $0x380] sm:$0xff] }
  0xfb   :  { %4603 = vmatprep.subr.mxu1 %v5998_v2  ;;  %4574 = vmatprep.subr.mxu0 %v5998_v2 }
  0xfc   :  { %4604 = vmatpush3.msra.mxu1 %v590_v35  ;;  %4575 = vmatpush3.msra.mxu0 %v493_v36  ;;  %v873_v35 = vld [vmem:[#allocation5 + $0x468] sm:$0xff]  ;;  %v969_v36 = vld [vmem:[#allocation5 + $0x4f8] sm:$0xff] }
  0xfd   :  { %4605 = vmatprep.subr.mxu1 %v5998_v2  ;;  %4576 = vmatprep.subr.mxu0 %v5998_v2 }
  0xfe   :  { %4606 = vmatpush3.msra.mxu1 %v589_v37  ;;  %4577 = vmatpush3.msra.mxu0 %v492_v38  ;;  %v872_v37 = vld [vmem:[#allocation5 + $0x460] sm:$0xff]  ;;  %v968_v38 = vld [vmem:[#allocation5 + $0x4f0] sm:$0xff] }
  0xff   :  { %4607 = vmatprep.subr.mxu1 %v5998_v2  ;;  %4578 = vmatprep.subr.mxu0 %v5998_v2 }
 0x100   :  { %4608 = vmatpush3.msra.mxu1 %v588_v39  ;;  %4579 = vmatpush3.msra.mxu0 %v491_v40  ;;  %v871_v39 = vld [vmem:[#allocation5 + $0x458] sm:$0xff]  ;;  %v967_v40 = vld [vmem:[#allocation5 + $0x4e8] sm:$0xff] }
 0x101   :  { %4609 = vmatprep.subr.mxu1 %v5998_v2  ;;  %4580 = vmatprep.subr.mxu0 %v5998_v2 }
 0x102   :  { %4610 = vmatpush3.msra.mxu1 %v587_v41  ;;  %4581 = vmatpush3.msra.mxu0 %v490_v42  ;;  %v870_v41 = vld [vmem:[#allocation5 + $0x450] sm:$0xff]  ;;  %v966_v42 = vld [vmem:[#allocation5 + $0x4e0] sm:$0xff] }
 0x103   :  { %4611 = vmatprep.subr.mxu1 %v5998_v2  ;;  %4582 = vmatprep.subr.mxu0 %v5998_v2 }
 0x104   :  { %4612 = vmatpush3.msra.mxu1 %v586_v43  ;;  %4583 = vmatpush3.msra.mxu0 %v489_v44  ;;  %v869_v43 = vld [vmem:[#allocation5 + $0x448] sm:$0xff]  ;;  %v965_v44 = vld [vmem:[#allocation5 + $0x4d8] sm:$0xff] }
 0x105   :  { %4613 = vmatprep.subr.mxu1 %v5998_v2  ;;  %4584 = vmatprep.subr.mxu0 %v5998_v2 }
 0x106   :  { %4614 = vmatpush3.msra.mxu1 %v585_v45  ;;  %4585 = vmatpush3.msra.mxu0 %v488_v46  ;;  %v868_v45 = vld [vmem:[#allocation5 + $0x440] sm:$0xff]  ;;  %v964_v46 = vld [vmem:[#allocation5 + $0x4d0] sm:$0xff] }
 0x107   :  { %4615 = vmatprep.subr.mxu1 %v5998_v2  ;;  %4586 = vmatprep.subr.mxu0 %v5998_v2 }
 0x108   :  { %4616 = vmatpush3.msra.mxu1 %v584_v47  ;;  %4587 = vmatpush3.msra.mxu0 %v487_v48  ;;  %v867_v47 = vld [vmem:[#allocation5 + $0x438] sm:$0xff]  ;;  %v963_v48 = vld [vmem:[#allocation5 + $0x4c8] sm:$0xff] }
 0x109   :  { %4617 = vmatprep.subr.mxu1 %v5998_v2  ;;  %4588 = vmatprep.subr.mxu0 %v5998_v2 }
 0x10a   :  { %4618 = vmatpush3.msra.mxu1 %v583_v49  ;;  %4589 = vmatpush3.msra.mxu0 %v486_v50  ;;  %v866_v49 = vld [vmem:[#allocation5 + $0x430] sm:$0xff]  ;;  %v962_v50 = vld [vmem:[#allocation5 + $0x4c0] sm:$0xff] }
 0x10b   :  { %4619 = vmatprep.subr.mxu1 %v5998_v2  ;;  %4590 = vmatprep.subr.mxu0 %v5998_v2 }
 0x10c   :  { %4620 = vmatpush3.msra.mxu1 %v582_v52  ;;  %4591 = vmatpush3.msra.mxu0 %v485_v53  ;;  %v865_v52 = vld [vmem:[#allocation5 + $0x428] sm:$0xff]  ;;  %v961_v53 = vld [vmem:[#allocation5 + $0x4b8] sm:$0xff] }
 0x10d   :  { %4621 = vmatprep.subr.mxu1 %v5998_v2  ;;  %4592 = vmatprep.subr.mxu0 %v5998_v2 }
 0x10e   :  { %4622 = vmatpush3.msra.mxu1 %v581_v56  ;;  %4593 = vmatpush3.msra.mxu0 %v484_v57  ;;  %v960_v56 = vld [vmem:[#allocation5 + $0x4b0] sm:$0xff]  ;;  %v863_v57 = vld [vmem:[#allocation5 + $0x418] sm:$0xff] }
 0x10f   :  { %4594 = vmatprep.mubr.msk.f32.mxu0 %vm5999_vm0, %v5998_v2  ;;  %4623 = vmatprep.subr.mxu1 %v5998_v2 }
 0x110   :  { %4595 = vmatmul.mubr.msk.f32.vlgmr.msra.gmra.mxu0 %vm480_vm5, %v6014_v54  ;;  %4624 = vmatpush3.msra.mxu1 %v580_v58  ;;  %v959_v58 = vld [vmem:[#allocation5 + $0x4a8] sm:$0xff] }
 0x111   :  { %4632 = vmatprep.subr.mxu0 %v5998_v2  ;;  %4625 = vmatprep.subr.mxu1 %v5998_v2 }
 0x112   :  { %4633 = vmatpush3.msra.mxu0 %v687_v59  ;;  %4626 = vmatpush3.msra.mxu1 %v579_v60  ;;  %v862_v59 = vld [vmem:[#allocation5 + $0x410] sm:$0xff]  ;;  %v958_v60 = vld [vmem:[#allocation5 + $0x4a0] sm:$0xff] }
 0x113   :  { %4634 = vmatprep.subr.mxu0 %v5998_v2  ;;  %4627 = vmatprep.subr.mxu1 %v5998_v2 }
 0x114   :  { %4635 = vmatpush3.msra.mxu0 %v686_v62  ;;  %4628 = vmatpush3.msra.mxu1 %v578_v63  ;;  %v855_v62 = vpop.permute.xlu0 %854  ;;  %v957_v63 = vld [vmem:[#allocation5 + $0x498] sm:$0xff] }
 0x115   :  { %4629 = vmatprep.mubr.msk.f32.mxu1 %vm5999_vm0, %v5998_v2  ;;  %4636 = vmatprep.subr.mxu0 %v5998_v2  ;;  %vm856_vm9 = vcmp.eq.s32.totalorder %v6150_v51, %v855_v62  ;;  %v1339_v62 = vld [vmem:[#allocation5 + $0x6c8] sm:$0xff] }
 0x116   :  { %4630 = vmatmul.mubr.msk.f32.vlgmr.msra.gmra.mxu1 %vm574_vm6, %v6014_v54  ;;  %4637 = vmatpush3.msra.mxu0 %v685_v0  ;;  %v860_v0 = vld [vmem:[#allocation5 + $0x400] sm:$0xff] }
 0x117   :  { %4667 = vmatprep.subr.mxu1 %v5998_v2  ;;  %4638 = vmatprep.subr.mxu0 %v5998_v2 }
 0x118   :  { %4668 = vmatpush3.msra.mxu1 %v781_v1  ;;  %4639 = vmatpush3.msra.mxu0 %v684_v3  ;;  %v956_v1 = vld [vmem:[#allocation5 + $0x490] sm:$0xff]  ;;  %v1063_v3 = vld [vmem:[#allocation5 + $0x578] sm:$0xff] }
 0x119   :  { %4669 = vmatprep.subr.mxu1 %v5998_v2  ;;  %4640 = vmatprep.subr.mxu0 %v5998_v2 }
 0x11a   :  { %4670 = vmatpush3.msra.mxu1 %v780_v4  ;;  %4641 = vmatpush3.msra.mxu0 %v683_v5  ;;  %v955_v4 = vld [vmem:[#allocation5 + $0x488] sm:$0xff]  ;;  %v949_v5 = vpop.permute.xlu1 %948 }
 0x11b   :  { %4671 = vmatprep.subr.mxu1 %v5998_v2  ;;  %4642 = vmatprep.subr.mxu0 %v5998_v2  ;;  %vm950_vm10 = vcmp.eq.s32.totalorder %v6150_v51, %v949_v5  ;;  %v1240_v5 = vld [vmem:[#allocation5 + $0x620] sm:$0xff] }
 0x11c   :  { %4672 = vmatpush3.msra.mxu1 %v779_v6  ;;  %4643 = vmatpush3.msra.mxu0 %v682_v7  ;;  %v6015_v6 = vmov 16   ;;  %v1062_v7 = vld [vmem:[#allocation5 + $0x570] sm:$0xff] }
 0x11d   :  { %4673 = vmatprep.subr.mxu1 %v5998_v2  ;;  %4644 = vmatprep.subr.mxu0 %v5998_v2 }
 0x11e   :  { %4674 = vmatpush3.msra.mxu1 %v778_v8  ;;  %4645 = vmatpush3.msra.mxu0 %v681_v9  ;;  %v954_v8 = vld [vmem:[#allocation5 + $0x480] sm:$0xff]  ;;  %v6311_v9 = vld [vmem:[#allocation2] sm:$0xff] }
 0x11f   :  { %4675 = vmatprep.subr.mxu1 %v5998_v2  ;;  %4646 = vmatprep.subr.mxu0 %v5998_v2 }
 0x120   :  { %4676 = vmatpush3.msra.mxu1 %v777_v10  ;;  %4647 = vmatpush3.msra.mxu0 %v680_v11  ;;  %v1061_v10 = vld [vmem:[#allocation5 + $0x568] sm:$0xff]  ;;  %v1157_v11 = vld [vmem:[#allocation5 + $0x5f8] sm:$0xff] }
 0x121   :  { %4677 = vmatprep.subr.mxu1 %v5998_v2  ;;  %4648 = vmatprep.subr.mxu0 %v5998_v2 }
 0x122   :  { %4678 = vmatpush3.msra.mxu1 %v776_v12  ;;  %4649 = vmatpush3.msra.mxu0 %v679_v13  ;;  %v1060_v12 = vld [vmem:[#allocation5 + $0x560] sm:$0xff]  ;;  %v6016_v13 = vmov 17  }
 0x123   :  { %4679 = vmatprep.subr.mxu1 %v5998_v2  ;;  %4650 = vmatprep.subr.mxu0 %v5998_v2 }
 0x124   :  { %4680 = vmatpush3.msra.mxu1 %v775_v14  ;;  %4651 = vmatpush3.msra.mxu0 %v678_v15  ;;  %v1156_v14 = vld [vmem:[#allocation5 + $0x5f0] sm:$0xff]  ;;  %v1059_v15 = vld [vmem:[#allocation5 + $0x558] sm:$0xff] }
 0x125   :  { %4681 = vmatprep.subr.mxu1 %v5998_v2  ;;  %4652 = vmatprep.subr.mxu0 %v5998_v2 }
 0x126   :  { %4682 = vmatpush3.msra.mxu1 %v774_v16  ;;  %4653 = vmatpush3.msra.mxu0 %v677_v17  ;;  %v1155_v16 = vld [vmem:[#allocation5 + $0x5e8] sm:$0xff]  ;;  %v1058_v17 = vld [vmem:[#allocation5 + $0x550] sm:$0xff] }
 0x127   :  { %4683 = vmatprep.subr.mxu1 %v5998_v2  ;;  %4654 = vmatprep.subr.mxu0 %v5998_v2 }
 0x128   :  { %4684 = vmatpush3.msra.mxu1 %v773_v18  ;;  %4655 = vmatpush3.msra.mxu0 %v676_v19  ;;  %v1154_v18 = vld [vmem:[#allocation5 + $0x5e0] sm:$0xff]  ;;  %v1057_v19 = vld [vmem:[#allocation5 + $0x548] sm:$0xff] }
 0x129   :  { %4685 = vmatprep.subr.mxu1 %v5998_v2  ;;  %4656 = vmatprep.subr.mxu0 %v5998_v2 }
 0x12a   :  { %4686 = vmatpush3.msra.mxu1 %v772_v20  ;;  %4657 = vmatpush3.msra.mxu0 %v675_v21  ;;  %v1153_v20 = vld [vmem:[#allocation5 + $0x5d8] sm:$0xff]  ;;  %v1056_v21 = vld [vmem:[#allocation5 + $0x540] sm:$0xff] }
 0x12b   :  { %4687 = vmatprep.subr.mxu1 %v5998_v2  ;;  %4658 = vmatprep.subr.mxu0 %v5998_v2 }
 0x12c   :  { %4688 = vmatpush3.msra.mxu1 %v771_v22  ;;  %4659 = vmatpush3.msra.mxu0 %v674_v23  ;;  %v1152_v22 = vld [vmem:[#allocation5 + $0x5d0] sm:$0xff]  ;;  %v1055_v23 = vld [vmem:[#allocation5 + $0x538] sm:$0xff] }
 0x12d   :  { %4689 = vmatprep.subr.mxu1 %v5998_v2  ;;  %4660 = vmatprep.subr.mxu0 %v5998_v2 }
 0x12e   :  { %4690 = vmatpush3.msra.mxu1 %v770_v24  ;;  %4661 = vmatpush3.msra.mxu0 %v673_v25  ;;  %v1151_v24 = vld [vmem:[#allocation5 + $0x5c8] sm:$0xff]  ;;  %v1054_v25 = vld [vmem:[#allocation5 + $0x530] sm:$0xff] }
 0x12f   :  { %4691 = vmatprep.subr.mxu1 %v5998_v2  ;;  %4662 = vmatprep.subr.mxu0 %v5998_v2 }
 0x130   :  { %4692 = vmatpush3.msra.mxu1 %v769_v27  ;;  %4663 = vmatpush3.msra.mxu0 %v672_v28  ;;  %v1053_v27 = vld [vmem:[#allocation5 + $0x528] sm:$0xff]  ;;  %v1149_v28 = vld [vmem:[#allocation5 + $0x5b8] sm:$0xff] }
 0x131   :  { %4664 = vmatprep.mubr.msk.f32.mxu0 %vm5999_vm0, %v5998_v2  ;;  %4693 = vmatprep.subr.mxu1 %v5998_v2 }
 0x132   :  { %4665 = vmatmul.mubr.msk.f32.vlgmr.msra.gmra.mxu0 %vm668_vm7, %v6014_v54  ;;  %4694 = vmatpush3.msra.mxu1 %v768_v29  ;;  %v1052_v29 = vld [vmem:[#allocation5 + $0x520] sm:$0xff] }
 0x133   :  { %4702 = vmatprep.subr.mxu0 %v5998_v2  ;;  %4695 = vmatprep.subr.mxu1 %v5998_v2 }
 0x134   :  { %4703 = vmatpush3.msra.mxu0 %v875_v30  ;;  %4696 = vmatpush3.msra.mxu1 %v767_v31  ;;  %v1148_v30 = vld [vmem:[#allocation5 + $0x5b0] sm:$0xff]  ;;  %v1051_v31 = vld [vmem:[#allocation5 + $0x518] sm:$0xff] }
 0x135   :  { %4704 = vmatprep.subr.mxu0 %v5998_v2  ;;  %4697 = vmatprep.subr.mxu1 %v5998_v2 }
 0x136   :  { %4705 = vmatpush3.msra.mxu0 %v874_v33  ;;  %4698 = vmatpush3.msra.mxu1 %v766_v34  ;;  %v1050_v33 = vld [vmem:[#allocation5 + $0x510] sm:$0xff]  ;;  %v1146_v34 = vld [vmem:[#allocation5 + $0x5a0] sm:$0xff] }
 0x137   :  { %4699 = vmatprep.mubr.msk.f32.mxu1 %vm5999_vm0, %v5998_v2  ;;  %4706 = vmatprep.subr.mxu0 %v5998_v2 }
 0x138   :  { %4700 = vmatmul.mubr.msk.f32.vlgmr.msra.gmra.mxu1 %vm762_vm8, %v6014_v54  ;;  %4707 = vmatpush3.msra.mxu0 %v873_v35  ;;  %v1049_v35 = vld [vmem:[#allocation5 + $0x508] sm:$0xff] }
 0x139   :  { %4737 = vmatprep.subr.mxu1 %v5998_v2  ;;  %4708 = vmatprep.subr.mxu0 %v5998_v2 }
 0x13a   :  { %4738 = vmatpush3.msra.mxu1 %v969_v36  ;;  %4709 = vmatpush3.msra.mxu0 %v872_v37  ;;  %v1043_v36 = vpop.permute.xlu1 %1042  ;;  %v1145_v37 = vld [vmem:[#allocation5 + $0x598] sm:$0xff] }
 0x13b   :  { %4739 = vmatprep.subr.mxu1 %v5998_v2  ;;  %4710 = vmatprep.subr.mxu0 %v5998_v2  ;;  %vm1044_vm11 = vcmp.eq.s32.totalorder %v6150_v51, %v1043_v36  ;;  %v1433_v36 = vld [vmem:[#allocation5 + $0x748] sm:$0xff] }
 0x13c   :  { %4740 = vmatpush3.msra.mxu1 %v968_v38  ;;  %4711 = vmatpush3.msra.mxu0 %v871_v39  ;;  %v1048_v38 = vld [vmem:[#allocation5 + $0x500] sm:$0xff]  ;;  %v1144_v39 = vld [vmem:[#allocation5 + $0x590] sm:$0xff] }
 0x13d   :  { %4741 = vmatprep.subr.mxu1 %v5998_v2  ;;  %4712 = vmatprep.subr.mxu0 %v5998_v2 }
 0x13e   :  { %4742 = vmatpush3.msra.mxu1 %v967_v40  ;;  %4713 = vmatpush3.msra.mxu0 %v870_v41  ;;  %v1251_v40 = vld [vmem:[#allocation5 + $0x678] sm:$0xff]  ;;  %v1143_v41 = vld [vmem:[#allocation5 + $0x588] sm:$0xff] }
 0x13f   :  { %4743 = vmatprep.subr.mxu1 %v5998_v2  ;;  %4714 = vmatprep.subr.mxu0 %v5998_v2 }
 0x140   :  { %4744 = vmatpush3.msra.mxu1 %v966_v42  ;;  %4715 = vmatpush3.msra.mxu0 %v869_v43  ;;  %v1137_v42 = vpop.permute.xlu0 %1136  ;;  %v6017_v43 = vmov 18  }
 0x141   :  { %4745 = vmatprep.subr.mxu1 %v5998_v2  ;;  %4716 = vmatprep.subr.mxu0 %v5998_v2  ;;  %vm1138_vm12 = vcmp.eq.s32.totalorder %v6150_v51, %v1137_v42  ;;  %v1527_v42 = vld [vmem:[#allocation5 + $0x7c8] sm:$0xff] }
 0x142   :  { %4746 = vmatpush3.msra.mxu1 %v965_v44  ;;  %4717 = vmatpush3.msra.mxu0 %v868_v45  ;;  %v1250_v44 = vld [vmem:[#allocation5 + $0x670] sm:$0xff]  ;;  %v1142_v45 = vld [vmem:[#allocation5 + $0x580] sm:$0xff] }
 0x143   :  { %4747 = vmatprep.subr.mxu1 %v5998_v2  ;;  %4718 = vmatprep.subr.mxu0 %v5998_v2 }
 0x144   :  { %4748 = vmatpush3.msra.mxu1 %v964_v46  ;;  %4719 = vmatpush3.msra.mxu0 %v867_v47  ;;  %v1249_v46 = vld [vmem:[#allocation5 + $0x668] sm:$0xff]  ;;  %v1345_v47 = vld [vmem:[#allocation5 + $0x6f8] sm:$0xff] }
 0x145   :  { %4749 = vmatprep.subr.mxu1 %v5998_v2  ;;  %4720 = vmatprep.subr.mxu0 %v5998_v2 }
 0x146   :  { %4750 = vmatpush3.msra.mxu1 %v963_v48  ;;  %4721 = vmatpush3.msra.mxu0 %v866_v49  ;;  %v1248_v48 = vld [vmem:[#allocation5 + $0x660] sm:$0xff]  ;;  %v6018_v49 = vmov 19  }
 0x147   :  { %4751 = vmatprep.subr.mxu1 %v5998_v2  ;;  %4722 = vmatprep.subr.mxu0 %v5998_v2 }
 0x148   :  { %4752 = vmatpush3.msra.mxu1 %v962_v50  ;;  %4723 = vmatpush3.msra.mxu0 %v865_v52  ;;  %v1344_v50 = vld [vmem:[#allocation5 + $0x6f0] sm:$0xff]  ;;  %v1247_v52 = vld [vmem:[#allocation5 + $0x658] sm:$0xff] }
 0x149   :  { %4753 = vmatprep.subr.mxu1 %v5998_v2  ;;  %4724 = vmatprep.subr.mxu0 %v5998_v2 }
 0x14a   :  { %4754 = vmatpush3.msra.mxu1 %v961_v53  ;;  %4725 = vmatpush3.msra.mxu0 %v864_v55  ;;  %v1343_v53 = vld [vmem:[#allocation5 + $0x6e8] sm:$0xff]  ;;  %v1246_v55 = vld [vmem:[#allocation5 + $0x650] sm:$0xff] }
 0x14b   :  { %4755 = vmatprep.subr.mxu1 %v5998_v2  ;;  %4726 = vmatprep.subr.mxu0 %v5998_v2 }
 0x14c   :  { %4756 = vmatpush3.msra.mxu1 %v960_v56  ;;  %4727 = vmatpush3.msra.mxu0 %v863_v57  ;;  %v1342_v56 = vld [vmem:[#allocation5 + $0x6e0] sm:$0xff]  ;;  %v1245_v57 = vld [vmem:[#allocation5 + $0x648] sm:$0xff] }
 0x14d   :  { %4757 = vmatprep.subr.mxu1 %v5998_v2  ;;  %4728 = vmatprep.subr.mxu0 %v5998_v2 }
 0x14e   :  { %4758 = vmatpush3.msra.mxu1 %v959_v58  ;;  %4729 = vmatpush3.msra.mxu0 %v862_v59  ;;  %v1341_v58 = vld [vmem:[#allocation5 + $0x6d8] sm:$0xff]  ;;  %v1244_v59 = vld [vmem:[#allocation5 + $0x640] sm:$0xff] }
 0x14f   :  { %4759 = vmatprep.subr.mxu1 %v5998_v2  ;;  %4730 = vmatprep.subr.mxu0 %v5998_v2 }
 0x150   :  { %4760 = vmatpush3.msra.mxu1 %v958_v60  ;;  %4731 = vmatpush3.msra.mxu0 %v861_v61  ;;  %v1340_v60 = vld [vmem:[#allocation5 + $0x6d0] sm:$0xff]  ;;  %v1243_v61 = vld [vmem:[#allocation5 + $0x638] sm:$0xff] }
 0x151   :  { %4761 = vmatprep.subr.mxu1 %v5998_v2  ;;  %4732 = vmatprep.subr.mxu0 %v5998_v2 }
 0x152   :  { %4762 = vmatpush3.msra.mxu1 %v957_v63  ;;  %4733 = vmatpush3.msra.mxu0 %v860_v0  ;;  %v1242_v63 = vld [vmem:[#allocation5 + $0x630] sm:$0xff]  ;;  %v1338_v0 = vld [vmem:[#allocation5 + $0x6c0] sm:$0xff] }
 0x153   :  { %4734 = vmatprep.mubr.msk.f32.mxu0 %vm5999_vm0, %v5998_v2  ;;  %4763 = vmatprep.subr.mxu1 %v5998_v2 }
 0x154   :  { %4735 = vmatmul.mubr.msk.f32.vlgmr.msra.gmra.mxu0 %vm856_vm9, %v6014_v54  ;;  %4764 = vmatpush3.msra.mxu1 %v956_v1  ;;  %v1241_v1 = vld [vmem:[#allocation5 + $0x628] sm:$0xff] }
 0x155   :  { %4772 = vmatprep.subr.mxu0 %v5998_v2  ;;  %4765 = vmatprep.subr.mxu1 %v5998_v2 }
 0x156   :  { %4773 = vmatpush3.msra.mxu0 %v1063_v3  ;;  %5816 = vset.pattern.permute.xlu1 %v6015_v6 }
 0x157   :  { %4766 = vmatpush3.msra.mxu1 %v955_v4  ;;  %4774 = vmatprep.subr.mxu0 %v5998_v2  ;;  %v1337_v4 = vld [vmem:[#allocation5 + $0x6b8] sm:$0xff] }
 0x158   :  { %1606 = vperm.xlu1 %5816, %v6311_v9   ;;  %4767 = vmatprep.subr.mxu1 %v5998_v2 }
 0x159   :  { %4775 = vmatpush3.msra.mxu0 %v1062_v7  ;;  %4768 = vmatpush3.msra.mxu1 %v954_v8  ;;  %v1336_v7 = vld [vmem:[#allocation5 + $0x6b0] sm:$0xff]  ;;  %v1239_v8 = vld [vmem:[#allocation5 + $0x618] sm:$0xff] }
 0x15a   :  { %4769 = vmatprep.mubr.msk.f32.mxu1 %vm5999_vm0, %v5998_v2  ;;  %4776 = vmatprep.subr.mxu0 %v5998_v2 }
 0x15b   :  { %4770 = vmatmul.mubr.msk.f32.vlgmr.msra.gmra.mxu1 %vm950_vm10, %v6014_v54  ;;  %4777 = vmatpush3.msra.mxu0 %v1061_v10  ;;  %v1335_v10 = vld [vmem:[#allocation5 + $0x6a8] sm:$0xff] }
 0x15c   :  { %4807 = vmatprep.subr.mxu1 %v5998_v2  ;;  %4778 = vmatprep.subr.mxu0 %v5998_v2 }
 0x15d   :  { %4808 = vmatpush3.msra.mxu1 %v1157_v11  ;;  %5817 = vset.pattern.permute.xlu0 %v6016_v13  ;;  %v1238_v11 = vld [vmem:[#allocation5 + $0x610] sm:$0xff] }
 0x15e   :  { %4779 = vmatpush3.msra.mxu0 %v1060_v12  ;;  %4809 = vmatprep.subr.mxu1 %v5998_v2 }
 0x15f   :  { %1700 = vperm.xlu0 %5817, %v6311_v9   ;;  %4780 = vmatprep.subr.mxu0 %v5998_v2 }
 0x160   :  { %4810 = vmatpush3.msra.mxu1 %v1156_v14  ;;  %4781 = vmatpush3.msra.mxu0 %v1059_v15  ;;  %v1334_v14 = vld [vmem:[#allocation5 + $0x6a0] sm:$0xff]  ;;  %v1237_v15 = vld [vmem:[#allocation5 + $0x608] sm:$0xff] }
 0x161   :  { %4811 = vmatprep.subr.mxu1 %v5998_v2  ;;  %4782 = vmatprep.subr.mxu0 %v5998_v2 }
 0x162   :  { %4812 = vmatpush3.msra.mxu1 %v1155_v16  ;;  %4783 = vmatpush3.msra.mxu0 %v1058_v17  ;;  %v1231_v17 = vpop.permute.xlu1 %1230 }
 0x163   :  { %4813 = vmatprep.subr.mxu1 %v5998_v2  ;;  %4784 = vmatprep.subr.mxu0 %v5998_v2  ;;  %vm1232_vm13 = vcmp.eq.s32.totalorder %v6150_v51, %v1231_v17  ;;  %v1718_v17 = vld [vmem:[#allocation5 + $0x8e0] sm:$0xff] }
 0x164   :  { %4814 = vmatpush3.msra.mxu1 %v1154_v18  ;;  %4785 = vmatpush3.msra.mxu0 %v1057_v19  ;;  %v1333_v18 = vld [vmem:[#allocation5 + $0x698] sm:$0xff]  ;;  %v1236_v19 = vld [vmem:[#allocation5 + $0x600] sm:$0xff] }
 0x165   :  { %4815 = vmatprep.subr.mxu1 %v5998_v2  ;;  %4786 = vmatprep.subr.mxu0 %v5998_v2 }
 0x166   :  { %4816 = vmatpush3.msra.mxu1 %v1153_v20  ;;  %4787 = vmatpush3.msra.mxu0 %v1056_v21  ;;  %v1332_v20 = vld [vmem:[#allocation5 + $0x690] sm:$0xff]  ;;  %v1439_v21 = vld [vmem:[#allocation5 + $0x778] sm:$0xff] }
 0x167   :  { %4817 = vmatprep.subr.mxu1 %v5998_v2  ;;  %4788 = vmatprep.subr.mxu0 %v5998_v2 }
 0x168   :  { %4818 = vmatpush3.msra.mxu1 %v1152_v22  ;;  %4789 = vmatpush3.msra.mxu0 %v1055_v23  ;;  %v1331_v22 = vld [vmem:[#allocation5 + $0x688] sm:$0xff]  ;;  %v1325_v23 = vpop.permute.xlu1 %1324 }
 0x169   :  { %4819 = vmatprep.subr.mxu1 %v5998_v2  ;;  %4790 = vmatprep.subr.mxu0 %v5998_v2  ;;  %vm1326_vm14 = vcmp.eq.s32.totalorder %v6150_v51, %v1325_v23  ;;  %v1619_v23 = vld [vmem:[#allocation5 + $0x838] sm:$0xff] }
 0x16a   :  { %4820 = vmatpush3.msra.mxu1 %v1151_v24  ;;  %4791 = vmatpush3.msra.mxu0 %v1054_v25  ;;  %v6019_v24 = vmov 20   ;;  %v1438_v25 = vld [vmem:[#allocation5 + $0x770] sm:$0xff] }
 0x16b   :  { %4821 = vmatprep.subr.mxu1 %v5998_v2  ;;  %4792 = vmatprep.subr.mxu0 %v5998_v2 }
 0x16c   :  { %4822 = vmatpush3.msra.mxu1 %v1150_v26  ;;  %4793 = vmatpush3.msra.mxu0 %v1053_v27  ;;  %v1330_v26 = vld [vmem:[#allocation5 + $0x680] sm:$0xff]  ;;  %v1437_v27 = vld [vmem:[#allocation5 + $0x768] sm:$0xff] }
 0x16d   :  { %4823 = vmatprep.subr.mxu1 %v5998_v2  ;;  %4794 = vmatprep.subr.mxu0 %v5998_v2 }
 0x16e   :  { %4824 = vmatpush3.msra.mxu1 %v1149_v28  ;;  %4795 = vmatpush3.msra.mxu0 %v1052_v29  ;;  %v1533_v28 = vld [vmem:[#allocation5 + $0x7f8] sm:$0xff]  ;;  %v1436_v29 = vld [vmem:[#allocation5 + $0x760] sm:$0xff] }
 0x16f   :  { %4825 = vmatprep.subr.mxu1 %v5998_v2  ;;  %4796 = vmatprep.subr.mxu0 %v5998_v2 }
 0x170   :  { %4826 = vmatpush3.msra.mxu1 %v1148_v30  ;;  %4797 = vmatpush3.msra.mxu0 %v1051_v31  ;;  %v6020_v30 = vmov 21   ;;  %v1532_v31 = vld [vmem:[#allocation5 + $0x7f0] sm:$0xff] }
 0x171   :  { %4827 = vmatprep.subr.mxu1 %v5998_v2  ;;  %4798 = vmatprep.subr.mxu0 %v5998_v2 }
 0x172   :  { %4828 = vmatpush3.msra.mxu1 %v1147_v32  ;;  %4799 = vmatpush3.msra.mxu0 %v1050_v33  ;;  %v1435_v32 = vld [vmem:[#allocation5 + $0x758] sm:$0xff]  ;;  %v1531_v33 = vld [vmem:[#allocation5 + $0x7e8] sm:$0xff] }
 0x173   :  { %4829 = vmatprep.subr.mxu1 %v5998_v2  ;;  %4800 = vmatprep.subr.mxu0 %v5998_v2 }
 0x174   :  { %4830 = vmatpush3.msra.mxu1 %v1146_v34  ;;  %4801 = vmatpush3.msra.mxu0 %v1049_v35  ;;  %v1434_v34 = vld [vmem:[#allocation5 + $0x750] sm:$0xff]  ;;  %v1530_v35 = vld [vmem:[#allocation5 + $0x7e0] sm:$0xff] }
 0x175   :  { %4831 = vmatprep.subr.mxu1 %v5998_v2  ;;  %4802 = vmatprep.subr.mxu0 %v5998_v2 }
 0x176   :  { %4832 = vmatpush3.msra.mxu1 %v1145_v37  ;;  %4803 = vmatpush3.msra.mxu0 %v1048_v38  ;;  %v1529_v37 = vld [vmem:[#allocation5 + $0x7d8] sm:$0xff]  ;;  %v1432_v38 = vld [vmem:[#allocation5 + $0x740] sm:$0xff] }
 0x177   :  { %4804 = vmatprep.mubr.msk.f32.mxu0 %vm5999_vm0, %v5998_v2  ;;  %4833 = vmatprep.subr.mxu1 %v5998_v2 }
 0x178   :  { %4805 = vmatmul.mubr.msk.f32.vlgmr.msra.gmra.mxu0 %vm1044_vm11, %v6014_v54  ;;  %4834 = vmatpush3.msra.mxu1 %v1144_v39  ;;  %v1528_v39 = vld [vmem:[#allocation5 + $0x7d0] sm:$0xff] }
 0x179   :  { %4842 = vmatprep.subr.mxu0 %v5998_v2  ;;  %4835 = vmatprep.subr.mxu1 %v5998_v2 }
 0x17a   :  { %4843 = vmatpush3.msra.mxu0 %v1251_v40  ;;  %5818 = vset.pattern.permute.xlu1 %v6017_v43  ;;  %v1431_v40 = vld [vmem:[#allocation5 + $0x738] sm:$0xff]  ;;  %v1430_v43 = vld [vmem:[#allocation5 + $0x730] sm:$0xff] }
 0x17b   :  { %4836 = vmatpush3.msra.mxu1 %v1143_v41  ;;  %4844 = vmatprep.subr.mxu0 %v5998_v2 }
 0x17c   :  { %1794 = vperm.xlu1 %5818, %v6311_v9   ;;  %4837 = vmatprep.subr.mxu1 %v5998_v2 }
 0x17d   :  { %4845 = vmatpush3.msra.mxu0 %v1250_v44  ;;  %4838 = vmatpush3.msra.mxu1 %v1142_v45 }
 0x17e   :  { %4839 = vmatprep.mubr.msk.f32.mxu1 %vm5999_vm0, %v5998_v2  ;;  %4846 = vmatprep.subr.mxu0 %v5998_v2 }
 0x17f   :  { %4840 = vmatmul.mubr.msk.f32.vlgmr.msra.gmra.mxu1 %vm1138_vm12, %v6014_v54  ;;  %4847 = vmatpush3.msra.mxu0 %v1249_v46  ;;  %v1526_v46 = vld [vmem:[#allocation5 + $0x7c0] sm:$0xff] }
 0x180   :  { %4877 = vmatprep.subr.mxu1 %v5998_v2  ;;  %4848 = vmatprep.subr.mxu0 %v5998_v2 }
 0x181   :  { %4878 = vmatpush3.msra.mxu1 %v1345_v47  ;;  %5819 = vset.pattern.permute.xlu1 %v6018_v49  ;;  %v1429_v47 = vld [vmem:[#allocation5 + $0x728] sm:$0xff]  ;;  %v1428_v49 = vld [vmem:[#allocation5 + $0x720] sm:$0xff] }
 0x182   :  { %4849 = vmatpush3.msra.mxu0 %v1248_v48  ;;  %4879 = vmatprep.subr.mxu1 %v5998_v2  ;;  %v1525_v48 = vld [vmem:[#allocation5 + $0x7b8] sm:$0xff] }
 0x183   :  { %1888 = vperm.xlu1 %5819, %v6311_v9   ;;  %4850 = vmatprep.subr.mxu0 %v5998_v2 }
 0x184   :  { %4880 = vmatpush3.msra.mxu1 %v1344_v50  ;;  %4851 = vmatpush3.msra.mxu0 %v1247_v52  ;;  %v1524_v52 = vld [vmem:[#allocation5 + $0x7b0] sm:$0xff] }
 0x185   :  { %4881 = vmatprep.subr.mxu1 %v5998_v2  ;;  %4852 = vmatprep.subr.mxu0 %v5998_v2 }
 0x186   :  { %4882 = vmatpush3.msra.mxu1 %v1343_v53  ;;  %4853 = vmatpush3.msra.mxu0 %v1246_v55  ;;  %v1427_v53 = vld [vmem:[#allocation5 + $0x718] sm:$0xff] }
 0x187   :  { %4883 = vmatprep.subr.mxu1 %v5998_v2  ;;  %4854 = vmatprep.subr.mxu0 %v5998_v2 }
 0x188   :  { %4884 = vmatpush3.msra.mxu1 %v1342_v56  ;;  %4855 = vmatpush3.msra.mxu0 %v1245_v57  ;;  %v1523_v57 = vld [vmem:[#allocation5 + $0x7a8] sm:$0xff] }
 0x189   :  { %4885 = vmatprep.subr.mxu1 %v5998_v2  ;;  %4856 = vmatprep.subr.mxu0 %v5998_v2 }
 0x18a   :  { %4886 = vmatpush3.msra.mxu1 %v1341_v58  ;;  %4857 = vmatpush3.msra.mxu0 %v1244_v59  ;;  %v1426_v58 = vld [vmem:[#allocation5 + $0x710] sm:$0xff]  ;;  %v1522_v59 = vld [vmem:[#allocation5 + $0x7a0] sm:$0xff] }
 0x18b   :  { %4887 = vmatprep.subr.mxu1 %v5998_v2  ;;  %4858 = vmatprep.subr.mxu0 %v5998_v2 }
 0x18c   :  { %4888 = vmatpush3.msra.mxu1 %v1340_v60  ;;  %4859 = vmatpush3.msra.mxu0 %v1243_v61  ;;  %v1425_v60 = vld [vmem:[#allocation5 + $0x708] sm:$0xff]  ;;  %v1419_v61 = vpop.permute.xlu0 %1418 }
 0x18d   :  { %4889 = vmatprep.subr.mxu1 %v5998_v2  ;;  %4860 = vmatprep.subr.mxu0 %v5998_v2  ;;  %vm1420_vm15 = vcmp.eq.s32.totalorder %v6150_v51, %v1419_v61  ;;  %v1906_v61 = vld [vmem:[#allocation5 + $0x9e0] sm:$0xff] }
 0x18e   :  { %4890 = vmatpush3.msra.mxu1 %v1339_v62  ;;  %4861 = vmatpush3.msra.mxu0 %v1242_v63  ;;  %v215_v3 = vpop.f32.mrf.mxu0  ;;  %v1521_v62 = vld [vmem:[#allocation5 + $0x798] sm:$0xff]  ;;  %v1424_v63 = vld [vmem:[#allocation5 + $0x700] sm:$0xff] }
 0x18f   :  { %4891 = vmatprep.subr.mxu1 %v5998_v2  ;;  %4862 = vmatprep.subr.mxu0 %v5998_v2 }
 0x190   :  { %4892 = vmatpush3.msra.mxu1 %v1338_v0  ;;  %4863 = vmatpush3.msra.mxu0 %v1241_v1  ;;  %v4456_v6 = vpop.f32.mrf.mxu0  ;;  %v1520_v0 = vld [vmem:[#allocation5 + $0x790] sm:$0xff]  ;;  %v1627_v1 = vld [vmem:[#allocation5 + $0x878] sm:$0xff] }
 0x191   :  { %4893 = vmatprep.subr.mxu1 %v5998_v2  ;;  %4864 = vmatprep.subr.mxu0 %v5998_v2  ;;  %v1626_v6 = vld [vmem:[#allocation5 + $0x870] sm:$0xff] }
 0x192   :  { %4894 = vmatpush3.msra.mxu1 %v1337_v4  ;;  %4865 = vmatpush3.msra.mxu0 %v1240_v5  ;;  %v1513_v4 = vpop.permute.xlu1 %1512  ;;  %v6021_v5 = vmov 22  }
 0x193   :  { %4895 = vmatprep.subr.mxu1 %v5998_v2  ;;  %4866 = vmatprep.subr.mxu0 %v5998_v2  ;;  %v285_v12 = vpop.f32.mrf.mxu1  ;;  %vm1514_vm1 = vcmp.eq.s32.totalorder %v6150_v51, %v1513_v4  ;;  %v1904_v4 = vld [vmem:[#allocation5 + $0x9d0] sm:$0xff] }
 0x194   :  { %4896 = vmatpush3.msra.mxu1 %v1336_v7  ;;  %4867 = vmatpush3.msra.mxu0 %v1239_v8  ;;  %v6383_v13 = vadd.f32 %v285_v12, %v215_v3  ;;  %v1519_v3 = vld [vmem:[#allocation5 + $0x788] sm:$0xff]  ;;  %v1518_v7 = vld [vmem:[#allocation5 + $0x780] sm:$0xff]  ;;  %v6022_v12 = vmov 23  }
 0x195   :  { %4897 = vmatprep.subr.mxu1 %v5998_v2  ;;  %4868 = vmatprep.subr.mxu0 %v5998_v2  ;;  %v4491_v16 = vpop.f32.mrf.mxu1  ;;  %v1625_v8 = vld [vmem:[#allocation5 + $0x868] sm:$0xff] }
 0x196   :  { %4898 = vmatpush3.msra.mxu1 %v1335_v10  ;;  %4869 = vmatpush3.msra.mxu0 %v1238_v11  ;;  %v1721_v10 = vld [vmem:[#allocation5 + $0x8f8] sm:$0xff]  ;;  %v1624_v11 = vld [vmem:[#allocation5 + $0x860] sm:$0xff]  ;;  %v1622_v16 = vld [vmem:[#allocation5 + $0x850] sm:$0xff] }
 0x197   :  { %4899 = vmatprep.subr.mxu1 %v5998_v2  ;;  %4870 = vmatprep.subr.mxu0 %v5998_v2 }
 0x198   :  { %4900 = vmatpush3.msra.mxu1 %v1334_v14  ;;  %4871 = vmatpush3.msra.mxu0 %v1237_v15  ;;  %v1623_v14 = vld [vmem:[#allocation5 + $0x858] sm:$0xff]  ;;  %v1719_v15 = vld [vmem:[#allocation5 + $0x8e8] sm:$0xff] }
 0x199   :  { %4901 = vmatprep.subr.mxu1 %v5998_v2  ;;  %4872 = vmatprep.subr.mxu0 %v5998_v2 }
 0x19a   :  { %4902 = vmatpush3.msra.mxu1 %v1333_v18  ;;  %4873 = vmatpush3.msra.mxu0 %v1236_v19  ;;  %v1621_v18 = vld [vmem:[#allocation5 + $0x848] sm:$0xff]  ;;  %v1717_v19 = vld [vmem:[#allocation5 + $0x8d8] sm:$0xff] }
 0x19b   :  { %4874 = vmatprep.mubr.msk.f32.mxu0 %vm5999_vm0, %v5998_v2  ;;  %4903 = vmatprep.subr.mxu1 %v5998_v2 }
 0x19c   :  { %4875 = vmatmul.mubr.msk.f32.vlgmr.msra.gmra.mxu0 %vm1232_vm13, %v6014_v54  ;;  %4904 = vmatpush3.msra.mxu1 %v1332_v20  ;;  %v1620_v20 = vld [vmem:[#allocation5 + $0x840] sm:$0xff] }
 0x19d   :  { %4912 = vmatprep.subr.mxu0 %v5998_v2  ;;  %4905 = vmatprep.subr.mxu1 %v5998_v2 }
 0x19e   :  { %4913 = vmatpush3.msra.mxu0 %v1439_v21  ;;  %5820 = vset.pattern.permute.xlu0 %v6019_v24 }
 0x19f   :  { %4906 = vmatpush3.msra.mxu1 %v1331_v22  ;;  %4914 = vmatprep.subr.mxu0 %v5998_v2  ;;  %v1716_v22 = vld [vmem:[#allocation5 + $0x8d0] sm:$0xff] }
 0x1a0   :  { %1982 = vperm.xlu0 %5820, %v6311_v9   ;;  %4907 = vmatprep.subr.mxu1 %v5998_v2 }
 0x1a1   :  { %4915 = vmatpush3.msra.mxu0 %v1438_v25  ;;  %4908 = vmatpush3.msra.mxu1 %v1330_v26  ;;  %v1715_v26 = vld [vmem:[#allocation5 + $0x8c8] sm:$0xff] }
 0x1a2   :  { %4909 = vmatprep.mubr.msk.f32.mxu1 %vm5999_vm0, %v5998_v2  ;;  %4916 = vmatprep.subr.mxu0 %v5998_v2 }
 0x1a3   :  { %4910 = vmatmul.mubr.msk.f32.vlgmr.msra.gmra.mxu1 %vm1326_vm14, %v6014_v54  ;;  %4917 = vmatpush3.msra.mxu0 %v1437_v27  ;;  %v1618_v27 = vld [vmem:[#allocation5 + $0x830] sm:$0xff] }
 0x1a4   :  { %4947 = vmatprep.subr.mxu1 %v5998_v2  ;;  %4918 = vmatprep.subr.mxu0 %v5998_v2 }
 0x1a5   :  { %4948 = vmatpush3.msra.mxu1 %v1533_v28  ;;  %5821 = vset.pattern.permute.xlu1 %v6020_v30  ;;  %v1714_v28 = vld [vmem:[#allocation5 + $0x8c0] sm:$0xff] }
 0x1a6   :  { %4919 = vmatpush3.msra.mxu0 %v1436_v29  ;;  %4949 = vmatprep.subr.mxu1 %v5998_v2  ;;  %v1617_v29 = vld [vmem:[#allocation5 + $0x828] sm:$0xff] }
 0x1a7   :  { %2076 = vperm.xlu1 %5821, %v6311_v9   ;;  %4920 = vmatprep.subr.mxu0 %v5998_v2 }
 0x1a8   :  { %4950 = vmatpush3.msra.mxu1 %v1532_v31  ;;  %4921 = vmatpush3.msra.mxu0 %v1435_v32  ;;  %v1713_v31 = vld [vmem:[#allocation5 + $0x8b8] sm:$0xff]  ;;  %v1616_v32 = vld [vmem:[#allocation5 + $0x820] sm:$0xff] }
 0x1a9   :  { %4951 = vmatprep.subr.mxu1 %v5998_v2  ;;  %4922 = vmatprep.subr.mxu0 %v5998_v2 }
 0x1aa   :  { %4952 = vmatpush3.msra.mxu1 %v1531_v33  ;;  %4923 = vmatpush3.msra.mxu0 %v1434_v34 }
 0x1ab   :  { %4953 = vmatprep.subr.mxu1 %v5998_v2  ;;  %4924 = vmatprep.subr.mxu0 %v5998_v2 }
 0x1ac   :  { %4954 = vmatpush3.msra.mxu1 %v1530_v35  ;;  %4925 = vmatpush3.msra.mxu0 %v1433_v36  ;;  %v1712_v35 = vld [vmem:[#allocation5 + $0x8b0] sm:$0xff]  ;;  %v1615_v36 = vld [vmem:[#allocation5 + $0x818] sm:$0xff] }
 0x1ad   :  { %4955 = vmatprep.subr.mxu1 %v5998_v2  ;;  %4926 = vmatprep.subr.mxu0 %v5998_v2 }
 0x1ae   :  { %4956 = vmatpush3.msra.mxu1 %v1529_v37  ;;  %4927 = vmatpush3.msra.mxu0 %v1432_v38  ;;  %v378_v41 = vpop.f32.mrf.mxu0  ;;  %v1711_v37 = vld [vmem:[#allocation5 + $0x8a8] sm:$0xff]  ;;  %v1614_v38 = vld [vmem:[#allocation5 + $0x810] sm:$0xff] }
 0x1af   :  { %4957 = vmatprep.subr.mxu1 %v5998_v2  ;;  %4928 = vmatprep.subr.mxu0 %v5998_v2  ;;  %v382_v44 = vadd.f32 %v378_v41, %v6383_v13  ;;  %v1720_v13 = vld [vmem:[#allocation5 + $0x8f0] sm:$0xff] }
 0x1b0   :  { %4958 = vmatpush3.msra.mxu1 %v1528_v39  ;;  %4929 = vmatpush3.msra.mxu0 %v1431_v40  ;;  %v4526_v45 = vpop.f32.mrf.mxu0  ;;  %v1710_v39 = vld [vmem:[#allocation5 + $0x8a0] sm:$0xff]  ;;  %v1613_v40 = vld [vmem:[#allocation5 + $0x808] sm:$0xff] }
 0x1b1   :  { %4959 = vmatprep.subr.mxu1 %v5998_v2  ;;  %4930 = vmatprep.subr.mxu0 %v5998_v2  ;;  %v1815_v45 = vld [vmem:[#allocation5 + $0x978] sm:$0xff] }
 0x1b2   :  { %4960 = vmatpush3.msra.mxu1 %v1527_v42  ;;  %4931 = vmatpush3.msra.mxu0 %v1430_v43  ;;  %v1709_v42 = vld [vmem:[#allocation5 + $0x898] sm:$0xff]  ;;  %v1612_v43 = vld [vmem:[#allocation5 + $0x800] sm:$0xff] }
 0x1b3   :  { %4961 = vmatprep.subr.mxu1 %v5998_v2  ;;  %4932 = vmatprep.subr.mxu0 %v5998_v2 }
 0x1b4   :  { %4962 = vmatpush3.msra.mxu1 %v1526_v46  ;;  %4933 = vmatpush3.msra.mxu0 %v1429_v47  ;;  %v472_v50 = vpop.f32.mrf.mxu1  ;;  %v1707_v46 = vld [vmem:[#allocation5 + $0x888] sm:$0xff] }
 0x1b5   :  { %4963 = vmatprep.subr.mxu1 %v5998_v2  ;;  %4934 = vmatprep.subr.mxu0 %v5998_v2  ;;  %v6426_v55 = vadd.f32 %v472_v50, %v382_v44  ;;  %v1708_v44 = vld [vmem:[#allocation5 + $0x890] sm:$0xff]  ;;  %v1706_v50 = vld [vmem:[#allocation5 + $0x880] sm:$0xff] }
 0x1b6   :  { %4964 = vmatpush3.msra.mxu1 %v1525_v48  ;;  %4935 = vmatpush3.msra.mxu0 %v1428_v49  ;;  %v4561_v56 = vpop.f32.mrf.mxu1  ;;  %v6023_v48 = vmov 24   ;;  %v1814_v49 = vld [vmem:[#allocation5 + $0x970] sm:$0xff] }
 0x1b7   :  { %4965 = vmatprep.subr.mxu1 %v5998_v2  ;;  %4936 = vmatprep.subr.mxu0 %v5998_v2  ;;  %v6024_v56 = vmov 25  }
 0x1b8   :  { %4966 = vmatpush3.msra.mxu1 %v1524_v52  ;;  %4937 = vmatpush3.msra.mxu0 %v1427_v53  ;;  %v1813_v52 = vld [vmem:[#allocation5 + $0x968] sm:$0xff]  ;;  %v1909_v53 = vld [vmem:[#allocation5 + $0x9f8] sm:$0xff] }
 0x1b9   :  { %4967 = vmatprep.subr.mxu1 %v5998_v2  ;;  %4938 = vmatprep.subr.mxu0 %v5998_v2 }
 0x1ba   :  { %4968 = vmatpush3.msra.mxu1 %v1523_v57  ;;  %4939 = vmatpush3.msra.mxu0 %v1426_v58  ;;  %v1908_v57 = vld [vmem:[#allocation5 + $0x9f0] sm:$0xff]  ;;  %v1811_v58 = vld [vmem:[#allocation5 + $0x958] sm:$0xff] }
 0x1bb   :  { %4969 = vmatprep.subr.mxu1 %v5998_v2  ;;  %4940 = vmatprep.subr.mxu0 %v5998_v2 }
 0x1bc   :  { %4970 = vmatpush3.msra.mxu1 %v1522_v59  ;;  %4941 = vmatpush3.msra.mxu0 %v1425_v60  ;;  %v1907_v59 = vld [vmem:[#allocation5 + $0x9e8] sm:$0xff]  ;;  %v1810_v60 = vld [vmem:[#allocation5 + $0x950] sm:$0xff] }
 0x1bd   :  { %4971 = vmatprep.subr.mxu1 %v5998_v2  ;;  %4942 = vmatprep.subr.mxu0 %v5998_v2 }
 0x1be   :  { %4972 = vmatpush3.msra.mxu1 %v1521_v62  ;;  %4943 = vmatpush3.msra.mxu0 %v1424_v63  ;;  %v1809_v62 = vld [vmem:[#allocation5 + $0x948] sm:$0xff] }
 0x1bf   :  { %4944 = vmatprep.mubr.msk.f32.mxu0 %vm5999_vm0, %v5998_v2  ;;  %4973 = vmatprep.subr.mxu1 %v5998_v2 }
 0x1c0   :  { %4945 = vmatmul.mubr.msk.f32.vlgmr.msra.gmra.mxu0 %vm1420_vm15, %v6014_v54  ;;  %4974 = vmatpush3.msra.mxu1 %v1520_v0  ;;  %v1808_v0 = vld [vmem:[#allocation5 + $0x940] sm:$0xff] }
 0x1c1   :  { %4982 = vmatprep.subr.mxu0 %v5998_v2  ;;  %4975 = vmatprep.subr.mxu1 %v5998_v2 }
 0x1c2   :  { %4983 = vmatpush3.msra.mxu0 %v1627_v1  ;;  %5822 = vset.pattern.permute.xlu1 %v6021_v5  ;;  %v1807_v5 = vld [vmem:[#allocation5 + $0x938] sm:$0xff] }
 0x1c3   :  { %4976 = vmatpush3.msra.mxu1 %v1519_v3  ;;  %4984 = vmatprep.subr.mxu0 %v5998_v2 }
 0x1c4   :  { %2170 = vperm.xlu1 %5822, %v6311_v9   ;;  %4977 = vmatprep.subr.mxu1 %v5998_v2 }
 0x1c5   :  { %4985 = vmatpush3.msra.mxu0 %v1626_v6  ;;  %4978 = vmatpush3.msra.mxu1 %v1518_v7  ;;  %v1903_v6 = vld [vmem:[#allocation5 + $0x9c8] sm:$0xff]  ;;  %v1806_v7 = vld [vmem:[#allocation5 + $0x930] sm:$0xff] }
 0x1c6   :  { %4979 = vmatprep.mubr.msk.f32.mxu1 %vm5999_vm0, %v5998_v2  ;;  %4986 = vmatprep.subr.mxu0 %v5998_v2 }
 0x1c7   :  { %4980 = vmatmul.mubr.msk.f32.vlgmr.msra.gmra.mxu1 %vm1514_vm1, %v6014_v54  ;;  %4987 = vmatpush3.msra.mxu0 %v1625_v8 }
 0x1c8   :  { %5017 = vmatprep.subr.mxu1 %v5998_v2  ;;  %4988 = vmatprep.subr.mxu0 %v5998_v2 }
 0x1c9   :  { %5018 = vmatpush3.msra.mxu1 %v1721_v10  ;;  %5823 = vset.pattern.permute.xlu0 %v6022_v12  ;;  %v1902_v10 = vld [vmem:[#allocation5 + $0x9c0] sm:$0xff] }
 0x1ca   :  { %4989 = vmatpush3.msra.mxu0 %v1624_v11  ;;  %5019 = vmatprep.subr.mxu1 %v5998_v2  ;;  %v1805_v11 = vld [vmem:[#allocation5 + $0x928] sm:$0xff] }
 0x1cb   :  { %2264 = vperm.xlu0 %5823, %v6311_v9   ;;  %4990 = vmatprep.subr.mxu0 %v5998_v2 }
 0x1cc   :  { %5020 = vmatpush3.msra.mxu1 %v1720_v13  ;;  %4991 = vmatpush3.msra.mxu0 %v1623_v14  ;;  %v1901_v14 = vld [vmem:[#allocation5 + $0x9b8] sm:$0xff] }
 0x1cd   :  { %5021 = vmatprep.subr.mxu1 %v5998_v2  ;;  %4992 = vmatprep.subr.mxu0 %v5998_v2 }
 0x1ce   :  { %5022 = vmatpush3.msra.mxu1 %v1719_v15  ;;  %4993 = vmatpush3.msra.mxu0 %v1622_v16  ;;  %v1804_v15 = vld [vmem:[#allocation5 + $0x920] sm:$0xff]  ;;  %v1900_v16 = vld [vmem:[#allocation5 + $0x9b0] sm:$0xff] }
 0x1cf   :  { %5023 = vmatprep.subr.mxu1 %v5998_v2  ;;  %4994 = vmatprep.subr.mxu0 %v5998_v2 }
 0x1d0   :  { %5024 = vmatpush3.msra.mxu1 %v1718_v17  ;;  %4995 = vmatpush3.msra.mxu0 %v1621_v18  ;;  %v566_v21 = vpop.f32.mrf.mxu0  ;;  %v1803_v17 = vld [vmem:[#allocation5 + $0x918] sm:$0xff]  ;;  %v1899_v18 = vld [vmem:[#allocation5 + $0x9a8] sm:$0xff] }
 0x1d1   :  { %5025 = vmatprep.subr.mxu1 %v5998_v2  ;;  %4996 = vmatprep.subr.mxu0 %v5998_v2  ;;  %v570_v24 = vadd.f32 %v566_v21, %v6426_v55  ;;  %v1812_v55 = vld [vmem:[#allocation5 + $0x960] sm:$0xff]  ;;  %v1801_v21 = vld [vmem:[#allocation5 + $0x908] sm:$0xff] }
 0x1d2   :  { %5026 = vmatpush3.msra.mxu1 %v1717_v19  ;;  %4997 = vmatpush3.msra.mxu0 %v1620_v20  ;;  %v4596_v25 = vpop.f32.mrf.mxu0  ;;  %v1802_v19 = vld [vmem:[#allocation5 + $0x910] sm:$0xff]  ;;  %v1898_v20 = vld [vmem:[#allocation5 + $0x9a0] sm:$0xff] }
 0x1d3   :  { %5027 = vmatprep.subr.mxu1 %v5998_v2  ;;  %4998 = vmatprep.subr.mxu0 %v5998_v2  ;;  %v1607_v41 = vpop.permute.xlu1 %1606  ;;  %v1896_v25 = vld [vmem:[#allocation5 + $0x990] sm:$0xff] }
 0x1d4   :  { %5028 = vmatpush3.msra.mxu1 %v1716_v22  ;;  %4999 = vmatpush3.msra.mxu0 %v1619_v23  ;;  %vm1608_vm2 = vcmp.eq.s32.totalorder %v6150_v51, %v1607_v41  ;;  %v1897_v23 = vld [vmem:[#allocation5 + $0x998] sm:$0xff] }
 0x1d5   :  { %5029 = vmatprep.subr.mxu1 %v5998_v2  ;;  %5000 = vmatprep.subr.mxu0 %v5998_v2 }
 0x1d6   :  { %5030 = vmatpush3.msra.mxu1 %v1715_v26  ;;  %5001 = vmatpush3.msra.mxu0 %v1618_v27  ;;  %v660_v30 = vpop.f32.mrf.mxu1  ;;  %v2003_v26 = vld [vmem:[#allocation5 + $0xa78] sm:$0xff]  ;;  %v1895_v27 = vld [vmem:[#allocation5 + $0x988] sm:$0xff] }
 0x1d7   :  { %5031 = vmatprep.subr.mxu1 %v5998_v2  ;;  %5002 = vmatprep.subr.mxu0 %v5998_v2  ;;  %v6469_v33 = vadd.f32 %v660_v30, %v570_v24  ;;  %v1800_v24 = vld [vmem:[#allocation5 + $0x900] sm:$0xff]  ;;  %v2002_v30 = vld [vmem:[#allocation5 + $0xa70] sm:$0xff] }
 0x1d8   :  { %5032 = vmatpush3.msra.mxu1 %v1714_v28  ;;  %5003 = vmatpush3.msra.mxu0 %v1617_v29  ;;  %v4631_v34 = vpop.f32.mrf.mxu1  ;;  %v6025_v29 = vmov 26  }
 0x1d9   :  { %5033 = vmatprep.subr.mxu1 %v5998_v2  ;;  %5004 = vmatprep.subr.mxu0 %v5998_v2  ;;  %v2097_v34 = vld [vmem:[#allocation5 + $0xaf8] sm:$0xff] }
 0x1da   :  { %5034 = vmatpush3.msra.mxu1 %v1713_v31  ;;  %5005 = vmatpush3.msra.mxu0 %v1616_v32  ;;  %v1701_v47 = vpop.permute.xlu0 %1700  ;;  %v1894_v31 = vld [vmem:[#allocation5 + $0x980] sm:$0xff]  ;;  %v6535_v32 = vld [vmem:[#allocation2] sm:$0xff] }
 0x1db   :  { %5035 = vmatprep.subr.mxu1 %v5998_v2  ;;  %5006 = vmatprep.subr.mxu0 %v5998_v2  ;;  %vm1702_vm3 = vcmp.eq.s32.totalorder %v6150_v51, %v1701_v47  ;;  %v1996_v47 = vld [vmem:[#allocation5 + $0xa40] sm:$0xff] }
 0x1dc   :  { %5036 = vmatpush3.msra.mxu1 %v1712_v35  ;;  %5007 = vmatpush3.msra.mxu0 %v1615_v36  ;;  %v2000_v35 = vld [vmem:[#allocation5 + $0xa60] sm:$0xff]  ;;  %v6026_v36 = vmov 27  }
 0x1dd   :  { %5037 = vmatprep.subr.mxu1 %v5998_v2  ;;  %5008 = vmatprep.subr.mxu0 %v5998_v2 }
 0x1de   :  { %5038 = vmatpush3.msra.mxu1 %v1711_v37  ;;  %5009 = vmatpush3.msra.mxu0 %v1614_v38  ;;  %v2096_v37 = vld [vmem:[#allocation5 + $0xaf0] sm:$0xff]  ;;  %v1999_v38 = vld [vmem:[#allocation5 + $0xa58] sm:$0xff] }
 0x1df   :  { %5039 = vmatprep.subr.mxu1 %v5998_v2  ;;  %5010 = vmatprep.subr.mxu0 %v5998_v2 }
 0x1e0   :  { %5040 = vmatpush3.msra.mxu1 %v1710_v39  ;;  %5011 = vmatpush3.msra.mxu0 %v1613_v40  ;;  %v2095_v39 = vld [vmem:[#allocation5 + $0xae8] sm:$0xff]  ;;  %v1998_v40 = vld [vmem:[#allocation5 + $0xa50] sm:$0xff] }
 0x1e1   :  { %5041 = vmatprep.subr.mxu1 %v5998_v2  ;;  %5012 = vmatprep.subr.mxu0 %v5998_v2 }
 0x1e2   :  { %5042 = vmatpush3.msra.mxu1 %v1709_v42  ;;  %5013 = vmatpush3.msra.mxu0 %v1612_v43  ;;  %v2094_v42 = vld [vmem:[#allocation5 + $0xae0] sm:$0xff]  ;;  %v1997_v43 = vld [vmem:[#allocation5 + $0xa48] sm:$0xff] }
 0x1e3   :  { %5014 = vmatprep.mubr.msk.f32.mxu0 %vm5999_vm0, %v5998_v2  ;;  %5043 = vmatprep.subr.mxu1 %v5998_v2 }
 0x1e4   :  { %5015 = vmatmul.mubr.msk.f32.vlgmr.msra.gmra.mxu0 %vm1608_vm2, %v6014_v54  ;;  %5044 = vmatpush3.msra.mxu1 %v1708_v44 }
 0x1e5   :  { %5052 = vmatprep.subr.mxu0 %v5998_v2  ;;  %5045 = vmatprep.subr.mxu1 %v5998_v2 }
 0x1e6   :  { %5053 = vmatpush3.msra.mxu0 %v1815_v45  ;;  %5824 = vset.pattern.permute.xlu1 %v6023_v48  ;;  %v2092_v48 = vld [vmem:[#allocation5 + $0xad0] sm:$0xff] }
 0x1e7   :  { %5046 = vmatpush3.msra.mxu1 %v1707_v46  ;;  %5054 = vmatprep.subr.mxu0 %v5998_v2  ;;  %v2093_v46 = vld [vmem:[#allocation5 + $0xad8] sm:$0xff] }
 0x1e8   :  { %2358 = vperm.xlu1 %5824, %v6311_v9   ;;  %5047 = vmatprep.subr.mxu1 %v5998_v2 }
 0x1e9   :  { %5055 = vmatpush3.msra.mxu0 %v1814_v49  ;;  %5048 = vmatpush3.msra.mxu1 %v1706_v50  ;;  %v1995_v49 = vld [vmem:[#allocation5 + $0xa38] sm:$0xff]  ;;  %v2091_v50 = vld [vmem:[#allocation5 + $0xac8] sm:$0xff] }
 0x1ea   :  { %5049 = vmatprep.mubr.msk.f32.mxu1 %vm5999_vm0, %v5998_v2  ;;  %5056 = vmatprep.subr.mxu0 %v5998_v2 }
 0x1eb   :  { %5050 = vmatmul.mubr.msk.f32.vlgmr.msra.gmra.mxu1 %vm1702_vm3, %v6014_v54  ;;  %5057 = vmatpush3.msra.mxu0 %v1813_v52  ;;  %v1994_v52 = vld [vmem:[#allocation5 + $0xa30] sm:$0xff] }
 0x1ec   :  { %5087 = vmatprep.subr.mxu1 %v5998_v2  ;;  %5058 = vmatprep.subr.mxu0 %v5998_v2 }
 0x1ed   :  { %5088 = vmatpush3.msra.mxu1 %v1909_v53  ;;  %5825 = vset.pattern.permute.xlu1 %v6024_v56  ;;  %v2090_v56 = vld [vmem:[#allocation5 + $0xac0] sm:$0xff] }
 0x1ee   :  { %5059 = vmatpush3.msra.mxu0 %v1812_v55  ;;  %5089 = vmatprep.subr.mxu1 %v5998_v2 }
 0x1ef   :  { %2452 = vperm.xlu1 %5825, %v6311_v9   ;;  %5060 = vmatprep.subr.mxu0 %v5998_v2  ;;  %v1905_v9 = vld [vmem:[#allocation5 + $0x9d8] sm:$0xff] }
 0x1f0   :  { %5090 = vmatpush3.msra.mxu1 %v1908_v57  ;;  %5061 = vmatpush3.msra.mxu0 %v1811_v58  ;;  %v1993_v57 = vld [vmem:[#allocation5 + $0xa28] sm:$0xff] }
 0x1f1   :  { %5091 = vmatprep.subr.mxu1 %v5998_v2  ;;  %5062 = vmatprep.subr.mxu0 %v5998_v2 }
 0x1f2   :  { %5092 = vmatpush3.msra.mxu1 %v1907_v59  ;;  %5063 = vmatpush3.msra.mxu0 %v1810_v60  ;;  %v754_v63 = vpop.f32.mrf.mxu0  ;;  %v2089_v59 = vld [vmem:[#allocation5 + $0xab8] sm:$0xff]  ;;  %v1992_v60 = vld [vmem:[#allocation5 + $0xa20] sm:$0xff] }
 0x1f3   :  { %5093 = vmatprep.subr.mxu1 %v5998_v2  ;;  %5064 = vmatprep.subr.mxu0 %v5998_v2  ;;  %v758_v1 = vadd.f32 %v754_v63, %v6469_v33  ;;  %v2001_v33 = vld [vmem:[#allocation5 + $0xa68] sm:$0xff] }
 0x1f4   :  { %5094 = vmatpush3.msra.mxu1 %v1906_v61  ;;  %5065 = vmatpush3.msra.mxu0 %v1809_v62  ;;  %v4666_v3 = vpop.f32.mrf.mxu0  ;;  %v2088_v61 = vld [vmem:[#allocation5 + $0xab0] sm:$0xff]  ;;  %v1991_v62 = vld [vmem:[#allocation5 + $0xa18] sm:$0xff]  ;;  %v2087_v63 = vld [vmem:[#allocation5 + $0xaa8] sm:$0xff] }
 0x1f5   :  { %5095 = vmatprep.subr.mxu1 %v5998_v2  ;;  %5066 = vmatprep.subr.mxu0 %v5998_v2 }
 0x1f6   :  { %5096 = vmatpush3.msra.mxu1 %v1905_v9  ;;  %5067 = vmatpush3.msra.mxu0 %v1808_v0  ;;  %v1990_v9 = vld [vmem:[#allocation5 + $0xa10] sm:$0xff]  ;;  %v2086_v0 = vld [vmem:[#allocation5 + $0xaa0] sm:$0xff] }
 0x1f7   :  { %5097 = vmatprep.subr.mxu1 %v5998_v2  ;;  %5068 = vmatprep.subr.mxu0 %v5998_v2  ;;  %v1795_v22 = vpop.permute.xlu1 %1794 }
 0x1f8   :  { %5098 = vmatpush3.msra.mxu1 %v1904_v4  ;;  %5069 = vmatpush3.msra.mxu0 %v1807_v5  ;;  %v848_v8 = vpop.f32.mrf.mxu1  ;;  %vm1796_vm4 = vcmp.eq.s32.totalorder %v6150_v51, %v1795_v22  ;;  %v2085_v4 = vld [vmem:[#allocation5 + $0xa98] sm:$0xff]  ;;  %v1988_v5 = vld [vmem:[#allocation5 + $0xa00] sm:$0xff] }
 0x1f9   :  { %5099 = vmatprep.subr.mxu1 %v5998_v2  ;;  %5070 = vmatprep.subr.mxu0 %v5998_v2  ;;  %v6512_v12 = vadd.f32 %v848_v8, %v758_v1  ;;  %v1989_v1 = vld [vmem:[#allocation5 + $0xa08] sm:$0xff] }
 0x1fa   :  { %5100 = vmatpush3.msra.mxu1 %v1903_v6  ;;  %5071 = vmatpush3.msra.mxu0 %v1806_v7  ;;  %v4701_v13 = vpop.f32.mrf.mxu1  ;;  %v2084_v6 = vld [vmem:[#allocation5 + $0xa90] sm:$0xff]  ;;  %v2191_v7 = vld [vmem:[#allocation5 + $0xb78] sm:$0xff]  ;;  %v2083_v8 = vld [vmem:[#allocation5 + $0xa88] sm:$0xff] }
 0x1fb   :  { %5101 = vmatprep.subr.mxu1 %v5998_v2  ;;  %5072 = vmatprep.subr.mxu0 %v5998_v2  ;;  %v2082_v13 = vld [vmem:[#allocation5 + $0xa80] sm:$0xff] }
 0x1fc   :  { %5102 = vmatpush3.msra.mxu1 %v1902_v10  ;;  %5073 = vmatpush3.msra.mxu0 %v1805_v11  ;;  %v6027_v11 = vmov 28  }
 0x1fd   :  { %5103 = vmatprep.subr.mxu1 %v5998_v2  ;;  %5074 = vmatprep.subr.mxu0 %v5998_v2 }
 0x1fe   :  { %5104 = vmatpush3.msra.mxu1 %v1901_v14  ;;  %5075 = vmatpush3.msra.mxu0 %v1804_v15  ;;  %v1889_v28 = vpop.permute.xlu1 %1888  ;;  %v2189_v14 = vld [vmem:[#allocation5 + $0xb68] sm:$0xff]  ;;  %v2285_v15 = vld [vmem:[#allocation5 + $0xbf8] sm:$0xff] }
 0x1ff   :  { %5105 = vmatprep.subr.mxu1 %v5998_v2  ;;  %5076 = vmatprep.subr.mxu0 %v5998_v2  ;;  %vm1890_vm5 = vcmp.eq.s32.totalorder %v6150_v51, %v1889_v28  ;;  %v2184_v28 = vld [vmem:[#allocation5 + $0xb40] sm:$0xff] }
 0x200   :  { %5106 = vmatpush3.msra.mxu1 %v1900_v16  ;;  %5077 = vmatpush3.msra.mxu0 %v1803_v17  ;;  %v2188_v16 = vld [vmem:[#allocation5 + $0xb60] sm:$0xff]  ;;  %v6028_v17 = vmov 29  }
 0x201   :  { %5107 = vmatprep.subr.mxu1 %v5998_v2  ;;  %5078 = vmatprep.subr.mxu0 %v5998_v2 }
 0x202   :  { %5108 = vmatpush3.msra.mxu1 %v1899_v18  ;;  %5079 = vmatpush3.msra.mxu0 %v1802_v19  ;;  %v2284_v18 = vld [vmem:[#allocation5 + $0xbf0] sm:$0xff]  ;;  %v2187_v19 = vld [vmem:[#allocation5 + $0xb58] sm:$0xff] }
 0x203   :  { %5109 = vmatprep.subr.mxu1 %v5998_v2  ;;  %5080 = vmatprep.subr.mxu0 %v5998_v2 }
 0x204   :  { %5110 = vmatpush3.msra.mxu1 %v1898_v20  ;;  %5081 = vmatpush3.msra.mxu0 %v1801_v21  ;;  %v2283_v20 = vld [vmem:[#allocation5 + $0xbe8] sm:$0xff]  ;;  %v2186_v21 = vld [vmem:[#allocation5 + $0xb50] sm:$0xff] }
 0x205   :  { %5111 = vmatprep.subr.mxu1 %v5998_v2  ;;  %5082 = vmatprep.subr.mxu0 %v5998_v2 }
 0x206   :  { %5112 = vmatpush3.msra.mxu1 %v1897_v23  ;;  %5083 = vmatpush3.msra.mxu0 %v1800_v24  ;;  %v2282_v23 = vld [vmem:[#allocation5 + $0xbe0] sm:$0xff]  ;;  %v2185_v24 = vld [vmem:[#allocation5 + $0xb48] sm:$0xff] }
 0x207   :  { %5084 = vmatprep.mubr.msk.f32.mxu0 %vm5999_vm0, %v5998_v2  ;;  %5113 = vmatprep.subr.mxu1 %v5998_v2 }
 0x208   :  { %5085 = vmatmul.mubr.msk.f32.vlgmr.msra.gmra.mxu0 %vm1796_vm4, %v6014_v54  ;;  %5114 = vmatpush3.msra.mxu1 %v1896_v25 }
 0x209   :  { %5122 = vmatprep.subr.mxu0 %v5998_v2  ;;  %5115 = vmatprep.subr.mxu1 %v5998_v2 }
 0x20a   :  { %5123 = vmatpush3.msra.mxu0 %v2003_v26  ;;  %5826 = vset.pattern.permute.xlu0 %v6025_v29  ;;  %v2280_v29 = vld [vmem:[#allocation5 + $0xbd0] sm:$0xff] }
 0x20b   :  { %5116 = vmatpush3.msra.mxu1 %v1895_v27  ;;  %5124 = vmatprep.subr.mxu0 %v5998_v2  ;;  %v2281_v27 = vld [vmem:[#allocation5 + $0xbd8] sm:$0xff] }
 0x20c   :  { %2546 = vperm.xlu0 %5826, %v6535_v32   ;;  %5117 = vmatprep.subr.mxu1 %v5998_v2 }
 0x20d   :  { %5125 = vmatpush3.msra.mxu0 %v2002_v30  ;;  %5118 = vmatpush3.msra.mxu1 %v1894_v31  ;;  %v2183_v30 = vld [vmem:[#allocation5 + $0xb38] sm:$0xff]  ;;  %v2279_v31 = vld [vmem:[#allocation5 + $0xbc8] sm:$0xff] }
 0x20e   :  { %5119 = vmatprep.mubr.msk.f32.mxu1 %vm5999_vm0, %v5998_v2  ;;  %5126 = vmatprep.subr.mxu0 %v5998_v2 }
 0x20f   :  { %5120 = vmatmul.mubr.msk.f32.vlgmr.msra.gmra.mxu1 %vm1890_vm5, %v6014_v54  ;;  %5127 = vmatpush3.msra.mxu0 %v2001_v33  ;;  %v2182_v33 = vld [vmem:[#allocation5 + $0xb30] sm:$0xff] }
 0x210   :  { %5157 = vmatprep.subr.mxu1 %v5998_v2  ;;  %5128 = vmatprep.subr.mxu0 %v5998_v2 }
 0x211   :  { %5158 = vmatpush3.msra.mxu1 %v2097_v34  ;;  %5827 = vset.pattern.permute.xlu1 %v6026_v36  ;;  %v2278_v36 = vld [vmem:[#allocation5 + $0xbc0] sm:$0xff] }
 0x212   :  { %5129 = vmatpush3.msra.mxu0 %v2000_v35  ;;  %5159 = vmatprep.subr.mxu1 %v5998_v2 }
 0x213   :  { %2640 = vperm.xlu1 %5827, %v6535_v32   ;;  %5130 = vmatprep.subr.mxu0 %v5998_v2 }
 0x214   :  { %5160 = vmatpush3.msra.mxu1 %v2096_v37  ;;  %5131 = vmatpush3.msra.mxu0 %v1999_v38  ;;  %v942_v41 = vpop.f32.mrf.mxu0  ;;  %v2181_v37 = vld [vmem:[#allocation5 + $0xb28] sm:$0xff] }
 0x215   :  { %5161 = vmatprep.subr.mxu1 %v5998_v2  ;;  %5132 = vmatprep.subr.mxu0 %v5998_v2  ;;  %v946_v44 = vadd.f32 %v942_v41, %v6512_v12  ;;  %v2190_v12 = vld [vmem:[#allocation5 + $0xb70] sm:$0xff] }
 0x216   :  { %5162 = vmatpush3.msra.mxu1 %v2095_v39  ;;  %5133 = vmatpush3.msra.mxu0 %v1998_v40  ;;  %v4736_v45 = vpop.f32.mrf.mxu0  ;;  %v2277_v39 = vld [vmem:[#allocation5 + $0xbb8] sm:$0xff]  ;;  %v2180_v40 = vld [vmem:[#allocation5 + $0xb20] sm:$0xff]  ;;  %v2276_v41 = vld [vmem:[#allocation5 + $0xbb0] sm:$0xff] }
 0x217   :  { %5163 = vmatprep.subr.mxu1 %v5998_v2  ;;  %5134 = vmatprep.subr.mxu0 %v5998_v2  ;;  %v2274_v45 = vld [vmem:[#allocation5 + $0xba0] sm:$0xff] }
 0x218   :  { %5164 = vmatpush3.msra.mxu1 %v2094_v42  ;;  %5135 = vmatpush3.msra.mxu0 %v1997_v43  ;;  %v2179_v42 = vld [vmem:[#allocation5 + $0xb18] sm:$0xff]  ;;  %v2275_v43 = vld [vmem:[#allocation5 + $0xba8] sm:$0xff] }
 0x219   :  { %5165 = vmatprep.subr.mxu1 %v5998_v2  ;;  %5136 = vmatprep.subr.mxu0 %v5998_v2 }
 0x21a   :  { %5166 = vmatpush3.msra.mxu1 %v2093_v46  ;;  %5137 = vmatpush3.msra.mxu0 %v1996_v47  ;;  %v2177_v46 = vld [vmem:[#allocation5 + $0xb08] sm:$0xff] }
 0x21b   :  { %5167 = vmatprep.subr.mxu1 %v5998_v2  ;;  %5138 = vmatprep.subr.mxu0 %v5998_v2  ;;  %v1036_v53 = vpop.f32.mrf.mxu1  ;;  %v1983_v3 = vpop.permute.xlu0 %1982 }
 0x21c   :  { %5168 = vmatpush3.msra.mxu1 %v2092_v48  ;;  %5139 = vmatpush3.msra.mxu0 %v1995_v49  ;;  %v6557_v55 = vadd.f32 %v1036_v53, %v946_v44  ;;  %vm1984_vm6 = vcmp.eq.s32.totalorder %v6150_v51, %v1983_v3  ;;  %v2178_v44 = vld [vmem:[#allocation5 + $0xb10] sm:$0xff]  ;;  %v2273_v48 = vld [vmem:[#allocation5 + $0xb98] sm:$0xff]  ;;  %v2176_v49 = vld [vmem:[#allocation5 + $0xb00] sm:$0xff] }
 0x21d   :  { %5169 = vmatprep.subr.mxu1 %v5998_v2  ;;  %5140 = vmatprep.subr.mxu0 %v5998_v2  ;;  %v4771_v58 = vpop.f32.mrf.mxu1  ;;  %v2271_v53 = vld [vmem:[#allocation5 + $0xb88] sm:$0xff] }
 0x21e   :  { %5170 = vmatpush3.msra.mxu1 %v2091_v50  ;;  %5141 = vmatpush3.msra.mxu0 %v1994_v52  ;;  %v2272_v50 = vld [vmem:[#allocation5 + $0xb90] sm:$0xff]  ;;  %v2379_v52 = vld [vmem:[#allocation5 + $0xc78] sm:$0xff]  ;;  %v2270_v58 = vld [vmem:[#allocation5 + $0xb80] sm:$0xff] }
 0x21f   :  { %5171 = vmatprep.subr.mxu1 %v5998_v2  ;;  %5142 = vmatprep.subr.mxu0 %v5998_v2 }
 0x220   :  { %5172 = vmatpush3.msra.mxu1 %v2090_v56  ;;  %5143 = vmatpush3.msra.mxu0 %v1993_v57  ;;  %v6029_v56 = vmov 30   ;;  %v2378_v57 = vld [vmem:[#allocation5 + $0xc70] sm:$0xff] }
 0x221   :  { %5173 = vmatprep.subr.mxu1 %v5998_v2  ;;  %5144 = vmatprep.subr.mxu0 %v5998_v2 }
 0x222   :  { %5174 = vmatpush3.msra.mxu1 %v2089_v59  ;;  %5145 = vmatpush3.msra.mxu0 %v1992_v60  ;;  %v2077_v10 = vpop.permute.xlu1 %2076  ;;  %v2377_v59 = vld [vmem:[#allocation5 + $0xc68] sm:$0xff]  ;;  %v2473_v60 = vld [vmem:[#allocation5 + $0xcf8] sm:$0xff] }
 0x223   :  { %5175 = vmatprep.subr.mxu1 %v5998_v2  ;;  %5146 = vmatprep.subr.mxu0 %v5998_v2  ;;  %vm2078_vm7 = vcmp.eq.s32.totalorder %v6150_v51, %v2077_v10  ;;  %v2372_v10 = vld [vmem:[#allocation5 + $0xc40] sm:$0xff] }
 0x224   :  { %5176 = vmatpush3.msra.mxu1 %v2088_v61  ;;  %5147 = vmatpush3.msra.mxu0 %v1991_v62  ;;  %v2376_v61 = vld [vmem:[#allocation5 + $0xc60] sm:$0xff]  ;;  %v6030_v62 = vmov 31  }
 0x225   :  { %5177 = vmatprep.subr.mxu1 %v5998_v2  ;;  %5148 = vmatprep.subr.mxu0 %v5998_v2 }
 0x226   :  { %5178 = vmatpush3.msra.mxu1 %v2087_v63  ;;  %5149 = vmatpush3.msra.mxu0 %v1990_v9  ;;  %v2472_v63 = vld [vmem:[#allocation5 + $0xcf0] sm:$0xff]  ;;  %v2375_v9 = vld [vmem:[#allocation5 + $0xc58] sm:$0xff] }
 0x227   :  { %5179 = vmatprep.subr.mxu1 %v5998_v2  ;;  %5150 = vmatprep.subr.mxu0 %v5998_v2 }
 0x228   :  { %5180 = vmatpush3.msra.mxu1 %v2086_v0  ;;  %5151 = vmatpush3.msra.mxu0 %v1989_v1  ;;  %v2471_v0 = vld [vmem:[#allocation5 + $0xce8] sm:$0xff]  ;;  %v2374_v1 = vld [vmem:[#allocation5 + $0xc50] sm:$0xff] }
 0x229   :  { %5181 = vmatprep.subr.mxu1 %v5998_v2  ;;  %5152 = vmatprep.subr.mxu0 %v5998_v2 }
 0x22a   :  { %5182 = vmatpush3.msra.mxu1 %v2085_v4  ;;  %5153 = vmatpush3.msra.mxu0 %v1988_v5  ;;  %v2470_v4 = vld [vmem:[#allocation5 + $0xce0] sm:$0xff]  ;;  %v2373_v5 = vld [vmem:[#allocation5 + $0xc48] sm:$0xff] }
 0x22b   :  { %5154 = vmatprep.mubr.msk.f32.mxu0 %vm5999_vm0, %v5998_v2  ;;  %5183 = vmatprep.subr.mxu1 %v5998_v2 }
 0x22c   :  { %5155 = vmatmul.mubr.msk.f32.vlgmr.msra.gmra.mxu0 %vm1984_vm6, %v6014_v54  ;;  %5184 = vmatpush3.msra.mxu1 %v2084_v6 }
 0x22d   :  { %5192 = vmatprep.subr.mxu0 %v5998_v2  ;;  %5185 = vmatprep.subr.mxu1 %v5998_v2 }
 0x22e   :  { %5193 = vmatpush3.msra.mxu0 %v2191_v7  ;;  %5828 = vset.pattern.permute.xlu1 %v6027_v11  ;;  %v2468_v11 = vld [vmem:[#allocation5 + $0xcd0] sm:$0xff] }
 0x22f   :  { %5186 = vmatpush3.msra.mxu1 %v2083_v8  ;;  %5194 = vmatprep.subr.mxu0 %v5998_v2  ;;  %v2469_v8 = vld [vmem:[#allocation5 + $0xcd8] sm:$0xff] }
 0x230   :  { %2734 = vperm.xlu1 %5828, %v6535_v32   ;;  %5187 = vmatprep.subr.mxu1 %v5998_v2 }
 0x231   :  { %5195 = vmatpush3.msra.mxu0 %v2190_v12  ;;  %5188 = vmatpush3.msra.mxu1 %v2082_v13  ;;  %v2371_v12 = vld [vmem:[#allocation5 + $0xc38] sm:$0xff]  ;;  %v2467_v13 = vld [vmem:[#allocation5 + $0xcc8] sm:$0xff] }
 0x232   :  { %5189 = vmatprep.mubr.msk.f32.mxu1 %vm5999_vm0, %v5998_v2  ;;  %5196 = vmatprep.subr.mxu0 %v5998_v2 }
 0x233   :  { %5190 = vmatmul.mubr.msk.f32.vlgmr.msra.gmra.mxu1 %vm2078_vm7, %v6014_v54  ;;  %5197 = vmatpush3.msra.mxu0 %v2189_v14  ;;  %v2370_v14 = vld [vmem:[#allocation5 + $0xc30] sm:$0xff] }
 0x234   :  { %5227 = vmatprep.subr.mxu1 %v5998_v2  ;;  %5198 = vmatprep.subr.mxu0 %v5998_v2 }
 0x235   :  { %5228 = vmatpush3.msra.mxu1 %v2285_v15  ;;  %5829 = vset.pattern.permute.xlu0 %v6028_v17  ;;  %v2466_v17 = vld [vmem:[#allocation5 + $0xcc0] sm:$0xff] }
 0x236   :  { %5199 = vmatpush3.msra.mxu0 %v2188_v16  ;;  %5229 = vmatprep.subr.mxu1 %v5998_v2 }
 0x237   :  { %2828 = vperm.xlu0 %5829, %v6535_v32   ;;  %5200 = vmatprep.subr.mxu0 %v5998_v2 }
 0x238   :  { %5230 = vmatpush3.msra.mxu1 %v2284_v18  ;;  %5201 = vmatpush3.msra.mxu0 %v2187_v19  ;;  %v1130_v22 = vpop.f32.mrf.mxu0  ;;  %v2369_v18 = vld [vmem:[#allocation5 + $0xc28] sm:$0xff] }
 0x239   :  { %5231 = vmatprep.subr.mxu1 %v5998_v2  ;;  %5202 = vmatprep.subr.mxu0 %v5998_v2  ;;  %v1134_v25 = vadd.f32 %v1130_v22, %v6557_v55  ;;  %v2464_v22 = vld [vmem:[#allocation5 + $0xcb0] sm:$0xff] }
 0x23a   :  { %5232 = vmatpush3.msra.mxu1 %v2283_v20  ;;  %5203 = vmatpush3.msra.mxu0 %v2186_v21  ;;  %v4806_v26 = vpop.f32.mrf.mxu0  ;;  %v2465_v20 = vld [vmem:[#allocation5 + $0xcb8] sm:$0xff]  ;;  %v2368_v21 = vld [vmem:[#allocation5 + $0xc20] sm:$0xff] }
 0x23b   :  { %5233 = vmatprep.subr.mxu1 %v5998_v2  ;;  %5204 = vmatprep.subr.mxu0 %v5998_v2  ;;  %v2462_v26 = vld [vmem:[#allocation5 + $0xca0] sm:$0xff] }
 0x23c   :  { %5234 = vmatpush3.msra.mxu1 %v2282_v23  ;;  %5205 = vmatpush3.msra.mxu0 %v2185_v24  ;;  %v2367_v23 = vld [vmem:[#allocation5 + $0xc18] sm:$0xff]  ;;  %v2463_v24 = vld [vmem:[#allocation5 + $0xca8] sm:$0xff] }
 0x23d   :  { %5235 = vmatprep.subr.mxu1 %v5998_v2  ;;  %5206 = vmatprep.subr.mxu0 %v5998_v2 }
 0x23e   :  { %5236 = vmatpush3.msra.mxu1 %v2281_v27  ;;  %5207 = vmatpush3.msra.mxu0 %v2184_v28  ;;  %v2365_v27 = vld [vmem:[#allocation5 + $0xc08] sm:$0xff] }
 0x23f   :  { %5237 = vmatprep.subr.mxu1 %v5998_v2  ;;  %5208 = vmatprep.subr.mxu0 %v5998_v2  ;;  %v1224_v34 = vpop.f32.mrf.mxu1  ;;  %v2171_v47 = vpop.permute.xlu1 %2170 }
 0x240   :  { %5238 = vmatpush3.msra.mxu1 %v2280_v29  ;;  %5209 = vmatpush3.msra.mxu0 %v2183_v30  ;;  %v6602_v35 = vadd.f32 %v1224_v34, %v1134_v25  ;;  %vm2172_vm8 = vcmp.eq.s32.totalorder %v6150_v51, %v2171_v47  ;;  %v2366_v25 = vld [vmem:[#allocation5 + $0xc10] sm:$0xff]  ;;  %v2461_v29 = vld [vmem:[#allocation5 + $0xc98] sm:$0xff]  ;;  %v2364_v30 = vld [vmem:[#allocation5 + $0xc00] sm:$0xff] }
 0x241   :  { %5239 = vmatprep.subr.mxu1 %v5998_v2  ;;  %5210 = vmatprep.subr.mxu0 %v5998_v2  ;;  %v4841_v38 = vpop.f32.mrf.mxu1  ;;  %v2459_v34 = vld [vmem:[#allocation5 + $0xc88] sm:$0xff] }
 0x242   :  { %5240 = vmatpush3.msra.mxu1 %v2279_v31  ;;  %5211 = vmatpush3.msra.mxu0 %v2182_v33  ;;  %v2460_v31 = vld [vmem:[#allocation5 + $0xc90] sm:$0xff]  ;;  %v2567_v33 = vld [vmem:[#allocation5 + $0xd78] sm:$0xff]  ;;  %v2458_v38 = vld [vmem:[#allocation5 + $0xc80] sm:$0xff] }
 0x243   :  { %5241 = vmatprep.subr.mxu1 %v5998_v2  ;;  %5212 = vmatprep.subr.mxu0 %v5998_v2 }
 0x244   :  { %5242 = vmatpush3.msra.mxu1 %v2278_v36  ;;  %5213 = vmatpush3.msra.mxu0 %v2181_v37  ;;  %v6031_v36 = vmov 32   ;;  %v2566_v37 = vld [vmem:[#allocation5 + $0xd70] sm:$0xff] }
 0x245   :  { %5243 = vmatprep.subr.mxu1 %v5998_v2  ;;  %5214 = vmatprep.subr.mxu0 %v5998_v2 }
 0x246   :  { %5244 = vmatpush3.msra.mxu1 %v2277_v39  ;;  %5215 = vmatpush3.msra.mxu0 %v2180_v40  ;;  %v2265_v55 = vpop.permute.xlu0 %2264  ;;  %v2565_v39 = vld [vmem:[#allocation5 + $0xd68] sm:$0xff]  ;;  %v2661_v40 = vld [vmem:[#allocation5 + $0xdf8] sm:$0xff] }
 0x247   :  { %5245 = vmatprep.subr.mxu1 %v5998_v2  ;;  %5216 = vmatprep.subr.mxu0 %v5998_v2  ;;  %vm2266_vm9 = vcmp.eq.s32.totalorder %v6150_v51, %v2265_v55  ;;  %v2560_v55 = vld [vmem:[#allocation5 + $0xd40] sm:$0xff] }
 0x248   :  { %5246 = vmatpush3.msra.mxu1 %v2276_v41  ;;  %5217 = vmatpush3.msra.mxu0 %v2179_v42  ;;  %v2564_v41 = vld [vmem:[#allocation5 + $0xd60] sm:$0xff]  ;;  %v6032_v42 = vmov 33  }
 0x249   :  { %5247 = vmatprep.subr.mxu1 %v5998_v2  ;;  %5218 = vmatprep.subr.mxu0 %v5998_v2 }
 0x24a   :  { %5248 = vmatpush3.msra.mxu1 %v2275_v43  ;;  %5219 = vmatpush3.msra.mxu0 %v2178_v44  ;;  %v2660_v43 = vld [vmem:[#allocation5 + $0xdf0] sm:$0xff]  ;;  %v2563_v44 = vld [vmem:[#allocation5 + $0xd58] sm:$0xff] }
 0x24b   :  { %5249 = vmatprep.subr.mxu1 %v5998_v2  ;;  %5220 = vmatprep.subr.mxu0 %v5998_v2 }
 0x24c   :  { %5250 = vmatpush3.msra.mxu1 %v2274_v45  ;;  %5221 = vmatpush3.msra.mxu0 %v2177_v46  ;;  %v2659_v45 = vld [vmem:[#allocation5 + $0xde8] sm:$0xff]  ;;  %v2562_v46 = vld [vmem:[#allocation5 + $0xd50] sm:$0xff] }
 0x24d   :  { %5251 = vmatprep.subr.mxu1 %v5998_v2  ;;  %5222 = vmatprep.subr.mxu0 %v5998_v2 }
 0x24e   :  { %5252 = vmatpush3.msra.mxu1 %v2273_v48  ;;  %5223 = vmatpush3.msra.mxu0 %v2176_v49  ;;  %v2658_v48 = vld [vmem:[#allocation5 + $0xde0] sm:$0xff]  ;;  %v2561_v49 = vld [vmem:[#allocation5 + $0xd48] sm:$0xff] }
 0x24f   :  { %5224 = vmatprep.mubr.msk.f32.mxu0 %vm5999_vm0, %v5998_v2  ;;  %5253 = vmatprep.subr.mxu1 %v5998_v2 }
 0x250   :  { %5225 = vmatmul.mubr.msk.f32.vlgmr.msra.gmra.mxu0 %vm2172_vm8, %v6014_v54  ;;  %5254 = vmatpush3.msra.mxu1 %v2272_v50 }
 0x251   :  { %5262 = vmatprep.subr.mxu0 %v5998_v2  ;;  %5255 = vmatprep.subr.mxu1 %v5998_v2 }
 0x252   :  { %5263 = vmatpush3.msra.mxu0 %v2379_v52  ;;  %5830 = vset.pattern.permute.xlu1 %v6029_v56  ;;  %v2656_v56 = vld [vmem:[#allocation5 + $0xdd0] sm:$0xff] }
 0x253   :  { %5256 = vmatpush3.msra.mxu1 %v2271_v53  ;;  %5264 = vmatprep.subr.mxu0 %v5998_v2  ;;  %v2657_v53 = vld [vmem:[#allocation5 + $0xdd8] sm:$0xff] }
 0x254   :  { %2922 = vperm.xlu1 %5830, %v6535_v32   ;;  %5257 = vmatprep.subr.mxu1 %v5998_v2 }
 0x255   :  { %5265 = vmatpush3.msra.mxu0 %v2378_v57  ;;  %5258 = vmatpush3.msra.mxu1 %v2270_v58  ;;  %v2559_v57 = vld [vmem:[#allocation5 + $0xd38] sm:$0xff]  ;;  %v2655_v58 = vld [vmem:[#allocation5 + $0xdc8] sm:$0xff] }
 0x256   :  { %5259 = vmatprep.mubr.msk.f32.mxu1 %vm5999_vm0, %v5998_v2  ;;  %5266 = vmatprep.subr.mxu0 %v5998_v2 }
 0x257   :  { %5260 = vmatmul.mubr.msk.f32.vlgmr.msra.gmra.mxu1 %vm2266_vm9, %v6014_v54  ;;  %5267 = vmatpush3.msra.mxu0 %v2377_v59  ;;  %v2558_v59 = vld [vmem:[#allocation5 + $0xd30] sm:$0xff] }
 0x258   :  { %5297 = vmatprep.subr.mxu1 %v5998_v2  ;;  %5268 = vmatprep.subr.mxu0 %v5998_v2 }
 0x259   :  { %5298 = vmatpush3.msra.mxu1 %v2473_v60  ;;  %5831 = vset.pattern.permute.xlu1 %v6030_v62  ;;  %v2654_v62 = vld [vmem:[#allocation5 + $0xdc0] sm:$0xff] }
 0x25a   :  { %5269 = vmatpush3.msra.mxu0 %v2376_v61  ;;  %5299 = vmatprep.subr.mxu1 %v5998_v2 }
 0x25b   :  { %3016 = vperm.xlu1 %5831, %v6535_v32   ;;  %5270 = vmatprep.subr.mxu0 %v5998_v2 }
 0x25c   :  { %5300 = vmatpush3.msra.mxu1 %v2472_v63  ;;  %5271 = vmatpush3.msra.mxu0 %v2375_v9  ;;  %v1318_v3 = vpop.f32.mrf.mxu0  ;;  %v2557_v63 = vld [vmem:[#allocation5 + $0xd28] sm:$0xff] }
 0x25d   :  { %5301 = vmatprep.subr.mxu1 %v5998_v2  ;;  %5272 = vmatprep.subr.mxu0 %v5998_v2  ;;  %v1322_v6 = vadd.f32 %v1318_v3, %v6602_v35  ;;  %v2652_v3 = vld [vmem:[#allocation5 + $0xdb0] sm:$0xff] }
 0x25e   :  { %5302 = vmatpush3.msra.mxu1 %v2471_v0  ;;  %5273 = vmatpush3.msra.mxu0 %v2374_v1  ;;  %v4876_v7 = vpop.f32.mrf.mxu0  ;;  %v2653_v0 = vld [vmem:[#allocation5 + $0xdb8] sm:$0xff]  ;;  %v2556_v1 = vld [vmem:[#allocation5 + $0xd20] sm:$0xff] }
 0x25f   :  { %5303 = vmatprep.subr.mxu1 %v5998_v2  ;;  %5274 = vmatprep.subr.mxu0 %v5998_v2  ;;  %v2650_v7 = vld [vmem:[#allocation5 + $0xda0] sm:$0xff] }
 0x260   :  { %5304 = vmatpush3.msra.mxu1 %v2470_v4  ;;  %5275 = vmatpush3.msra.mxu0 %v2373_v5  ;;  %v2555_v4 = vld [vmem:[#allocation5 + $0xd18] sm:$0xff]  ;;  %v2651_v5 = vld [vmem:[#allocation5 + $0xda8] sm:$0xff] }
 0x261   :  { %5305 = vmatprep.subr.mxu1 %v5998_v2  ;;  %5276 = vmatprep.subr.mxu0 %v5998_v2 }
 0x262   :  { %5306 = vmatpush3.msra.mxu1 %v2469_v8  ;;  %5277 = vmatpush3.msra.mxu0 %v2372_v10  ;;  %v2553_v8 = vld [vmem:[#allocation5 + $0xd08] sm:$0xff] }
 0x263   :  { %5307 = vmatprep.subr.mxu1 %v5998_v2  ;;  %5278 = vmatprep.subr.mxu0 %v5998_v2  ;;  %v1412_v15 = vpop.f32.mrf.mxu1  ;;  %v2359_v28 = vpop.permute.xlu1 %2358 }
 0x264   :  { %5308 = vmatpush3.msra.mxu1 %v2468_v11  ;;  %5279 = vmatpush3.msra.mxu0 %v2371_v12  ;;  %v6647_v16 = vadd.f32 %v1412_v15, %v1322_v6  ;;  %vm2360_vm10 = vcmp.eq.s32.totalorder %v6150_v51, %v2359_v28  ;;  %v2554_v6 = vld [vmem:[#allocation5 + $0xd10] sm:$0xff]  ;;  %v2649_v11 = vld [vmem:[#allocation5 + $0xd98] sm:$0xff]  ;;  %v2552_v12 = vld [vmem:[#allocation5 + $0xd00] sm:$0xff] }
 0x265   :  { %5309 = vmatprep.subr.mxu1 %v5998_v2  ;;  %5280 = vmatprep.subr.mxu0 %v5998_v2  ;;  %v4911_v19 = vpop.f32.mrf.mxu1  ;;  %v2647_v15 = vld [vmem:[#allocation5 + $0xd88] sm:$0xff] }
 0x266   :  { %5310 = vmatpush3.msra.mxu1 %v2467_v13  ;;  %5281 = vmatpush3.msra.mxu0 %v2370_v14  ;;  %v2648_v13 = vld [vmem:[#allocation5 + $0xd90] sm:$0xff]  ;;  %v2755_v14 = vld [vmem:[#allocation5 + $0xe78] sm:$0xff]  ;;  %v2646_v19 = vld [vmem:[#allocation5 + $0xd80] sm:$0xff] }
 0x267   :  { %5311 = vmatprep.subr.mxu1 %v5998_v2  ;;  %5282 = vmatprep.subr.mxu0 %v5998_v2 }
 0x268   :  { %5312 = vmatpush3.msra.mxu1 %v2466_v17  ;;  %5283 = vmatpush3.msra.mxu0 %v2369_v18  ;;  %v6033_v17 = vmov 34   ;;  %v2754_v18 = vld [vmem:[#allocation5 + $0xe70] sm:$0xff] }
 0x269   :  { %5313 = vmatprep.subr.mxu1 %v5998_v2  ;;  %5284 = vmatprep.subr.mxu0 %v5998_v2 }
 0x26a   :  { %5314 = vmatpush3.msra.mxu1 %v2465_v20  ;;  %5285 = vmatpush3.msra.mxu0 %v2368_v21  ;;  %v2453_v35 = vpop.permute.xlu1 %2452  ;;  %v2753_v20 = vld [vmem:[#allocation5 + $0xe68] sm:$0xff]  ;;  %v2849_v21 = vld [vmem:[#allocation5 + $0xef8] sm:$0xff] }
 0x26b   :  { %5315 = vmatprep.subr.mxu1 %v5998_v2  ;;  %5286 = vmatprep.subr.mxu0 %v5998_v2  ;;  %vm2454_vm11 = vcmp.eq.s32.totalorder %v6150_v51, %v2453_v35  ;;  %v2844_v35 = vld [vmem:[#allocation5 + $0xed0] sm:$0xff] }
 0x26c   :  { %5316 = vmatpush3.msra.mxu1 %v2464_v22  ;;  %5287 = vmatpush3.msra.mxu0 %v2367_v23  ;;  %v2752_v22 = vld [vmem:[#allocation5 + $0xe60] sm:$0xff]  ;;  %v6034_v23 = vmov 35  }
 0x26d   :  { %5317 = vmatprep.subr.mxu1 %v5998_v2  ;;  %5288 = vmatprep.subr.mxu0 %v5998_v2 }
 0x26e   :  { %5318 = vmatpush3.msra.mxu1 %v2463_v24  ;;  %5289 = vmatpush3.msra.mxu0 %v2366_v25  ;;  %v2848_v24 = vld [vmem:[#allocation5 + $0xef0] sm:$0xff]  ;;  %v2751_v25 = vld [vmem:[#allocation5 + $0xe58] sm:$0xff] }
 0x26f   :  { %5319 = vmatprep.subr.mxu1 %v5998_v2  ;;  %5290 = vmatprep.subr.mxu0 %v5998_v2 }
 0x270   :  { %5320 = vmatpush3.msra.mxu1 %v2462_v26  ;;  %5291 = vmatpush3.msra.mxu0 %v2365_v27  ;;  %v2847_v26 = vld [vmem:[#allocation5 + $0xee8] sm:$0xff]  ;;  %v2750_v27 = vld [vmem:[#allocation5 + $0xe50] sm:$0xff] }
 0x271   :  { %5321 = vmatprep.subr.mxu1 %v5998_v2  ;;  %5292 = vmatprep.subr.mxu0 %v5998_v2 }
 0x272   :  { %5322 = vmatpush3.msra.mxu1 %v2461_v29  ;;  %5293 = vmatpush3.msra.mxu0 %v2364_v30  ;;  %v2846_v29 = vld [vmem:[#allocation5 + $0xee0] sm:$0xff]  ;;  %v2749_v30 = vld [vmem:[#allocation5 + $0xe48] sm:$0xff] }
 0x273   :  { %5294 = vmatprep.mubr.msk.f32.mxu0 %vm5999_vm0, %v5998_v2  ;;  %5323 = vmatprep.subr.mxu1 %v5998_v2 }
 0x274   :  { %5295 = vmatmul.mubr.msk.f32.vlgmr.msra.gmra.mxu0 %vm2360_vm10, %v6014_v54  ;;  %5324 = vmatpush3.msra.mxu1 %v2460_v31 }
 0x275   :  { %5332 = vmatprep.subr.mxu0 %v5998_v2  ;;  %5325 = vmatprep.subr.mxu1 %v5998_v2 }
 0x276   :  { %5333 = vmatpush3.msra.mxu0 %v2567_v33  ;;  %5832 = vset.pattern.permute.xlu0 %v6031_v36  ;;  %v2747_v36 = vld [vmem:[#allocation5 + $0xe38] sm:$0xff] }
 0x277   :  { %5326 = vmatpush3.msra.mxu1 %v2459_v34  ;;  %5334 = vmatprep.subr.mxu0 %v5998_v2  ;;  %v2748_v34 = vld [vmem:[#allocation5 + $0xe40] sm:$0xff] }
 0x278   :  { %3110 = vperm.xlu0 %5832, %v6535_v32   ;;  %5327 = vmatprep.subr.mxu1 %v5998_v2 }
 0x279   :  { %5335 = vmatpush3.msra.mxu0 %v2566_v37  ;;  %5328 = vmatpush3.msra.mxu1 %v2458_v38  ;;  %v2843_v37 = vld [vmem:[#allocation5 + $0xec8] sm:$0xff]  ;;  %v2746_v38 = vld [vmem:[#allocation5 + $0xe30] sm:$0xff] }
 0x27a   :  { %5329 = vmatprep.mubr.msk.f32.mxu1 %vm5999_vm0, %v5998_v2  ;;  %5336 = vmatprep.subr.mxu0 %v5998_v2 }
 0x27b   :  { %5330 = vmatmul.mubr.msk.f32.vlgmr.msra.gmra.mxu1 %vm2454_vm11, %v6014_v54  ;;  %5337 = vmatpush3.msra.mxu0 %v2565_v39 }
 0x27c   :  { %5367 = vmatprep.subr.mxu1 %v5998_v2  ;;  %5338 = vmatprep.subr.mxu0 %v5998_v2 }
 0x27d   :  { %5368 = vmatpush3.msra.mxu1 %v2661_v40  ;;  %5833 = vset.pattern.permute.xlu1 %v6032_v42  ;;  %v2745_v42 = vld [vmem:[#allocation5 + $0xe28] sm:$0xff] }
 0x27e   :  { %5339 = vmatpush3.msra.mxu0 %v2564_v41  ;;  %5369 = vmatprep.subr.mxu1 %v5998_v2  ;;  %v2842_v41 = vld [vmem:[#allocation5 + $0xec0] sm:$0xff] }
 0x27f   :  { %3204 = vperm.xlu1 %5833, %v6535_v32   ;;  %5340 = vmatprep.subr.mxu0 %v5998_v2 }
 0x280   :  { %5370 = vmatpush3.msra.mxu1 %v2660_v43  ;;  %5341 = vmatpush3.msra.mxu0 %v2563_v44  ;;  %v1506_v47 = vpop.f32.mrf.mxu0  ;;  %v2841_v44 = vld [vmem:[#allocation5 + $0xeb8] sm:$0xff] }
 0x281   :  { %5371 = vmatprep.subr.mxu1 %v5998_v2  ;;  %5342 = vmatprep.subr.mxu0 %v5998_v2  ;;  %v1510_v50 = vadd.f32 %v1506_v47, %v6647_v16  ;;  %v2743_v47 = vld [vmem:[#allocation5 + $0xe18] sm:$0xff] }
 0x282   :  { %5372 = vmatpush3.msra.mxu1 %v2659_v45  ;;  %5343 = vmatpush3.msra.mxu0 %v2562_v46  ;;  %v4946_v52 = vpop.f32.mrf.mxu0  ;;  %v2744_v45 = vld [vmem:[#allocation5 + $0xe20] sm:$0xff]  ;;  %v2840_v46 = vld [vmem:[#allocation5 + $0xeb0] sm:$0xff] }
 0x283   :  { %5373 = vmatprep.subr.mxu1 %v5998_v2  ;;  %5344 = vmatprep.subr.mxu0 %v5998_v2  ;;  %v2741_v52 = vld [vmem:[#allocation5 + $0xe08] sm:$0xff] }
 0x284   :  { %5374 = vmatpush3.msra.mxu1 %v2658_v48  ;;  %5345 = vmatpush3.msra.mxu0 %v2561_v49  ;;  %v2839_v48 = vld [vmem:[#allocation5 + $0xea8] sm:$0xff]  ;;  %v2742_v49 = vld [vmem:[#allocation5 + $0xe10] sm:$0xff] }
 0x285   :  { %5375 = vmatprep.subr.mxu1 %v5998_v2  ;;  %5346 = vmatprep.subr.mxu0 %v5998_v2 }
 0x286   :  { %5376 = vmatpush3.msra.mxu1 %v2657_v53  ;;  %5347 = vmatpush3.msra.mxu0 %v2560_v55  ;;  %v2837_v55 = vld [vmem:[#allocation5 + $0xe98] sm:$0xff] }
 0x287   :  { %5377 = vmatprep.subr.mxu1 %v5998_v2  ;;  %5348 = vmatprep.subr.mxu0 %v5998_v2  ;;  %v1600_v60 = vpop.f32.mrf.mxu1  ;;  %v2547_v10 = vpop.permute.xlu0 %2546 }
 0x288   :  { %5378 = vmatpush3.msra.mxu1 %v2656_v56  ;;  %5349 = vmatpush3.msra.mxu0 %v2559_v57  ;;  %v6692_v61 = vadd.f32 %v1600_v60, %v1510_v50  ;;  %vm2548_vm12 = vcmp.eq.s32.totalorder %v6150_v51, %v2547_v10  ;;  %v2838_v50 = vld [vmem:[#allocation5 + $0xea0] sm:$0xff]  ;;  %v2836_v57 = vld [vmem:[#allocation5 + $0xe90] sm:$0xff]  ;;  %v3033_v10 = vld [vmem:[#allocation5 + $0xfd8] sm:$0xff] }
 0x289   :  { %5379 = vmatprep.subr.mxu1 %v5998_v2  ;;  %5350 = vmatprep.subr.mxu0 %v5998_v2  ;;  %v4981_v9 = vpop.f32.mrf.mxu1  ;;  %v2740_v56 = vld [vmem:[#allocation5 + $0xe00] sm:$0xff] }
 0x28a   :  { %5380 = vmatpush3.msra.mxu1 %v2655_v58  ;;  %5351 = vmatpush3.msra.mxu0 %v2558_v59  ;;  %v2943_v58 = vld [vmem:[#allocation5 + $0xf78] sm:$0xff]  ;;  %v2835_v59 = vld [vmem:[#allocation5 + $0xe88] sm:$0xff] }
 0x28b   :  { %5381 = vmatprep.subr.mxu1 %v5998_v2  ;;  %5352 = vmatprep.subr.mxu0 %v5998_v2  ;;  %v3037_v9 = vld [vmem:[#allocation5 + $0xff8] sm:$0xff] }
 0x28c   :  { %5382 = vmatpush3.msra.mxu1 %v2654_v62  ;;  %5353 = vmatpush3.msra.mxu0 %v2557_v63  ;;  %v2834_v62 = vld [vmem:[#allocation5 + $0xe80] sm:$0xff]  ;;  %v2941_v63 = vld [vmem:[#allocation5 + $0xf68] sm:$0xff] }
 0x28d   :  { %5383 = vmatprep.subr.mxu1 %v5998_v2  ;;  %5354 = vmatprep.subr.mxu0 %v5998_v2 }
 0x28e   :  { %5384 = vmatpush3.msra.mxu1 %v2653_v0  ;;  %5355 = vmatpush3.msra.mxu0 %v2556_v1  ;;  %v2641_v16 = vpop.permute.xlu1 %2640  ;;  %v2940_v0 = vld [vmem:[#allocation5 + $0xf60] sm:$0xff]  ;;  %v3036_v1 = vld [vmem:[#allocation5 + $0xff0] sm:$0xff] }
 0x28f   :  { %5385 = vmatprep.subr.mxu1 %v5998_v2  ;;  %5356 = vmatprep.subr.mxu0 %v5998_v2  ;;  %vm2642_vm13 = vcmp.eq.s32.totalorder %v6150_v51, %v2641_v16  ;;  %v3031_v16 = vld [vmem:[#allocation5 + $0xfc8] sm:$0xff] }
 0x290   :  { %5386 = vmatpush3.msra.mxu1 %v2652_v3  ;;  %5357 = vmatpush3.msra.mxu0 %v2555_v4  ;;  %v2939_v3 = vld [vmem:[#allocation5 + $0xf58] sm:$0xff]  ;;  %v3035_v4 = vld [vmem:[#allocation5 + $0xfe8] sm:$0xff] }
 0x291   :  { %5387 = vmatprep.subr.mxu1 %v5998_v2  ;;  %5358 = vmatprep.subr.mxu0 %v5998_v2 }
 0x292   :  { %5388 = vmatpush3.msra.mxu1 %v2651_v5  ;;  %5359 = vmatpush3.msra.mxu0 %v2554_v6  ;;  %v2938_v5 = vld [vmem:[#allocation5 + $0xf50] sm:$0xff]  ;;  %v3034_v6 = vld [vmem:[#allocation5 + $0xfe0] sm:$0xff] }
 0x293   :  { %5389 = vmatprep.subr.mxu1 %v5998_v2  ;;  %5360 = vmatprep.subr.mxu0 %v5998_v2 }
 0x294   :  { %5390 = vmatpush3.msra.mxu1 %v2650_v7  ;;  %5361 = vmatpush3.msra.mxu0 %v2553_v8  ;;  %v2937_v7 = vld [vmem:[#allocation5 + $0xf48] sm:$0xff] }
 0x295   :  { %5391 = vmatprep.subr.mxu1 %v5998_v2  ;;  %5362 = vmatprep.subr.mxu0 %v5998_v2 }
 0x296   :  { %5392 = vmatpush3.msra.mxu1 %v2649_v11  ;;  %5363 = vmatpush3.msra.mxu0 %v2552_v12  ;;  %v2936_v11 = vld [vmem:[#allocation5 + $0xf40] sm:$0xff] }
 0x297   :  { %5364 = vmatprep.mubr.msk.f32.mxu0 %vm5999_vm0, %v5998_v2  ;;  %5393 = vmatprep.subr.mxu1 %v5998_v2 }
 0x298   :  { %5365 = vmatmul.mubr.msk.f32.vlgmr.msra.gmra.mxu0 %vm2548_vm12, %v6014_v54  ;;  %5394 = vmatpush3.msra.mxu1 %v2648_v13 }
 0x299   :  { %5402 = vmatprep.subr.mxu0 %v5998_v2  ;;  %5395 = vmatprep.subr.mxu1 %v5998_v2 }
 0x29a   :  { %5403 = vmatpush3.msra.mxu0 %v2755_v14  ;;  %5834 = vset.pattern.permute.xlu1 %v6033_v17  ;;  %v3032_v14 = vld [vmem:[#allocation5 + $0xfd0] sm:$0xff] }
 0x29b   :  { %5396 = vmatpush3.msra.mxu1 %v2647_v15  ;;  %5404 = vmatprep.subr.mxu0 %v5998_v2  ;;  %v2935_v15 = vld [vmem:[#allocation5 + $0xf38] sm:$0xff]  ;;  %v2934_v17 = vld [vmem:[#allocation5 + $0xf30] sm:$0xff] }
 0x29c   :  { %3298 = vperm.xlu1 %5834, %v6535_v32   ;;  %5397 = vmatprep.subr.mxu1 %v5998_v2 }
 0x29d   :  { %5405 = vmatpush3.msra.mxu0 %v2754_v18  ;;  %5398 = vmatpush3.msra.mxu1 %v2646_v19  ;;  %v3030_v18 = vld [vmem:[#allocation5 + $0xfc0] sm:$0xff]  ;;  %v2933_v19 = vld [vmem:[#allocation5 + $0xf28] sm:$0xff] }
 0x29e   :  { %5399 = vmatprep.mubr.msk.f32.mxu1 %vm5999_vm0, %v5998_v2  ;;  %5406 = vmatprep.subr.mxu0 %v5998_v2 }
 0x29f   :  { %5400 = vmatmul.mubr.msk.f32.vlgmr.msra.gmra.mxu1 %vm2642_vm13, %v6014_v54  ;;  %5407 = vmatpush3.msra.mxu0 %v2753_v20 }
 0x2a0   :  { %5437 = vmatprep.subr.mxu1 %v5998_v2  ;;  %5408 = vmatprep.subr.mxu0 %v5998_v2 }
 0x2a1   :  { %5438 = vmatpush3.msra.mxu1 %v2849_v21  ;;  %5835 = vset.pattern.permute.xlu0 %v6034_v23  ;;  %v2932_v23 = vld [vmem:[#allocation5 + $0xf20] sm:$0xff] }
 0x2a2   :  { %5409 = vmatpush3.msra.mxu0 %v2752_v22  ;;  %5439 = vmatprep.subr.mxu1 %v5998_v2  ;;  %v3029_v22 = vld [vmem:[#allocation5 + $0xfb8] sm:$0xff] }
 0x2a3   :  { %3392 = vperm.xlu0 %5835, %v6535_v32   ;;  %5410 = vmatprep.subr.mxu0 %v5998_v2  ;;  %v2845_v32 = vld [vmem:[#allocation5 + $0xed8] sm:$0xff] }
 0x2a4   :  { %5440 = vmatpush3.msra.mxu1 %v2848_v24  ;;  %5411 = vmatpush3.msra.mxu0 %v2751_v25  ;;  %v1694_v28 = vpop.f32.mrf.mxu0  ;;  %v3028_v25 = vld [vmem:[#allocation5 + $0xfb0] sm:$0xff] }
 0x2a5   :  { %5441 = vmatprep.subr.mxu1 %v5998_v2  ;;  %5412 = vmatprep.subr.mxu0 %v5998_v2  ;;  %v1698_v31 = vadd.f32 %v1694_v28, %v6692_v61  ;;  %v2942_v61 = vld [vmem:[#allocation5 + $0xf70] sm:$0xff] }
 0x2a6   :  { %5442 = vmatpush3.msra.mxu1 %v2847_v26  ;;  %5413 = vmatpush3.msra.mxu0 %v2750_v27  ;;  %v5016_v33 = vpop.f32.mrf.mxu0  ;;  %v2931_v26 = vld [vmem:[#allocation5 + $0xf18] sm:$0xff]  ;;  %v3027_v27 = vld [vmem:[#allocation5 + $0xfa8] sm:$0xff]  ;;  %v2930_v28 = vld [vmem:[#allocation5 + $0xf10] sm:$0xff] }
 0x2a7   :  { %5443 = vmatprep.subr.mxu1 %v5998_v2  ;;  %5414 = vmatprep.subr.mxu0 %v5998_v2  ;;  %v3025_v33 = vld [vmem:[#allocation5 + $0xf98] sm:$0xff] }
 0x2a8   :  { %5444 = vmatpush3.msra.mxu1 %v2846_v29  ;;  %5415 = vmatpush3.msra.mxu0 %v2749_v30  ;;  %v3026_v29 = vld [vmem:[#allocation5 + $0xfa0] sm:$0xff]  ;;  %v2929_v30 = vld [vmem:[#allocation5 + $0xf08] sm:$0xff] }
 0x2a9   :  { %5445 = vmatprep.subr.mxu1 %v5998_v2  ;;  %5416 = vmatprep.subr.mxu0 %v5998_v2 }
 0x2aa   :  { %5446 = vmatpush3.msra.mxu1 %v2845_v32  ;;  %5417 = vmatpush3.msra.mxu0 %v2748_v34  ;;  %v2928_v32 = vld [vmem:[#allocation5 + $0xf00] sm:$0xff]  ;;  %v3024_v34 = vld [vmem:[#allocation5 + $0xf90] sm:$0xff] }
 0x2ab   :  { %5447 = vmatprep.subr.mxu1 %v5998_v2  ;;  %5418 = vmatprep.subr.mxu0 %v5998_v2  ;;  %v1788_v39 = vpop.f32.mrf.mxu1  ;;  %v2735_v53 = vpop.permute.xlu1 %2734 }
 0x2ac   :  { %5448 = vmatpush3.msra.mxu1 %v2844_v35  ;;  %5419 = vmatpush3.msra.mxu0 %v2747_v36  ;;  %v6737_v40 = vadd.f32 %v1788_v39, %v1698_v31  ;;  %vm2736_vm14 = vcmp.eq.s32.totalorder %v6150_v51, %v2735_v53  ;;  %v3131_v35 = vld [vmem:[#allocation5 + $0x1078] sm:$0xff]  ;;  %v3023_v36 = vld [vmem:[#allocation5 + $0xf88] sm:$0xff]  ;;  %v3022_v39 = vld [vmem:[#allocation5 + $0xf80] sm:$0xff] }
 0x2ad   :  { %5449 = vmatprep.subr.mxu1 %v5998_v2  ;;  %5420 = vmatprep.subr.mxu0 %v5998_v2  ;;  %v5051_v43 = vpop.f32.mrf.mxu1  ;;  %v3220_v53 = vld [vmem:[#allocation5 + $0x10d0] sm:$0xff] }
 0x2ae   :  { %5450 = vmatpush3.msra.mxu1 %v2843_v37  ;;  %5421 = vmatpush3.msra.mxu0 %v2746_v38  ;;  %v3130_v38 = vld [vmem:[#allocation5 + $0x1070] sm:$0xff] }
 0x2af   :  { %5451 = vmatprep.subr.mxu1 %v5998_v2  ;;  %5422 = vmatprep.subr.mxu0 %v5998_v2  ;;  %v3224_v43 = vld [vmem:[#allocation5 + $0x10f0] sm:$0xff] }
 0x2b0   :  { %5452 = vmatpush3.msra.mxu1 %v2842_v41  ;;  %5423 = vmatpush3.msra.mxu0 %v2745_v42  ;;  %v3225_v41 = vld [vmem:[#allocation5 + $0x10f8] sm:$0xff]  ;;  %v3128_v42 = vld [vmem:[#allocation5 + $0x1060] sm:$0xff] }
 0x2b1   :  { %5453 = vmatprep.subr.mxu1 %v5998_v2  ;;  %5424 = vmatprep.subr.mxu0 %v5998_v2 }
 0x2b2   :  { %5454 = vmatpush3.msra.mxu1 %v2841_v44  ;;  %5425 = vmatpush3.msra.mxu0 %v2744_v45  ;;  %v2829_v60 = vpop.permute.xlu0 %2828  ;;  %v3127_v44 = vld [vmem:[#allocation5 + $0x1058] sm:$0xff]  ;;  %v3223_v45 = vld [vmem:[#allocation5 + $0x10e8] sm:$0xff] }
 0x2b3   :  { %5455 = vmatprep.subr.mxu1 %v5998_v2  ;;  %5426 = vmatprep.subr.mxu0 %v5998_v2  ;;  %vm2830_vm15 = vcmp.eq.s32.totalorder %v6150_v51, %v2829_v60  ;;  %v3218_v60 = vld [vmem:[#allocation5 + $0x10c0] sm:$0xff] }
 0x2b4   :  { %5456 = vmatpush3.msra.mxu1 %v2840_v46  ;;  %5427 = vmatpush3.msra.mxu0 %v2743_v47  ;;  %v3126_v46 = vld [vmem:[#allocation5 + $0x1050] sm:$0xff]  ;;  %v3222_v47 = vld [vmem:[#allocation5 + $0x10e0] sm:$0xff] }
 0x2b5   :  { %5457 = vmatprep.subr.mxu1 %v5998_v2  ;;  %5428 = vmatprep.subr.mxu0 %v5998_v2 }
 0x2b6   :  { %5458 = vmatpush3.msra.mxu1 %v2839_v48  ;;  %5429 = vmatpush3.msra.mxu0 %v2742_v49  ;;  %v3125_v48 = vld [vmem:[#allocation5 + $0x1048] sm:$0xff]  ;;  %v3221_v49 = vld [vmem:[#allocation5 + $0x10d8] sm:$0xff] }
 0x2b7   :  { %5459 = vmatprep.subr.mxu1 %v5998_v2  ;;  %5430 = vmatprep.subr.mxu0 %v5998_v2 }
 0x2b8   :  { %5460 = vmatpush3.msra.mxu1 %v2838_v50  ;;  %5431 = vmatpush3.msra.mxu0 %v2741_v52  ;;  %v3124_v50 = vld [vmem:[#allocation5 + $0x1040] sm:$0xff] }
 0x2b9   :  { %5461 = vmatprep.subr.mxu1 %v5998_v2  ;;  %5432 = vmatprep.subr.mxu0 %v5998_v2 }
 0x2ba   :  { %5462 = vmatpush3.msra.mxu1 %v2837_v55  ;;  %5433 = vmatpush3.msra.mxu0 %v2740_v56  ;;  %v3123_v55 = vld [vmem:[#allocation5 + $0x1038] sm:$0xff] }
 0x2bb   :  { %5434 = vmatprep.mubr.msk.f32.mxu0 %vm5999_vm0, %v5998_v2  ;;  %5463 = vmatprep.subr.mxu1 %v5998_v2 }
 0x2bc   :  { %5435 = vmatmul.mubr.msk.f32.vlgmr.msra.gmra.mxu0 %vm2736_vm14, %v6014_v54  ;;  %5464 = vmatpush3.msra.mxu1 %v2836_v57 }
 0x2bd   :  { %5472 = vmatprep.subr.mxu0 %v5998_v2  ;;  %5465 = vmatprep.subr.mxu1 %v5998_v2 }
 0x2be   :  { %5473 = vmatpush3.msra.mxu0 %v2943_v58  ;;  %5466 = vmatpush3.msra.mxu1 %v2835_v59  ;;  %v3219_v58 = vld [vmem:[#allocation5 + $0x10c8] sm:$0xff]  ;;  %v3122_v59 = vld [vmem:[#allocation5 + $0x1030] sm:$0xff] }
 0x2bf   :  { %5474 = vmatprep.subr.mxu0 %v5998_v2  ;;  %5467 = vmatprep.subr.mxu1 %v5998_v2 }
 0x2c0   :  { %5475 = vmatpush3.msra.mxu0 %v2942_v61  ;;  %5468 = vmatpush3.msra.mxu1 %v2834_v62  ;;  %v3121_v61 = vld [vmem:[#allocation5 + $0x1028] sm:$0xff]  ;;  %v3217_v62 = vld [vmem:[#allocation5 + $0x10b8] sm:$0xff] }
 0x2c1   :  { %5469 = vmatprep.mubr.msk.f32.mxu1 %vm5999_vm0, %v5998_v2  ;;  %5476 = vmatprep.subr.mxu0 %v5998_v2 }
 0x2c2   :  { %5470 = vmatmul.mubr.msk.f32.vlgmr.msra.gmra.mxu1 %vm2830_vm15, %v6014_v54  ;;  %5477 = vmatpush3.msra.mxu0 %v2941_v63  ;;  %v3120_v63 = vld [vmem:[#allocation5 + $0x1020] sm:$0xff] }
 0x2c3   :  { %5507 = vmatprep.subr.mxu1 %v5998_v2  ;;  %5478 = vmatprep.subr.mxu0 %v5998_v2 }
 0x2c4   :  { %5508 = vmatpush3.msra.mxu1 %v3037_v9  ;;  %5479 = vmatpush3.msra.mxu0 %v2940_v0 }
 0x2c5   :  { %5509 = vmatprep.subr.mxu1 %v5998_v2  ;;  %5480 = vmatprep.subr.mxu0 %v5998_v2 }
 0x2c6   :  { %5510 = vmatpush3.msra.mxu1 %v3036_v1  ;;  %5481 = vmatpush3.msra.mxu0 %v2939_v3  ;;  %v3216_v1 = vld [vmem:[#allocation5 + $0x10b0] sm:$0xff]  ;;  %v3119_v3 = vld [vmem:[#allocation5 + $0x1018] sm:$0xff] }
 0x2c7   :  { %5511 = vmatprep.subr.mxu1 %v5998_v2  ;;  %5482 = vmatprep.subr.mxu0 %v5998_v2 }
 0x2c8   :  { %5512 = vmatpush3.msra.mxu1 %v3035_v4  ;;  %5483 = vmatpush3.msra.mxu0 %v2938_v5  ;;  %v1882_v8 = vpop.f32.mrf.mxu0  ;;  %v3215_v5 = vld [vmem:[#allocation5 + $0x10a8] sm:$0xff] }
 0x2c9   :  { %5513 = vmatprep.subr.mxu1 %v5998_v2  ;;  %5484 = vmatprep.subr.mxu0 %v5998_v2  ;;  %v1886_v12 = vadd.f32 %v1882_v8, %v6737_v40  ;;  %v3129_v40 = vld [vmem:[#allocation5 + $0x1068] sm:$0xff] }
 0x2ca   :  { %5514 = vmatpush3.msra.mxu1 %v3034_v6  ;;  %5485 = vmatpush3.msra.mxu0 %v2937_v7  ;;  %v5086_v13 = vpop.f32.mrf.mxu0  ;;  %v3118_v6 = vld [vmem:[#allocation5 + $0x1010] sm:$0xff]  ;;  %v3214_v7 = vld [vmem:[#allocation5 + $0x10a0] sm:$0xff]  ;;  %v3117_v8 = vld [vmem:[#allocation5 + $0x1008] sm:$0xff] }
 0x2cb   :  { %5515 = vmatprep.subr.mxu1 %v5998_v2  ;;  %5486 = vmatprep.subr.mxu0 %v5998_v2  ;;  %v3212_v13 = vld [vmem:[#allocation5 + $0x1090] sm:$0xff] }
 0x2cc   :  { %5516 = vmatpush3.msra.mxu1 %v3033_v10  ;;  %5487 = vmatpush3.msra.mxu0 %v2936_v11  ;;  %v3213_v11 = vld [vmem:[#allocation5 + $0x1098] sm:$0xff] }
 0x2cd   :  { %5517 = vmatprep.subr.mxu1 %v5998_v2  ;;  %5488 = vmatprep.subr.mxu0 %v5998_v2 }
 0x2ce   :  { %5518 = vmatpush3.msra.mxu1 %v3032_v14  ;;  %5489 = vmatpush3.msra.mxu0 %v2935_v15  ;;  %v3319_v14 = vld [vmem:[#allocation5 + $0x1178] sm:$0xff]  ;;  %v3211_v15 = vld [vmem:[#allocation5 + $0x1088] sm:$0xff] }
 0x2cf   :  { %5519 = vmatprep.subr.mxu1 %v5998_v2  ;;  %5490 = vmatprep.subr.mxu0 %v5998_v2  ;;  %v1976_v20 = vpop.f32.mrf.mxu1  ;;  %v2923_v31 = vpop.permute.xlu1 %2922 }
 0x2d0   :  { %5520 = vmatpush3.msra.mxu1 %v3031_v16  ;;  %5491 = vmatpush3.msra.mxu0 %v2934_v17  ;;  %v6782_v21 = vadd.f32 %v1976_v20, %v1886_v12  ;;  %vm2924_vm1 = vcmp.eq.s32.totalorder %v6150_v51, %v2923_v31  ;;  %v3116_v12 = vld [vmem:[#allocation5 + $0x1000] sm:$0xff]  ;;  %v3318_v17 = vld [vmem:[#allocation5 + $0x1170] sm:$0xff]  ;;  %v3413_v20 = vld [vmem:[#allocation5 + $0x11f8] sm:$0xff] }
 0x2d1   :  { %5521 = vmatprep.subr.mxu1 %v5998_v2  ;;  %5492 = vmatprep.subr.mxu0 %v5998_v2  ;;  %v5121_v24 = vpop.f32.mrf.mxu1  ;;  %v3311_v31 = vld [vmem:[#allocation5 + $0x1138] sm:$0xff] }
 0x2d2   :  { %5522 = vmatpush3.msra.mxu1 %v3030_v18  ;;  %5493 = vmatpush3.msra.mxu0 %v2933_v19  ;;  %v3210_v18 = vld [vmem:[#allocation5 + $0x1080] sm:$0xff]  ;;  %v3317_v19 = vld [vmem:[#allocation5 + $0x1168] sm:$0xff] }
 0x2d3   :  { %5523 = vmatprep.subr.mxu1 %v5998_v2  ;;  %5494 = vmatprep.subr.mxu0 %v5998_v2  ;;  %v3411_v24 = vld [vmem:[#allocation5 + $0x11e8] sm:$0xff] }
 0x2d4   :  { %5524 = vmatpush3.msra.mxu1 %v3029_v22  ;;  %5495 = vmatpush3.msra.mxu0 %v2932_v23  ;;  %v3412_v22 = vld [vmem:[#allocation5 + $0x11f0] sm:$0xff]  ;;  %v3315_v23 = vld [vmem:[#allocation5 + $0x1158] sm:$0xff] }
 0x2d5   :  { %5525 = vmatprep.subr.mxu1 %v5998_v2  ;;  %5496 = vmatprep.subr.mxu0 %v5998_v2 }
 0x2d6   :  { %5526 = vmatpush3.msra.mxu1 %v3028_v25  ;;  %5497 = vmatpush3.msra.mxu0 %v2931_v26  ;;  %v3017_v37 = vpop.permute.xlu1 %3016  ;;  %v3314_v25 = vld [vmem:[#allocation5 + $0x1150] sm:$0xff]  ;;  %v3410_v26 = vld [vmem:[#allocation5 + $0x11e0] sm:$0xff] }
 0x2d7   :  { %5527 = vmatprep.subr.mxu1 %v5998_v2  ;;  %5498 = vmatprep.subr.mxu0 %v5998_v2  ;;  %vm3018_vm2 = vcmp.eq.s32.totalorder %v6150_v51, %v3017_v37  ;;  %v3406_v37 = vld [vmem:[#allocation5 + $0x11c0] sm:$0xff] }
 0x2d8   :  { %5528 = vmatpush3.msra.mxu1 %v3027_v27  ;;  %5499 = vmatpush3.msra.mxu0 %v2930_v28  ;;  %v3313_v27 = vld [vmem:[#allocation5 + $0x1148] sm:$0xff]  ;;  %v3409_v28 = vld [vmem:[#allocation5 + $0x11d8] sm:$0xff] }
 0x2d9   :  { %5529 = vmatprep.subr.mxu1 %v5998_v2  ;;  %5500 = vmatprep.subr.mxu0 %v5998_v2 }
 0x2da   :  { %5530 = vmatpush3.msra.mxu1 %v3026_v29  ;;  %5501 = vmatpush3.msra.mxu0 %v2929_v30  ;;  %v3312_v29 = vld [vmem:[#allocation5 + $0x1140] sm:$0xff]  ;;  %v3408_v30 = vld [vmem:[#allocation5 + $0x11d0] sm:$0xff] }
 0x2db   :  { %5531 = vmatprep.subr.mxu1 %v5998_v2  ;;  %5502 = vmatprep.subr.mxu0 %v5998_v2 }
 0x2dc   :  { %5532 = vmatpush3.msra.mxu1 %v3025_v33  ;;  %5503 = vmatpush3.msra.mxu0 %v2928_v32  ;;  %v3407_v32 = vld [vmem:[#allocation5 + $0x11c8] sm:$0xff] }
 0x2dd   :  { %5504 = vmatprep.mubr.msk.f32.mxu0 %vm5999_vm0, %v5998_v2  ;;  %5533 = vmatprep.subr.mxu1 %v5998_v2 }
 0x2de   :  { %5505 = vmatmul.mubr.msk.f32.vlgmr.msra.gmra.mxu0 %vm2924_vm1, %v6014_v54  ;;  %5534 = vmatpush3.msra.mxu1 %v3024_v34  ;;  %v3310_v34 = vld [vmem:[#allocation5 + $0x1130] sm:$0xff] }
 0x2df   :  { %5542 = vmatprep.subr.mxu0 %v5998_v2  ;;  %5535 = vmatprep.subr.mxu1 %v5998_v2 }
 0x2e0   :  { %5543 = vmatpush3.msra.mxu0 %v3131_v35  ;;  %5536 = vmatpush3.msra.mxu1 %v3023_v36 }
 0x2e1   :  { %5544 = vmatprep.subr.mxu0 %v5998_v2  ;;  %5537 = vmatprep.subr.mxu1 %v5998_v2 }
 0x2e2   :  { %5545 = vmatpush3.msra.mxu0 %v3130_v38  ;;  %5538 = vmatpush3.msra.mxu1 %v3022_v39  ;;  %v3309_v38 = vld [vmem:[#allocation5 + $0x1128] sm:$0xff]  ;;  %v3405_v39 = vld [vmem:[#allocation5 + $0x11b8] sm:$0xff] }
 0x2e3   :  { %5539 = vmatprep.mubr.msk.f32.mxu1 %vm5999_vm0, %v5998_v2  ;;  %5546 = vmatprep.subr.mxu0 %v5998_v2 }
 0x2e4   :  { %5540 = vmatmul.mubr.msk.f32.vlgmr.msra.gmra.mxu1 %vm3018_vm2, %v6014_v54  ;;  %5547 = vmatpush3.msra.mxu0 %v3129_v40  ;;  %v3308_v40 = vld [vmem:[#allocation5 + $0x1120] sm:$0xff] }
 0x2e5   :  { %5577 = vmatprep.subr.mxu1 %v5998_v2  ;;  %5548 = vmatprep.subr.mxu0 %v5998_v2 }
 0x2e6   :  { %5578 = vmatpush3.msra.mxu1 %v3225_v41  ;;  %5549 = vmatpush3.msra.mxu0 %v3128_v42  ;;  %v3404_v41 = vld [vmem:[#allocation5 + $0x11b0] sm:$0xff]  ;;  %v3307_v42 = vld [vmem:[#allocation5 + $0x1118] sm:$0xff] }
 0x2e7   :  { %5579 = vmatprep.subr.mxu1 %v5998_v2  ;;  %5550 = vmatprep.subr.mxu0 %v5998_v2 }
 0x2e8   :  { %5580 = vmatpush3.msra.mxu1 %v3224_v43  ;;  %5551 = vmatpush3.msra.mxu0 %v3127_v44 }
 0x2e9   :  { %5581 = vmatprep.subr.mxu1 %v5998_v2  ;;  %5552 = vmatprep.subr.mxu0 %v5998_v2 }
 0x2ea   :  { %5582 = vmatpush3.msra.mxu1 %v3223_v45  ;;  %5553 = vmatpush3.msra.mxu0 %v3126_v46  ;;  %v3403_v45 = vld [vmem:[#allocation5 + $0x11a8] sm:$0xff]  ;;  %v3306_v46 = vld [vmem:[#allocation5 + $0x1110] sm:$0xff] }
 0x2eb   :  { %5583 = vmatprep.subr.mxu1 %v5998_v2  ;;  %5554 = vmatprep.subr.mxu0 %v5998_v2 }
 0x2ec   :  { %5584 = vmatpush3.msra.mxu1 %v3222_v47  ;;  %5555 = vmatpush3.msra.mxu0 %v3125_v48  ;;  %v2070_v52 = vpop.f32.mrf.mxu0  ;;  %v3402_v48 = vld [vmem:[#allocation5 + $0x11a0] sm:$0xff] }
 0x2ed   :  { %5585 = vmatprep.subr.mxu1 %v5998_v2  ;;  %5556 = vmatprep.subr.mxu0 %v5998_v2  ;;  %v2074_v56 = vadd.f32 %v2070_v52, %v6782_v21  ;;  %v3316_v21 = vld [vmem:[#allocation5 + $0x1160] sm:$0xff]  ;;  %v3401_v52 = vld [vmem:[#allocation5 + $0x1198] sm:$0xff] }
 0x2ee   :  { %5586 = vmatpush3.msra.mxu1 %v3221_v49  ;;  %5557 = vmatpush3.msra.mxu0 %v3124_v50  ;;  %v5156_v57 = vpop.f32.mrf.mxu0  ;;  %v3305_v49 = vld [vmem:[#allocation5 + $0x1108] sm:$0xff] }
 0x2ef   :  { %5587 = vmatprep.subr.mxu1 %v5998_v2  ;;  %5558 = vmatprep.subr.mxu0 %v5998_v2 }
 0x2f0   :  { %5588 = vmatpush3.msra.mxu1 %v3220_v53  ;;  %5559 = vmatpush3.msra.mxu0 %v3123_v55  ;;  %v3304_v53 = vld [vmem:[#allocation5 + $0x1100] sm:$0xff]  ;;  %v3400_v55 = vld [vmem:[#allocation5 + $0x1190] sm:$0xff] }
 0x2f1   :  { %5589 = vmatprep.subr.mxu1 %v5998_v2  ;;  %5560 = vmatprep.subr.mxu0 %v5998_v2 }
 0x2f2   :  { %5590 = vmatpush3.msra.mxu1 %v3219_v58  ;;  %5561 = vmatpush3.msra.mxu0 %v3122_v59  ;;  %v3398_v58 = vld [vmem:[#allocation5 + $0x1180] sm:$0xff] }
 0x2f3   :  { %5591 = vmatprep.subr.mxu1 %v5998_v2  ;;  %5562 = vmatprep.subr.mxu0 %v5998_v2  ;;  %v2164_v9 = vpop.f32.mrf.mxu1  ;;  %v3111_v10 = vpop.permute.xlu0 %3110 }
 0x2f4   :  { %5592 = vmatpush3.msra.mxu1 %v3218_v60  ;;  %5563 = vmatpush3.msra.mxu0 %v3121_v61  ;;  %v6827_v0 = vadd.f32 %v2164_v9, %v2074_v56  ;;  %vm3112_vm3 = vcmp.eq.s32.totalorder %v6150_v51, %v3111_v10  ;;  %v3399_v56 = vld [vmem:[#allocation5 + $0x1188] sm:$0xff]  ;;  %v3509_v9 = vld [vmem:[#allocation8 + $0x78] sm:$0xff]  ;;  %v3500_v10 = vld [vmem:[#allocation8 + $0x30] sm:$0xff] }
 0x2f5   :  { %5593 = vmatprep.subr.mxu1 %v5998_v2  ;;  %5564 = vmatprep.subr.mxu0 %v5998_v2  ;;  %v5191_v4 = vpop.f32.mrf.mxu1 }
 0x2f6   :  { %5594 = vmatpush3.msra.mxu1 %v3217_v62  ;;  %5565 = vmatpush3.msra.mxu0 %v3120_v63  ;;  %v3504_v4 = vld [vmem:[#allocation8 + $0x50] sm:$0xff] }
 0x2f7   :  { %5595 = vmatprep.subr.mxu1 %v5998_v2  ;;  %5566 = vmatprep.subr.mxu0 %v5998_v2 }
 0x2f8   :  { %5596 = vmatpush3.msra.mxu1 %v3216_v1  ;;  %5567 = vmatpush3.msra.mxu0 %v3119_v3  ;;  %v3507_v1 = vld [vmem:[#allocation8 + $0x68] sm:$0xff]  ;;  %v3505_v3 = vld [vmem:[#allocation8 + $0x58] sm:$0xff] }
 0x2f9   :  { %5597 = vmatprep.subr.mxu1 %v5998_v2  ;;  %5568 = vmatprep.subr.mxu0 %v5998_v2 }
 0x2fa   :  { %5598 = vmatpush3.msra.mxu1 %v3215_v5  ;;  %5569 = vmatpush3.msra.mxu0 %v3118_v6  ;;  %v3205_v16 = vpop.permute.xlu1 %3204  ;;  %v3503_v5 = vld [vmem:[#allocation8 + $0x48] sm:$0xff]  ;;  %v3502_v6 = vld [vmem:[#allocation8 + $0x40] sm:$0xff] }
 0x2fb   :  { %5599 = vmatprep.subr.mxu1 %v5998_v2  ;;  %5570 = vmatprep.subr.mxu0 %v5998_v2  ;;  %vm3206_vm4 = vcmp.eq.s32.totalorder %v6150_v51, %v3205_v16  ;;  %v3499_v16 = vld [vmem:[#allocation8 + $0x28] sm:$0xff] }
 0x2fc   :  { %5600 = vmatpush3.msra.mxu1 %v3214_v7  ;;  %5571 = vmatpush3.msra.mxu0 %v3117_v8  ;;  %v3501_v7 = vld [vmem:[#allocation8 + $0x38] sm:$0xff] }
 0x2fd   :  { %5601 = vmatprep.subr.mxu1 %v5998_v2  ;;  %5572 = vmatprep.subr.mxu0 %v5998_v2 }
 0x2fe   :  { %5602 = vmatpush3.msra.mxu1 %v3213_v11  ;;  %5573 = vmatpush3.msra.mxu0 %v3116_v12 }
 0x2ff   :  { %5574 = vmatprep.mubr.msk.f32.mxu0 %vm5999_vm0, %v5998_v2  ;;  %5603 = vmatprep.subr.mxu1 %v5998_v2 }
 0x300   :  { %5575 = vmatmul.mubr.msk.f32.vlgmr.msra.gmra.mxu0 %vm3112_vm3, %v6014_v54  ;;  %5604 = vmatpush3.msra.mxu1 %v3212_v13 }
 0x301   :  { %5612 = vmatprep.subr.mxu0 %v5998_v2  ;;  %5605 = vmatprep.subr.mxu1 %v5998_v2 }
 0x302   :  { %5613 = vmatpush3.msra.mxu0 %v3319_v14  ;;  %5606 = vmatpush3.msra.mxu1 %v3211_v15 }
 0x303   :  { %5614 = vmatprep.subr.mxu0 %v5998_v2  ;;  %5607 = vmatprep.subr.mxu1 %v5998_v2 }
 0x304   :  { %5615 = vmatpush3.msra.mxu0 %v3318_v17  ;;  %5608 = vmatpush3.msra.mxu1 %v3210_v18  ;;  %v3498_v17 = vld [vmem:[#allocation8 + $0x20] sm:$0xff]  ;;  %v3497_v18 = vld [vmem:[#allocation8 + $0x18] sm:$0xff] }
 0x305   :  { %5609 = vmatprep.mubr.msk.f32.mxu1 %vm5999_vm0, %v5998_v2  ;;  %5616 = vmatprep.subr.mxu0 %v5998_v2 }
 0x306   :  { %5610 = vmatmul.mubr.msk.f32.vlgmr.msra.gmra.mxu1 %vm3206_vm4, %v6014_v54  ;;  %5617 = vmatpush3.msra.mxu0 %v3317_v19  ;;  %v3496_v19 = vld [vmem:[#allocation8 + $0x10] sm:$0xff] }
 0x307   :  { %5647 = vmatprep.subr.mxu1 %v5998_v2  ;;  %5618 = vmatprep.subr.mxu0 %v5998_v2 }
 0x308   :  { %5648 = vmatpush3.msra.mxu1 %v3413_v20  ;;  %5619 = vmatpush3.msra.mxu0 %v3316_v21  ;;  %v3495_v20 = vld [vmem:[#allocation8 + $0x8] sm:$0xff]  ;;  %v3494_v21 = vld [vmem:[#allocation8] sm:$0xff] }
 0x309   :  { %5649 = vmatprep.subr.mxu1 %v5998_v2  ;;  %5620 = vmatprep.subr.mxu0 %v5998_v2 }
 0x30a   :  { %5650 = vmatpush3.msra.mxu1 %v3412_v22  ;;  %5621 = vmatpush3.msra.mxu0 %v3315_v23  ;;  %v3603_v22 = vld [vmem:[%s6983_s5 + $0x78] sm:$0xff]  ;;  %v3602_v23 = vld [vmem:[%s6983_s5 + $0x70] sm:$0xff] }
 0x30b   :  { %5651 = vmatprep.subr.mxu1 %v5998_v2  ;;  %5622 = vmatprep.subr.mxu0 %v5998_v2 }
 0x30c   :  { %5652 = vmatpush3.msra.mxu1 %v3411_v24  ;;  %5623 = vmatpush3.msra.mxu0 %v3314_v25  ;;  %v3601_v24 = vld [vmem:[%s6983_s5 + $0x68] sm:$0xff]  ;;  %v3600_v25 = vld [vmem:[%s6983_s5 + $0x60] sm:$0xff] }
 0x30d   :  { %5653 = vmatprep.subr.mxu1 %v5998_v2  ;;  %5624 = vmatprep.subr.mxu0 %v5998_v2 }
 0x30e   :  { %5654 = vmatpush3.msra.mxu1 %v3410_v26  ;;  %5625 = vmatpush3.msra.mxu0 %v3313_v27  ;;  %v3599_v26 = vld [vmem:[%s6983_s5 + $0x58] sm:$0xff]  ;;  %v3598_v27 = vld [vmem:[%s6983_s5 + $0x50] sm:$0xff] }
 0x30f   :  { %5655 = vmatprep.subr.mxu1 %v5998_v2  ;;  %5626 = vmatprep.subr.mxu0 %v5998_v2 }
 0x310   :  { %5656 = vmatpush3.msra.mxu1 %v3409_v28  ;;  %5627 = vmatpush3.msra.mxu0 %v3312_v29  ;;  %v2258_v33 = vpop.f32.mrf.mxu0  ;;  %v3597_v28 = vld [vmem:[%s6983_s5 + $0x48] sm:$0xff]  ;;  %v3596_v29 = vld [vmem:[%s6983_s5 + $0x40] sm:$0xff] }
 0x311   :  { %5657 = vmatprep.subr.mxu1 %v5998_v2  ;;  %5628 = vmatprep.subr.mxu0 %v5998_v2  ;;  %v2262_v35 = vadd.f32 %v2258_v33, %v6827_v0  ;;  %v3508_v0 = vld [vmem:[#allocation8 + $0x70] sm:$0xff] }
 0x312   :  { %5658 = vmatpush3.msra.mxu1 %v3408_v30  ;;  %5629 = vmatpush3.msra.mxu0 %v3311_v31  ;;  %v5226_v36 = vpop.f32.mrf.mxu0  ;;  %v3595_v31 = vld [vmem:[%s6983_s5 + $0x38] sm:$0xff] }
 0x313   :  { %5659 = vmatprep.subr.mxu1 %v5998_v2  ;;  %5630 = vmatprep.subr.mxu0 %v5998_v2 }
 0x314   :  { %5660 = vmatpush3.msra.mxu1 %v3407_v32  ;;  %5631 = vmatpush3.msra.mxu0 %v3310_v34  ;;  %v3594_v34 = vld [vmem:[%s6983_s5 + $0x30] sm:$0xff] }
 0x315   :  { %5661 = vmatprep.subr.mxu1 %v5998_v2  ;;  %5632 = vmatprep.subr.mxu0 %v5998_v2 }
 0x316   :  { %5662 = vmatpush3.msra.mxu1 %v3406_v37  ;;  %5633 = vmatpush3.msra.mxu0 %v3309_v38  ;;  %v3592_v37 = vld [vmem:[%s6983_s5 + $0x20] sm:$0xff] }
 0x317   :  { %5663 = vmatprep.subr.mxu1 %v5998_v2  ;;  %5634 = vmatprep.subr.mxu0 %v5998_v2  ;;  %v2352_v43 = vpop.f32.mrf.mxu1  ;;  %v3299_v50 = vpop.permute.xlu1 %3298 }
 0x318   :  { %5664 = vmatpush3.msra.mxu1 %v3405_v39  ;;  %5635 = vmatpush3.msra.mxu0 %v3308_v40  ;;  %v2356_v44 = vadd.f32 %v2352_v43, %v2262_v35  ;;  %vm3300_vm5 = vcmp.eq.s32.totalorder %v6150_v51, %v3299_v50  ;;  %v3593_v35 = vld [vmem:[%s6983_s5 + $0x28] sm:$0xff]  ;;  %v3591_v40 = vld [vmem:[%s6983_s5 + $0x18] sm:$0xff] }
 0x319   :  { %5665 = vmatprep.subr.mxu1 %v5998_v2  ;;  %5636 = vmatprep.subr.mxu0 %v5998_v2  ;;  %v5261_v47 = vpop.f32.mrf.mxu1 }
 0x31a   :  { %5666 = vmatpush3.msra.mxu1 %v3404_v41  ;;  %5637 = vmatpush3.msra.mxu0 %v3307_v42 }
 0x31b   :  { %5667 = vmatprep.subr.mxu1 %v5998_v2  ;;  %5638 = vmatprep.subr.mxu0 %v5998_v2 }
 0x31c   :  { %5668 = vmatpush3.msra.mxu1 %v3403_v45  ;;  %5639 = vmatpush3.msra.mxu0 %v3306_v46 }
 0x31d   :  { %5669 = vmatprep.subr.mxu1 %v5998_v2  ;;  %5640 = vmatprep.subr.mxu0 %v5998_v2 }
 0x31e   :  { %5670 = vmatpush3.msra.mxu1 %v3402_v48  ;;  %5641 = vmatpush3.msra.mxu0 %v3305_v49  ;;  %v3393_v57 = vpop.permute.xlu0 %3392 }
 0x31f   :  { %5671 = vmatprep.subr.mxu1 %v5998_v2  ;;  %5642 = vmatprep.subr.mxu0 %v5998_v2  ;;  %vm3394_vm6 = vcmp.eq.s32.totalorder %v6150_v51, %v3393_v57 }
 0x320   :  { %5672 = vmatpush3.msra.mxu1 %v3401_v52  ;;  %5643 = vmatpush3.msra.mxu0 %v3304_v53 }
 0x321   :  { %5644 = vmatprep.mubr.msk.f32.mxu0 %vm5999_vm0, %v5998_v2  ;;  %5673 = vmatprep.subr.mxu1 %v5998_v2 }
 0x322   :  { %5645 = vmatmul.mubr.msk.f32.vlgmr.msra.gmra.mxu0 %vm3300_vm5, %v6014_v54  ;;  %5674 = vmatpush3.msra.mxu1 %v3400_v55 }
 0x323   :  { %5675 = vmatprep.subr.mxu1 %v5998_v2  ;;  %5679 = vmatprep.mubr.msk.f32.mxu1 %vm5999_vm0, %v5998_v2 }
 0x324   :  { %5676 = vmatpush3.msra.mxu1 %v3399_v56  ;;  %5682 = vmatprep.subr.mxu0 %v5998_v2 }
 0x325   :  { %5677 = vmatprep.subr.mxu1 %v5998_v2  ;;  %5714 = vmatprep.mubr.msk.f32.mxu0 %vm5999_vm0, %v5998_v2 }
 0x326   :  { %5678 = vmatpush3.msra.mxu1 %v3398_v58  ;;  %5683 = vmatpush3.msra.mxu0 %v3509_v9  ;;  %v3589_v9 = vld [vmem:[%s6983_s5 + $0x8] sm:$0xff] }
 0x327   :  { %5680 = vmatmul.mubr.msk.f32.vlgmr.msra.gmra.mxu1 %vm3394_vm6, %v6014_v54  ;;  %5717 = vmatprep.subr.mxu1 %v5998_v2  ;;  %v3506_v54 = vld [vmem:[#allocation8 + $0x60] sm:$0xff] }
 0x328   :  { %5749 = vmatprep.mubr.msk.f32.mxu1 %vm5999_vm0, %v5998_v2  ;;  %5684 = vmatprep.subr.mxu0 %v5998_v2  ;;  %vm3681_vm0 = vcmask 64512  }
 0x329   :  { %5685 = vmatpush3.msra.mxu0 %v3508_v0  ;;  %5718 = vmatpush3.msra.mxu1 %v3603_v22  ;;  %v3588_v0 = vld [vmem:[%s6983_s5] sm:$0xff] }
 0x32a   :  { %5686 = vmatprep.subr.mxu0 %v5998_v2  ;;  %5719 = vmatprep.subr.mxu1 %v5998_v2 }
 0x32b   :  { %5687 = vmatpush3.msra.mxu0 %v3507_v1  ;;  %5720 = vmatpush3.msra.mxu1 %v3602_v23  ;;  %v3774_v1 = vld [vmem:[#allocation10] ss:$0 sm:$0xff] }
 0x32c   :  { %5688 = vmatprep.subr.mxu0 %v5998_v2  ;;  %5721 = vmatprep.subr.mxu1 %v5998_v2 }
 0x32d   :  { %5689 = vmatpush3.msra.mxu0 %v3506_v54  ;;  %5722 = vmatpush3.msra.mxu1 %v3601_v24 }
 0x32e   :  { %5690 = vmatprep.subr.mxu0 %v5998_v2  ;;  %5723 = vmatprep.subr.mxu1 %v5998_v2 }
 0x32f   :  { %5691 = vmatpush3.msra.mxu0 %v3505_v3  ;;  %5724 = vmatpush3.msra.mxu1 %v3600_v25 }
 0x330   :  { %5692 = vmatprep.subr.mxu0 %v5998_v2  ;;  %5725 = vmatprep.subr.mxu1 %v5998_v2 }
 0x331   :  { %5693 = vmatpush3.msra.mxu0 %v3504_v4  ;;  %5726 = vmatpush3.msra.mxu1 %v3599_v26 }
 0x332   :  { %5694 = vmatprep.subr.mxu0 %v5998_v2  ;;  %5727 = vmatprep.subr.mxu1 %v5998_v2 }
 0x333   :  { %5695 = vmatpush3.msra.mxu0 %v3503_v5  ;;  %5728 = vmatpush3.msra.mxu1 %v3598_v27 }
 0x334   :  { %v2446_v59 = vpop.f32.mrf.mxu0  ;;  %5696 = vmatprep.subr.mxu0 %v5998_v2  ;;  %5729 = vmatprep.subr.mxu1 %v5998_v2 }
 0x335   :  { %v2450_v60 = vadd.f32 %v2446_v59, %v2356_v44  ;;  %5697 = vmatpush3.msra.mxu0 %v3502_v6  ;;  %5730 = vmatpush3.msra.mxu1 %v3597_v28  ;;  %v3773_v59 = vld [vmem:[#allocation7] ss:$0 sm:$0xff]  ;;  %v3775_v6 = vld [vmem:[#allocation11] ss:$0 sm:$0xff] }
 0x336   :  { %v5296_v61 = vpop.f32.mrf.mxu0  ;;  %5698 = vmatprep.subr.mxu0 %v5998_v2  ;;  %5731 = vmatprep.subr.mxu1 %v5998_v2 }
 0x337   :  { %5699 = vmatpush3.msra.mxu0 %v3501_v7  ;;  %5732 = vmatpush3.msra.mxu1 %v3596_v29 }
 0x338   :  { %5700 = vmatprep.subr.mxu0 %v5998_v2  ;;  %5733 = vmatprep.subr.mxu1 %v5998_v2 }
 0x339   :  { %5701 = vmatpush3.msra.mxu0 %v3500_v10  ;;  %5734 = vmatpush3.msra.mxu1 %v3595_v31 }
 0x33a   :  { %5702 = vmatprep.subr.mxu0 %v5998_v2  ;;  %5735 = vmatprep.subr.mxu1 %v5998_v2 }
 0x33b   :  { %v2540_v62 = vpop.f32.mrf.mxu1  ;;  %5703 = vmatpush3.msra.mxu0 %v3499_v16  ;;  %5736 = vmatpush3.msra.mxu1 %v3594_v34 }
 0x33c   :  { %v2544_v51 = vadd.f32 %v2540_v62, %v2450_v60  ;;  %5704 = vmatprep.subr.mxu0 %v5998_v2  ;;  %5737 = vmatprep.subr.mxu1 %v5998_v2 }
 0x33d   :  { %v5331_v63 = vpop.f32.mrf.mxu1  ;;  %5705 = vmatpush3.msra.mxu0 %v3498_v17  ;;  %5738 = vmatpush3.msra.mxu1 %v3593_v35 }
 0x33e   :  { %5706 = vmatprep.subr.mxu0 %v5998_v2  ;;  %5739 = vmatprep.subr.mxu1 %v5998_v2  ;;  %v3590_v63 = vld [vmem:[%s6983_s5 + $0x10] sm:$0xff] }
 0x33f   :  { %5707 = vmatpush3.msra.mxu0 %v3497_v18  ;;  %5740 = vmatpush3.msra.mxu1 %v3592_v37 }
 0x340   :  { %5708 = vmatprep.subr.mxu0 %v5998_v2  ;;  %5741 = vmatprep.subr.mxu1 %v5998_v2 }
 0x341   :  { %5709 = vmatpush3.msra.mxu0 %v3496_v19  ;;  %5742 = vmatpush3.msra.mxu1 %v3591_v40 }
 0x342   :  { %5710 = vmatprep.subr.mxu0 %v5998_v2  ;;  %5743 = vmatprep.subr.mxu1 %v5998_v2 }
 0x343   :  { %5711 = vmatpush3.msra.mxu0 %v3495_v20  ;;  %5744 = vmatpush3.msra.mxu1 %v3590_v63 }
 0x344   :  { %5712 = vmatprep.subr.mxu0 %v5998_v2  ;;  %5745 = vmatprep.subr.mxu1 %v5998_v2 }
 0x345   :  { %5713 = vmatpush3.msra.mxu0 %v3494_v21  ;;  %5746 = vmatpush3.msra.mxu1 %v3589_v9 }
 0x346   :  { %5747 = vmatprep.subr.mxu1 %v5998_v2 }
 0x347   :  { %5748 = vmatpush3.msra.mxu1 %v3588_v0 }
 0x358   :  { %v2634_v8 = vpop.f32.mrf.mxu0 }
 0x359   :  { %v2638_v11 = vadd.f32 %v2634_v8, %v2544_v51 }
 0x35a   :  { %v5366_v12 = vpop.f32.mrf.mxu0 }
 0x35f   :  { %v2728_v13 = vpop.f32.mrf.mxu1 }
 0x360   :  { %v2732_v14 = vadd.f32 %v2728_v13, %v2638_v11 }
 0x361   :  { %v5401_v15 = vpop.f32.mrf.mxu1 }
 0x37c   :  { %v2822_v30 = vpop.f32.mrf.mxu0 }
 0x37d   :  { %v2826_v33 = vadd.f32 %v2822_v30, %v2732_v14 }
 0x37e   :  { %v5436_v32 = vpop.f32.mrf.mxu0 }
 0x382   :  { %v2916_v36 = vpop.f32.mrf.mxu1 }
 0x383   :  { %v2920_v38 = vadd.f32 %v2916_v36, %v2826_v33 }
 0x384   :  { %v5471_v39 = vpop.f32.mrf.mxu1 }
 0x39e   :  { %v3010_v41 = vpop.f32.mrf.mxu0 }
 0x39f   :  { %v3014_v49 = vadd.f32 %v3010_v41, %v2920_v38 }
 0x3a0   :  { %v5506_v42 = vpop.f32.mrf.mxu0 }
 0x3a4   :  { %v3104_v43 = vpop.f32.mrf.mxu1 }
 0x3a5   :  { %v3108_v50 = vadd.f32 %v3104_v43, %v3014_v49 }
 0x3a6   :  { %v5541_v44 = vpop.f32.mrf.mxu1 }
 0x3c0   :  { %v3198_v45 = vpop.f32.mrf.mxu0 }
 0x3c1   :  { %v3202_v52 = vadd.f32 %v3198_v45, %v3108_v50 }
 0x3c2   :  { %v5576_v46 = vpop.f32.mrf.mxu0 }
 0x3c6   :  { %v3292_v47 = vpop.f32.mrf.mxu1 }
 0x3c7   :  { %v3296_v55 = vadd.f32 %v3292_v47, %v3202_v52 }
 0x3c8   :  { %v5611_v48 = vpop.f32.mrf.mxu1 }
 0x3e2   :  { %v3386_v53 = vpop.f32.mrf.mxu0 }
 0x3e3   :  { %v3390_v57 = vadd.f32 %v3386_v53, %v3296_v55 }
 0x3e4   :  { %v5646_v56 = vpop.f32.mrf.mxu0 }
 0x3e7   :  { %v3480_v58 = vpop.f32.mrf.mxu1 }
 0x3e8   :  { %v3484_v60 = vadd.f32 %v3480_v58, %v3390_v57 }
 0x3e9   :  { %v5681_v61 = vpop.f32.mrf.mxu1 }
 0x3ea   :  { %v3492_v62 = vadd.f32 %v3773_v59, %v3484_v60 }
 0x3ec   :  { %v3493_v51 = vmax.f32 %v3492_v62, 0.0 }
 0x3ee   :  { %5715 = vmatmul.mubr.f32.vlgmr.msra.gmra.mxu0 %v3493_v51 }
 0x4ae   :  { %v3583_v54 = vpop.f32.mrf.mxu0 }
 0x4af   :  { %v3584_v3 = vadd.f32 %v3774_v1, %v3583_v54 }
 0x4b0   :  { %v5716_v4 = vpop.f32.mrf.mxu0 }
 0x4b1   :  { %v3587_v5 = vmax.f32 %v3584_v3, 0.0 }
 0x4b3   :  { %5750 = vmatmul.mubr.f32.vlgmr.msra.gmra.mxu1 %v3587_v5 }
 0x573   :  { %v3677_v7 = vpop.f32.mrf.mxu1 }
 0x574   :  { %v3678_v8 = vadd.f32 %v3775_v6, %v3677_v7 }
 0x575   :  { %v5751_v10 = vpop.f32.mrf.mxu1 }
 0x576   :  { %3682 = vst.msk [vmem:[#allocation13] sm:$0xff] %vm3681_vm0, %v3678_v8 }
 0x577   :  { %5969 = shalt.err (!%p5966_p6)
}
 0x578   :  { %3692 = dma.vmem_to_hbm [thread:$0]  %s3690_s11, 128, %s6985_s7, [#allocation4]  }
 0x579   :  { %5986 = dma.done.wait [#allocation4], 128  }
 0x57a   :  { %5987 = vsyncadd [#allocation4], 4294967168 }
 0x57b   :  { %3696 = vsyncpa [#allocation3], 1 }
 0x57c   :  { %3697 = vsyncpa [#allocation6], 1 }
 0x57d   :  { %3698 = vsyncpa [#allocation9], 1 }
 0x57e   :  { %3699 = vsyncpa [#allocation12], 1 }
 0x57f   :  { %3700 = vsyncpa [#allocation4], 1 }

</bundles_post_ra>
